<compile_context>
chip_gen: v7x
topology: tpu7x:2x2x1
jax: 0.10.0
libtpu: 0.0.40
codegen_flags: <defaults>
</compile_context>

<pallas_src>
import jax
import jax.numpy as jnp
from jax.experimental import pallas as pl
from jax.experimental.pallas import tpu as pltpu

_BN_EPS = 1e-5


def _round_up(x, m):
    return ((x + m - 1) // m) * m


# ----------------------------------------------------------------------------
# Fused LinearBlock kernel: 5 stages + residual averages, one grid step / tile.
# ----------------------------------------------------------------------------
def _linear_block_kernel(alpha_ref,                      # SMEM (4,) f32 PReLU
                         x_ref,                          # (tm, K) bf16 row tile
                         w1_ref, b1_ref,                 # BN1 folded into lin1
                         s2_ref, t2_ref, w2_ref, b2_ref,  # BN3 folded into lin2
                         w3_ref, b3_ref,                 # stage 3: PReLU only
                         s4_ref, t4_ref, w4_ref, b4_ref,
                         s5_ref, t5_ref, w5_ref, b5_ref,  # s5 pre-scaled by 0.5
                         o_ref):                         # (tm, N) f32
    bf16 = jnp.bfloat16

    def affine_prelu_dot(h, s_ref, t_ref, alpha, w_ref, b_ref):
        h = h * s_ref[...] + t_ref[...]                  # BN affine (f32, VPU)
        h = jnp.where(h > 0, h, alpha * h)               # single-param PReLU
        return jnp.dot(h.astype(bf16), w_ref[...],
                       preferred_element_type=jnp.float32) + b_ref[...]

    x = x_ref[...]                                       # already bf16
    # lin1: BN1 pre-folded into (w1, b1); lin1 has no PReLU.
    y1 = jnp.dot(x, w1_ref[...],
                 preferred_element_type=jnp.float32) + b1_ref[...]
    y1c = y1.astype(bf16)                                # bf16 residual carry

    # lin2 (BN2 -> PReLU -> Linear); BN3 is already folded into w2/b2, so y2
    # arrives as the post-BN3 activation.
    y2 = affine_prelu_dot(y1, s2_ref, t2_ref, alpha_ref[0], w2_ref, b2_ref)
    # lin3: PReLU -> Linear (its BN was folded upstream).
    h3 = jnp.where(y2 > 0, y2, alpha_ref[1] * y2)
    y3 = jnp.dot(h3.astype(bf16), w3_ref[...],
                 preferred_element_type=jnp.float32) + b3_ref[...]

    xr = (y3 + y1c.astype(jnp.float32)) * 0.5            # residual average 1
    xrc = xr.astype(bf16)                                # bf16 residual carry

    y4 = affine_prelu_dot(xr, s4_ref, t4_ref, alpha_ref[2], w4_ref, b4_ref)
    z = y4 + xrc.astype(jnp.float32)                     # 0.5 folded into s5
    y5 = affine_prelu_dot(z, s5_ref, t5_ref, alpha_ref[3], w5_ref, b5_ref)
    o_ref[...] = y5.astype(o_ref.dtype)


# ----------------------------------------------------------------------------
# Parameter folding (exact, f32, prep-time)
# ----------------------------------------------------------------------------
def _bn_affine(bn):
    gamma, beta, mean, var = bn
    scale = gamma / jnp.sqrt(var + _BN_EPS)
    shift = beta - mean * scale
    return scale, shift


def _prep_params(params):
    s1, t1 = _bn_affine(params["bn1"])
    s2, t2 = _bn_affine(params["bn2"])
    s3, t3 = _bn_affine(params["bn3"])
    s4, t4 = _bn_affine(params["bn4"])
    s5, t5 = _bn_affine(params["bn5"])
    w1, b1 = params["lin1"]
    w2, b2 = params["lin2"]
    w3, b3 = params["lin3"]
    w4, b4 = params["lin4"]
    w5, b5 = params["lin5"]

    row = lambda v: v.reshape(1, -1).astype(jnp.float32)

    # Fold BN1 into lin1 (lin1 has no PReLU).
    w1f = (s1[:, None] * w1).astype(jnp.bfloat16)
    b1f = row(t1 @ w1 + b1)
    # Fold BN3 into lin2's weight/bias: y2 feeds only stage 3.
    w2f = (w2 * s3[None, :]).astype(jnp.bfloat16)
    b2f = row(b2 * s3 + t3)
    # Fold the final residual's 1/2 into BN5's scale.
    s5h = 0.5 * s5

    packed = [
        w1f, b1f,
        row(s2), row(t2), w2f, b2f,
        w3.astype(jnp.bfloat16), row(b3),
        row(s4), row(t4), w4.astype(jnp.bfloat16), row(b4),
        row(s5h), row(t5), w5.astype(jnp.bfloat16), row(b5),
    ]
    alphas = jnp.stack([jnp.asarray(params[f"prelu{i}"], jnp.float32)
                        for i in (2, 3, 4, 5)])
    return packed, alphas


# ----------------------------------------------------------------------------
# Row tiling: >=2 grid steps whenever possible, bf16 sublane-pack alignment.
# ----------------------------------------------------------------------------
def _choose_row_tiling(M, tm_target):
    Mp = _round_up(M, 16)                 # bf16 sublane packing is (16, 128)
    if Mp <= 16:
        return Mp, Mp                     # nothing to split
    tm = min(tm_target, Mp // 2)          # ensure >=2 grid steps (v7x megacore)
    align = 128 if tm >= 128 else 16
    tm = max(16, (tm // align) * align)
    Mp = _round_up(M, tm)
    return Mp, tm


# ----------------------------------------------------------------------------
# Wrapper: padding, VMEM budget, pallas_call
# ----------------------------------------------------------------------------
def linear_block_forward(params, x, *, tm_target=512):
    """Fused eval-mode LinearBlock forward. x: [M, n_feats] float."""
    M, K = x.shape
    N = params["lin5"][0].shape[1]

    packed, alphas = _prep_params(params)
    hidden = packed[0].shape[1]           # 6 * n_feats

    # bf16 activations at the input: BN1 is folded into w1/b1, so nothing
    # touches x in f32. Halves x DMA bytes and the double-buffered x tile.
    x = x.astype(jnp.bfloat16)

    Mp, tm = _choose_row_tiling(M, tm_target)
    if Mp != M:
        x = jnp.pad(x, ((0, Mp - M), (0, 0)))
    grid = (Mp // tm,)

    # Explicit VMEM budget: resident params (single-buffered) + double-buffered
    # x/out tiles + generous f32-intermediate estimate, 25% headroom, capped at
    # ~90% of the chip's VMEM (64 MiB v7x floor if the query is unavailable).
    param_bytes = sum(int(p.size) * p.dtype.itemsize for p in packed)
    io_bytes = 2 * (tm * K * 2 + tm * N * 4)
    live_bytes = 6 * tm * hidden * 4
    try:
        vmem_cap = int(pltpu.get_tpu_info().vmem_capacity_bytes)
    except Exception:
        vmem_cap = 64 * 2**20
    vmem_limit = int(min(max(1.25 * (param_bytes + io_bytes + live_bytes),
                             32 * 2**20),
                         0.9 * vmem_cap))

    def _run(const_pipeline_mode):
        const_specs = []
        for p in packed:
            if const_pipeline_mode is None:
                const_specs.append(pl.BlockSpec(p.shape, lambda i: (0, 0)))
            else:
                # Constant across the row grid -> no double buffering needed.
                const_specs.append(pl.BlockSpec(p.shape, lambda i: (0, 0),
                                                pipeline_mode=const_pipeline_mode))
        return pl.pallas_call(
            _linear_block_kernel,
            out_shape=jax.ShapeDtypeStruct((Mp, N), jnp.float32),
            grid_spec=pltpu.PrefetchScalarGridSpec(
                num_scalar_prefetch=0,
                grid=grid,
                in_specs=[
                    pl.BlockSpec(memory_space=pltpu.MemorySpace.SMEM),  # alphas
                    pl.BlockSpec((tm, K), lambda i: (i, 0)),            # x tile
                ] + const_specs,
                # Unpadded out block: last dim equals the full array dim (legal
                # for N < 128) -> no 4x padded HBM write, no wrapper N-slice.
                out_specs=pl.BlockSpec((tm, N), lambda i: (i, 0)),
            ),
            compiler_params=pltpu.CompilerParams(
                dimension_semantics=("parallel",),
                vmem_limit_bytes=vmem_limit),
        )(alphas, x, *packed)

    try:
        out = jax.block_until_ready(_run(pl.Buffered(1)))
    except Exception:
        # Fallback if this JAX build rejects single-buffered pipeline_mode.
        out = _run(None)

    return out[:M] if Mp != M else out


# ----------------------------------------------------------------------------
# Deterministic synthetic parameters (PyTorch-like init) and pure-JAX reference
# ----------------------------------------------------------------------------
def init_linear(key, fan_in, fan_out):
    k1, k2 = jax.random.split(key)
    bound = 1.0 / jnp.sqrt(fan_in)
    w = jax.random.uniform(k1, (fan_in, fan_out), jnp.float32, -bound, bound)
    b = jax.random.uniform(k2, (fan_out,), jnp.float32, -bound, bound)
    return w, b


def init_bn(key, feats):
    k1, k2, k3, k4 = jax.random.split(key, 4)
    gamma = 1.0 + 0.1 * jax.random.normal(k1, (feats,), jnp.float32)
    beta = 0.1 * jax.random.normal(k2, (feats,), jnp.float32)
    running_mean = 0.1 * jax.random.normal(k3, (feats,), jnp.float32)
    running_var = jax.random.uniform(k4, (feats,), jnp.float32, 0.5, 1.5)
    return gamma, beta, running_mean, running_var


def init_linear_block(key, n_feats):
    snd = 6 * n_feats
    dims = [(n_feats, snd), (snd, snd), (snd, snd), (snd, snd), (snd, n_feats)]
    keys = jax.random.split(key, 2 * len(dims))
    params = {}
    for i, (din, dout) in enumerate(dims):
        params[f"bn{i + 1}"] = init_bn(keys[2 * i], din)
        params[f"lin{i + 1}"] = init_linear(keys[2 * i + 1], din, dout)
        params[f"prelu{i + 1}"] = jnp.float32(0.25)   # nn.PReLU() default
    return params


def linear_block_reference(params, x):
    """Pure-JAX f32 reference matching the PyTorch forward (eval mode)."""
    def bn(h, p):
        gamma, beta, mean, var = p
        return (h - mean) / jnp.sqrt(var + _BN_EPS) * gamma + beta

    def prelu(h, a):
        return jnp.where(h > 0, h, a * h)

    def lin(h, p):
        w, b = p
        return h @ w + b

    x1 = lin(bn(x, params["bn1"]), params["lin1"])
    x2 = lin(prelu(bn(x1, params["bn2"]), params["prelu2"]), params["lin2"])
    x3 = lin(prelu(bn(x2, params["bn3"]), params["prelu3"]), params["lin3"])
    xr = (x3 + x1) / 2.0
    x4 = lin(prelu(bn(xr, params["bn4"]), params["prelu4"]), params["lin4"])
    xr = (x4 + xr) / 2.0
    return lin(prelu(bn(xr, params["bn5"]), params["prelu5"]), params["lin5"])


if __name__ == "__main__":
    n_feats = 32          # hidden_dim used by BiSemDRUG
    batch = 64            # node rows fed through the block

    root = jax.random.PRNGKey(0)
    k_param, k_x = jax.random.split(root)
    params = init_linear_block(k_param, n_feats)
    x = jax.random.normal(k_x, (batch, n_feats), jnp.float32)

    out = linear_block_forward(params, x)
    out = jax.block_until_ready(out)

    assert out.shape == (batch, n_feats), out.shape
    assert bool(jnp.all(jnp.isfinite(out)))

    ref = linear_block_reference(params, x)
    # bf16 MXU operands + bf16 residual carries (f32 accumulation) vs pure-f32
    # reference -> loose tolerance.
    assert bool(jnp.allclose(out, ref, rtol=5e-2, atol=5e-2)), (
        float(jnp.max(jnp.abs(out - ref))))
    print("KERNEL_OK")
</pallas_src>

<mosaic_0001>
module attributes {stable_mosaic.version = 11 : i64} {
  func.func @_linear_block_kernel(%arg0: i32, %arg1: memref<4xf32, #tpu.memory_space<smem>>, %arg2: memref<32x32xbf16, #tpu.memory_space<vmem>>, %arg3: memref<32x192xbf16, #tpu.memory_space<vmem>>, %arg4: memref<1x192xf32, #tpu.memory_space<vmem>>, %arg5: memref<1x192xf32, #tpu.memory_space<vmem>>, %arg6: memref<1x192xf32, #tpu.memory_space<vmem>>, %arg7: memref<192x192xbf16, #tpu.memory_space<vmem>>, %arg8: memref<1x192xf32, #tpu.memory_space<vmem>>, %arg9: memref<192x192xbf16, #tpu.memory_space<vmem>>, %arg10: memref<1x192xf32, #tpu.memory_space<vmem>>, %arg11: memref<1x192xf32, #tpu.memory_space<vmem>>, %arg12: memref<1x192xf32, #tpu.memory_space<vmem>>, %arg13: memref<192x192xbf16, #tpu.memory_space<vmem>>, %arg14: memref<1x192xf32, #tpu.memory_space<vmem>>, %arg15: memref<1x192xf32, #tpu.memory_space<vmem>>, %arg16: memref<1x192xf32, #tpu.memory_space<vmem>>, %arg17: memref<192x32xbf16, #tpu.memory_space<vmem>>, %arg18: memref<1x32xf32, #tpu.memory_space<vmem>>, %arg19: memref<32x32xf32, #tpu.memory_space<vmem>>) attributes {dimension_semantics = [#tpu.dimension_semantics<parallel>], iteration_bounds = array<i64: 2>, scalar_prefetch = 0 : i64, scratch_operands = 0 : i64, tpu.core_type = #tpu.core_type<tc>, window_params = [{transform_indices = @transform_0, window_bounds = array<i64: 4>}, {transform_indices = @transform_1, window_bounds = array<i64: 32, 32>}, {pipeline_mode = #tpu.pipeline_mode<synchronous>, transform_indices = @transform_2, window_bounds = array<i64: 32, 192>}, {pipeline_mode = #tpu.pipeline_mode<synchronous>, transform_indices = @transform_3, window_bounds = array<i64: 1, 192>}, {pipeline_mode = #tpu.pipeline_mode<synchronous>, transform_indices = @transform_4, window_bounds = array<i64: 1, 192>}, {pipeline_mode = #tpu.pipeline_mode<synchronous>, transform_indices = @transform_5, window_bounds = array<i64: 1, 192>}, {pipeline_mode = #tpu.pipeline_mode<synchronous>, transform_indices = @transform_6, window_bounds = array<i64: 192, 192>}, {pipeline_mode = #tpu.pipeline_mode<synchronous>, transform_indices = @transform_7, window_bounds = array<i64: 1, 192>}, {pipeline_mode = #tpu.pipeline_mode<synchronous>, transform_indices = @transform_8, window_bounds = array<i64: 192, 192>}, {pipeline_mode = #tpu.pipeline_mode<synchronous>, transform_indices = @transform_9, window_bounds = array<i64: 1, 192>}, {pipeline_mode = #tpu.pipeline_mode<synchronous>, transform_indices = @transform_10, window_bounds = array<i64: 1, 192>}, {pipeline_mode = #tpu.pipeline_mode<synchronous>, transform_indices = @transform_11, window_bounds = array<i64: 1, 192>}, {pipeline_mode = #tpu.pipeline_mode<synchronous>, transform_indices = @transform_12, window_bounds = array<i64: 192, 192>}, {pipeline_mode = #tpu.pipeline_mode<synchronous>, transform_indices = @transform_13, window_bounds = array<i64: 1, 192>}, {pipeline_mode = #tpu.pipeline_mode<synchronous>, transform_indices = @transform_14, window_bounds = array<i64: 1, 192>}, {pipeline_mode = #tpu.pipeline_mode<synchronous>, transform_indices = @transform_15, window_bounds = array<i64: 1, 192>}, {pipeline_mode = #tpu.pipeline_mode<synchronous>, transform_indices = @transform_16, window_bounds = array<i64: 192, 32>}, {pipeline_mode = #tpu.pipeline_mode<synchronous>, transform_indices = @transform_17, window_bounds = array<i64: 1, 32>}, {transform_indices = @transform_18, window_bounds = array<i64: 32, 32>}]} {
    %c0 = arith.constant 0 : index
    %c0_0 = arith.constant 0 : index
    %0 = vector.load %arg2[%c0, %c0_0] : memref<32x32xbf16, #tpu.memory_space<vmem>>, vector<32x32xbf16>
    %c0_1 = arith.constant 0 : index
    %c0_2 = arith.constant 0 : index
    %1 = vector.load %arg3[%c0_1, %c0_2] : memref<32x192xbf16, #tpu.memory_space<vmem>>, vector<32x192xbf16>
    %cst = arith.constant dense<0.000000e+00> : vector<32x192xf32>
    %2 = tpu.matmul %0, %1, %cst {dimension_numbers = #tpu.dot_dimension_numbers<[1], [0], [0], [1], [0, 0, 1, 1], [], []>} : vector<32x32xbf16>, vector<32x192xbf16>, vector<32x192xf32> -> vector<32x192xf32>
    %c0_3 = arith.constant 0 : index
    %c0_4 = arith.constant 0 : index
    %3 = vector.load %arg4[%c0_3, %c0_4] : memref<1x192xf32, #tpu.memory_space<vmem>>, vector<1x192xf32>
    %4 = vector.broadcast %3 : vector<1x192xf32> to vector<32x192xf32>
    %5 = arith.addf %2, %4 : vector<32x192xf32>
    %6 = arith.truncf %5 : vector<32x192xf32> to vector<32x192xbf16>
    %c0_5 = arith.constant 0 : index
    %7 = memref.load %arg1[%c0_5] : memref<4xf32, #tpu.memory_space<smem>>
    %c0_6 = arith.constant 0 : index
    %c0_7 = arith.constant 0 : index
    %8 = vector.load %arg5[%c0_6, %c0_7] : memref<1x192xf32, #tpu.memory_space<vmem>>, vector<1x192xf32>
    %9 = vector.broadcast %8 : vector<1x192xf32> to vector<32x192xf32>
    %10 = arith.mulf %5, %9 : vector<32x192xf32>
    %c0_8 = arith.constant 0 : index
    %c0_9 = arith.constant 0 : index
    %11 = vector.load %arg6[%c0_8, %c0_9] : memref<1x192xf32, #tpu.memory_space<vmem>>, vector<1x192xf32>
    %12 = vector.broadcast %11 : vector<1x192xf32> to vector<32x192xf32>
    %13 = arith.addf %10, %12 : vector<32x192xf32>
    %cst_10 = arith.constant 0.000000e+00 : f32
    %14 = vector.broadcast %cst_10 : f32 to vector<32x192xf32>
    %15 = arith.cmpf ogt, %13, %14 : vector<32x192xf32>
    %16 = vector.broadcast %7 : f32 to vector<32x192xf32>
    %17 = arith.mulf %16, %13 : vector<32x192xf32>
    %18 = arith.select %15, %13, %17 : vector<32x192xi1>, vector<32x192xf32>
    %19 = arith.truncf %18 : vector<32x192xf32> to vector<32x192xbf16>
    %c0_11 = arith.constant 0 : index
    %c0_12 = arith.constant 0 : index
    %20 = vector.load %arg7[%c0_11, %c0_12] : memref<192x192xbf16, #tpu.memory_space<vmem>>, vector<192x192xbf16>
    %cst_13 = arith.constant dense<0.000000e+00> : vector<32x192xf32>
    %21 = tpu.matmul %19, %20, %cst_13 {dimension_numbers = #tpu.dot_dimension_numbers<[1], [0], [0], [1], [0, 0, 1, 1], [], []>} : vector<32x192xbf16>, vector<192x192xbf16>, vector<32x192xf32> -> vector<32x192xf32>
    %c0_14 = arith.constant 0 : index
    %c0_15 = arith.constant 0 : index
    %22 = vector.load %arg8[%c0_14, %c0_15] : memref<1x192xf32, #tpu.memory_space<vmem>>, vector<1x192xf32>
    %23 = vector.broadcast %22 : vector<1x192xf32> to vector<32x192xf32>
    %24 = arith.addf %21, %23 : vector<32x192xf32>
    %cst_16 = arith.constant 0.000000e+00 : f32
    %25 = vector.broadcast %cst_16 : f32 to vector<32x192xf32>
    %26 = arith.cmpf ogt, %24, %25 : vector<32x192xf32>
    %c1 = arith.constant 1 : index
    %27 = memref.load %arg1[%c1] : memref<4xf32, #tpu.memory_space<smem>>
    %28 = vector.broadcast %27 : f32 to vector<32x192xf32>
    %29 = arith.mulf %28, %24 : vector<32x192xf32>
    %30 = arith.select %26, %24, %29 : vector<32x192xi1>, vector<32x192xf32>
    %31 = arith.truncf %30 : vector<32x192xf32> to vector<32x192xbf16>
    %c0_17 = arith.constant 0 : index
    %c0_18 = arith.constant 0 : index
    %32 = vector.load %arg9[%c0_17, %c0_18] : memref<192x192xbf16, #tpu.memory_space<vmem>>, vector<192x192xbf16>
    %cst_19 = arith.constant dense<0.000000e+00> : vector<32x192xf32>
    %33 = tpu.matmul %31, %32, %cst_19 {dimension_numbers = #tpu.dot_dimension_numbers<[1], [0], [0], [1], [0, 0, 1, 1], [], []>} : vector<32x192xbf16>, vector<192x192xbf16>, vector<32x192xf32> -> vector<32x192xf32>
    %c0_20 = arith.constant 0 : index
    %c0_21 = arith.constant 0 : index
    %34 = vector.load %arg10[%c0_20, %c0_21] : memref<1x192xf32, #tpu.memory_space<vmem>>, vector<1x192xf32>
    %35 = vector.broadcast %34 : vector<1x192xf32> to vector<32x192xf32>
    %36 = arith.addf %33, %35 : vector<32x192xf32>
    %37 = arith.extf %6 : vector<32x192xbf16> to vector<32x192xf32>
    %38 = arith.addf %36, %37 : vector<32x192xf32>
    %cst_22 = arith.constant 5.000000e-01 : f32
    %39 = vector.broadcast %cst_22 : f32 to vector<32x192xf32>
    %40 = arith.mulf %38, %39 : vector<32x192xf32>
    %41 = arith.truncf %40 : vector<32x192xf32> to vector<32x192xbf16>
    %c2 = arith.constant 2 : index
    %42 = memref.load %arg1[%c2] : memref<4xf32, #tpu.memory_space<smem>>
    %c0_23 = arith.constant 0 : index
    %c0_24 = arith.constant 0 : index
    %43 = vector.load %arg11[%c0_23, %c0_24] : memref<1x192xf32, #tpu.memory_space<vmem>>, vector<1x192xf32>
    %44 = vector.broadcast %43 : vector<1x192xf32> to vector<32x192xf32>
    %45 = arith.mulf %40, %44 : vector<32x192xf32>
    %c0_25 = arith.constant 0 : index
    %c0_26 = arith.constant 0 : index
    %46 = vector.load %arg12[%c0_25, %c0_26] : memref<1x192xf32, #tpu.memory_space<vmem>>, vector<1x192xf32>
    %47 = vector.broadcast %46 : vector<1x192xf32> to vector<32x192xf32>
    %48 = arith.addf %45, %47 : vector<32x192xf32>
    %cst_27 = arith.constant 0.000000e+00 : f32
    %49 = vector.broadcast %cst_27 : f32 to vector<32x192xf32>
    %50 = arith.cmpf ogt, %48, %49 : vector<32x192xf32>
    %51 = vector.broadcast %42 : f32 to vector<32x192xf32>
    %52 = arith.mulf %51, %48 : vector<32x192xf32>
    %53 = arith.select %50, %48, %52 : vector<32x192xi1>, vector<32x192xf32>
    %54 = arith.truncf %53 : vector<32x192xf32> to vector<32x192xbf16>
    %c0_28 = arith.constant 0 : index
    %c0_29 = arith.constant 0 : index
    %55 = vector.load %arg13[%c0_28, %c0_29] : memref<192x192xbf16, #tpu.memory_space<vmem>>, vector<192x192xbf16>
    %cst_30 = arith.constant dense<0.000000e+00> : vector<32x192xf32>
    %56 = tpu.matmul %54, %55, %cst_30 {dimension_numbers = #tpu.dot_dimension_numbers<[1], [0], [0], [1], [0, 0, 1, 1], [], []>} : vector<32x192xbf16>, vector<192x192xbf16>, vector<32x192xf32> -> vector<32x192xf32>
    %c0_31 = arith.constant 0 : index
    %c0_32 = arith.constant 0 : index
    %57 = vector.load %arg14[%c0_31, %c0_32] : memref<1x192xf32, #tpu.memory_space<vmem>>, vector<1x192xf32>
    %58 = vector.broadcast %57 : vector<1x192xf32> to vector<32x192xf32>
    %59 = arith.addf %56, %58 : vector<32x192xf32>
    %60 = arith.extf %41 : vector<32x192xbf16> to vector<32x192xf32>
    %61 = arith.addf %59, %60 : vector<32x192xf32>
    %c3 = arith.constant 3 : index
    %62 = memref.load %arg1[%c3] : memref<4xf32, #tpu.memory_space<smem>>
    %c0_33 = arith.constant 0 : index
    %c0_34 = arith.constant 0 : index
    %63 = vector.load %arg15[%c0_33, %c0_34] : memref<1x192xf32, #tpu.memory_space<vmem>>, vector<1x192xf32>
    %64 = vector.broadcast %63 : vector<1x192xf32> to vector<32x192xf32>
    %65 = arith.mulf %61, %64 : vector<32x192xf32>
    %c0_35 = arith.constant 0 : index
    %c0_36 = arith.constant 0 : index
    %66 = vector.load %arg16[%c0_35, %c0_36] : memref<1x192xf32, #tpu.memory_space<vmem>>, vector<1x192xf32>
    %67 = vector.broadcast %66 : vector<1x192xf32> to vector<32x192xf32>
    %68 = arith.addf %65, %67 : vector<32x192xf32>
    %cst_37 = arith.constant 0.000000e+00 : f32
    %69 = vector.broadcast %cst_37 : f32 to vector<32x192xf32>
    %70 = arith.cmpf ogt, %68, %69 : vector<32x192xf32>
    %71 = vector.broadcast %62 : f32 to vector<32x192xf32>
    %72 = arith.mulf %71, %68 : vector<32x192xf32>
    %73 = arith.select %70, %68, %72 : vector<32x192xi1>, vector<32x192xf32>
    %74 = arith.truncf %73 : vector<32x192xf32> to vector<32x192xbf16>
    %c0_38 = arith.constant 0 : index
    %c0_39 = arith.constant 0 : index
    %75 = vector.load %arg17[%c0_38, %c0_39] : memref<192x32xbf16, #tpu.memory_space<vmem>>, vector<192x32xbf16>
    %cst_40 = arith.constant dense<0.000000e+00> : vector<32x32xf32>
    %76 = tpu.matmul %74, %75, %cst_40 {dimension_numbers = #tpu.dot_dimension_numbers<[1], [0], [0], [1], [0, 0, 1, 1], [], []>} : vector<32x192xbf16>, vector<192x32xbf16>, vector<32x32xf32> -> vector<32x32xf32>
    %c0_41 = arith.constant 0 : index
    %c0_42 = arith.constant 0 : index
    %77 = vector.load %arg18[%c0_41, %c0_42] : memref<1x32xf32, #tpu.memory_space<vmem>>, vector<1x32xf32>
    %78 = vector.broadcast %77 : vector<1x32xf32> to vector<32x32xf32>
    %79 = arith.addf %76, %78 : vector<32x32xf32>
    %c0_43 = arith.constant 0 : index
    %c0_44 = arith.constant 0 : index
    %80 = vector.load %arg19[%c0_43, %c0_44] : memref<32x32xf32, #tpu.memory_space<vmem>>, vector<32x32xf32>
    tpu.vector_store %arg19[%c0_43, %c0_44], %79 {strides = array<i32>} : memref<32x32xf32, #tpu.memory_space<vmem>>, vector<32x32xf32>,
    return
  }
  func.func @transform_0(%arg0: i32) -> i32 {
    %c0_i32 = arith.constant 0 : i32
    %c0_i32_0 = arith.constant 0 : i32
    return %c0_i32 : i32
  }
  func.func @transform_1(%arg0: i32) -> (i32, i32) {
    %c0_i32 = arith.constant 0 : i32
    %c0_i32_0 = arith.constant 0 : i32
    return %arg0, %c0_i32 : i32, i32
  }
  func.func @transform_2(%arg0: i32) -> (i32, i32) {
    %c0_i32 = arith.constant 0 : i32
    %c0_i32_0 = arith.constant 0 : i32
    %c0_i32_1 = arith.constant 0 : i32
    return %c0_i32, %c0_i32_0 : i32, i32
  }
  func.func @transform_3(%arg0: i32) -> (i32, i32) {
    %c0_i32 = arith.constant 0 : i32
    %c0_i32_0 = arith.constant 0 : i32
    %c0_i32_1 = arith.constant 0 : i32
    return %c0_i32, %c0_i32_0 : i32, i32
  }
  func.func @transform_4(%arg0: i32) -> (i32, i32) {
    %c0_i32 = arith.constant 0 : i32
    %c0_i32_0 = arith.constant 0 : i32
    %c0_i32_1 = arith.constant 0 : i32
    return %c0_i32, %c0_i32_0 : i32, i32
  }
  func.func @transform_5(%arg0: i32) -> (i32, i32) {
    %c0_i32 = arith.constant 0 : i32
    %c0_i32_0 = arith.constant 0 : i32
    %c0_i32_1 = arith.constant 0 : i32
    return %c0_i32, %c0_i32_0 : i32, i32
  }
  func.func @transform_6(%arg0: i32) -> (i32, i32) {
    %c0_i32 = arith.constant 0 : i32
    %c0_i32_0 = arith.constant 0 : i32
    %c0_i32_1 = arith.constant 0 : i32
    return %c0_i32, %c0_i32_0 : i32, i32
  }
  func.func @transform_7(%arg0: i32) -> (i32, i32) {
    %c0_i32 = arith.constant 0 : i32
    %c0_i32_0 = arith.constant 0 : i32
    %c0_i32_1 = arith.constant 0 : i32
    return %c0_i32, %c0_i32_0 : i32, i32
  }
  func.func @transform_8(%arg0: i32) -> (i32, i32) {
    %c0_i32 = arith.constant 0 : i32
    %c0_i32_0 = arith.constant 0 : i32
    %c0_i32_1 = arith.constant 0 : i32
    return %c0_i32, %c0_i32_0 : i32, i32
  }
  func.func @transform_9(%arg0: i32) -> (i32, i32) {
    %c0_i32 = arith.constant 0 : i32
    %c0_i32_0 = arith.constant 0 : i32
    %c0_i32_1 = arith.constant 0 : i32
    return %c0_i32, %c0_i32_0 : i32, i32
  }
  func.func @transform_10(%arg0: i32) -> (i32, i32) {
    %c0_i32 = arith.constant 0 : i32
    %c0_i32_0 = arith.constant 0 : i32
    %c0_i32_1 = arith.constant 0 : i32
    return %c0_i32, %c0_i32_0 : i32, i32
  }
  func.func @transform_11(%arg0: i32) -> (i32, i32) {
    %c0_i32 = arith.constant 0 : i32
    %c0_i32_0 = arith.constant 0 : i32
    %c0_i32_1 = arith.constant 0 : i32
    return %c0_i32, %c0_i32_0 : i32, i32
  }
  func.func @transform_12(%arg0: i32) -> (i32, i32) {
    %c0_i32 = arith.constant 0 : i32
    %c0_i32_0 = arith.constant 0 : i32
    %c0_i32_1 = arith.constant 0 : i32
    return %c0_i32, %c0_i32_0 : i32, i32
  }
  func.func @transform_13(%arg0: i32) -> (i32, i32) {
    %c0_i32 = arith.constant 0 : i32
    %c0_i32_0 = arith.constant 0 : i32
    %c0_i32_1 = arith.constant 0 : i32
    return %c0_i32, %c0_i32_0 : i32, i32
  }
  func.func @transform_14(%arg0: i32) -> (i32, i32) {
    %c0_i32 = arith.constant 0 : i32
    %c0_i32_0 = arith.constant 0 : i32
    %c0_i32_1 = arith.constant 0 : i32
    return %c0_i32, %c0_i32_0 : i32, i32
  }
  func.func @transform_15(%arg0: i32) -> (i32, i32) {
    %c0_i32 = arith.constant 0 : i32
    %c0_i32_0 = arith.constant 0 : i32
    %c0_i32_1 = arith.constant 0 : i32
    return %c0_i32, %c0_i32_0 : i32, i32
  }
  func.func @transform_16(%arg0: i32) -> (i32, i32) {
    %c0_i32 = arith.constant 0 : i32
    %c0_i32_0 = arith.constant 0 : i32
    %c0_i32_1 = arith.constant 0 : i32
    return %c0_i32, %c0_i32_0 : i32, i32
  }
  func.func @transform_17(%arg0: i32) -> (i32, i32) {
    %c0_i32 = arith.constant 0 : i32
    %c0_i32_0 = arith.constant 0 : i32
    %c0_i32_1 = arith.constant 0 : i32
    return %c0_i32, %c0_i32_0 : i32, i32
  }
  func.func @transform_18(%arg0: i32) -> (i32, i32) {
    %c0_i32 = arith.constant 0 : i32
    %c0_i32_0 = arith.constant 0 : i32
    return %arg0, %c0_i32 : i32, i32
  }
}

module attributes {stable_mosaic.version = 11 : i64} {
  func.func @_linear_block_kernel(%arg0: i32, %arg1: memref<4xf32, #tpu.memory_space<smem>>, %arg2: memref<32x32xbf16, #tpu.memory_space<vmem>>, %arg3: memref<32x192xbf16, #tpu.memory_space<vmem>>, %arg4: memref<1x192xf32, #tpu.memory_space<vmem>>, %arg5: memref<1x192xf32, #tpu.memory_space<vmem>>, %arg6: memref<1x192xf32, #tpu.memory_space<vmem>>, %arg7: memref<192x192xbf16, #tpu.memory_space<vmem>>, %arg8: memref<1x192xf32, #tpu.memory_space<vmem>>, %arg9: memref<192x192xbf16, #tpu.memory_space<vmem>>, %arg10: memref<1x192xf32, #tpu.memory_space<vmem>>, %arg11: memref<1x192xf32, #tpu.memory_space<vmem>>, %arg12: memref<1x192xf32, #tpu.memory_space<vmem>>, %arg13: memref<192x192xbf16, #tpu.memory_space<vmem>>, %arg14: memref<1x192xf32, #tpu.memory_space<vmem>>, %arg15: memref<1x192xf32, #tpu.memory_space<vmem>>, %arg16: memref<1x192xf32, #tpu.memory_space<vmem>>, %arg17: memref<192x32xbf16, #tpu.memory_space<vmem>>, %arg18: memref<1x32xf32, #tpu.memory_space<vmem>>, %arg19: memref<32x32xf32, #tpu.memory_space<vmem>>) attributes {dimension_semantics = [#tpu.dimension_semantics<parallel>], iteration_bounds = array<i64: 2>, scalar_prefetch = 0 : i64, scratch_operands = 0 : i64, tpu.core_type = #tpu.core_type<tc>, window_params = [{transform_indices = @transform_0, window_bounds = array<i64: 4>}, {transform_indices = @transform_1, window_bounds = array<i64: 32, 32>}, {pipeline_mode = #tpu.pipeline_mode<synchronous>, transform_indices = @transform_2, window_bounds = array<i64: 32, 192>}, {pipeline_mode = #tpu.pipeline_mode<synchronous>, transform_indices = @transform_3, window_bounds = array<i64: 1, 192>}, {pipeline_mode = #tpu.pipeline_mode<synchronous>, transform_indices = @transform_4, window_bounds = array<i64: 1, 192>}, {pipeline_mode = #tpu.pipeline_mode<synchronous>, transform_indices = @transform_5, window_bounds = array<i64: 1, 192>}, {pipeline_mode = #tpu.pipeline_mode<synchronous>, transform_indices = @transform_6, window_bounds = array<i64: 192, 192>}, {pipeline_mode = #tpu.pipeline_mode<synchronous>, transform_indices = @transform_7, window_bounds = array<i64: 1, 192>}, {pipeline_mode = #tpu.pipeline_mode<synchronous>, transform_indices = @transform_8, window_bounds = array<i64: 192, 192>}, {pipeline_mode = #tpu.pipeline_mode<synchronous>, transform_indices = @transform_9, window_bounds = array<i64: 1, 192>}, {pipeline_mode = #tpu.pipeline_mode<synchronous>, transform_indices = @transform_10, window_bounds = array<i64: 1, 192>}, {pipeline_mode = #tpu.pipeline_mode<synchronous>, transform_indices = @transform_11, window_bounds = array<i64: 1, 192>}, {pipeline_mode = #tpu.pipeline_mode<synchronous>, transform_indices = @transform_12, window_bounds = array<i64: 192, 192>}, {pipeline_mode = #tpu.pipeline_mode<synchronous>, transform_indices = @transform_13, window_bounds = array<i64: 1, 192>}, {pipeline_mode = #tpu.pipeline_mode<synchronous>, transform_indices = @transform_14, window_bounds = array<i64: 1, 192>}, {pipeline_mode = #tpu.pipeline_mode<synchronous>, transform_indices = @transform_15, window_bounds = array<i64: 1, 192>}, {pipeline_mode = #tpu.pipeline_mode<synchronous>, transform_indices = @transform_16, window_bounds = array<i64: 192, 32>}, {pipeline_mode = #tpu.pipeline_mode<synchronous>, transform_indices = @transform_17, window_bounds = array<i64: 1, 32>}, {transform_indices = @transform_18, window_bounds = array<i64: 32, 32>}]} {
    %c0 = arith.constant 0 : index
    %c0_0 = arith.constant 0 : index
    %0 = vector.load %arg2[%c0, %c0_0] : memref<32x32xbf16, #tpu.memory_space<vmem>>, vector<32x32xbf16>
    %c0_1 = arith.constant 0 : index
    %c0_2 = arith.constant 0 : index
    %1 = vector.load %arg3[%c0_1, %c0_2] : memref<32x192xbf16, #tpu.memory_space<vmem>>, vector<32x192xbf16>
    %cst = arith.constant dense<0.000000e+00> : vector<32x192xf32>
    %2 = tpu.matmul %0, %1, %cst {dimension_numbers = #tpu.dot_dimension_numbers<[1], [0], [0], [1], [0, 0, 1, 1], [], []>} : vector<32x32xbf16>, vector<32x192xbf16>, vector<32x192xf32> -> vector<32x192xf32>
    %c0_3 = arith.constant 0 : index
    %c0_4 = arith.constant 0 : index
    %3 = vector.load %arg4[%c0_3, %c0_4] : memref<1x192xf32, #tpu.memory_space<vmem>>, vector<1x192xf32>
    %4 = vector.broadcast %3 : vector<1x192xf32> to vector<32x192xf32>
    %5 = arith.addf %2, %4 : vector<32x192xf32>
    %6 = arith.truncf %5 : vector<32x192xf32> to vector<32x192xbf16>
    %c0_5 = arith.constant 0 : index
    %7 = memref.load %arg1[%c0_5] : memref<4xf32, #tpu.memory_space<smem>>
    %c0_6 = arith.constant 0 : index
    %c0_7 = arith.constant 0 : index
    %8 = vector.load %arg5[%c0_6, %c0_7] : memref<1x192xf32, #tpu.memory_space<vmem>>, vector<1x192xf32>
    %9 = vector.broadcast %8 : vector<1x192xf32> to vector<32x192xf32>
    %10 = arith.mulf %5, %9 : vector<32x192xf32>
    %c0_8 = arith.constant 0 : index
    %c0_9 = arith.constant 0 : index
    %11 = vector.load %arg6[%c0_8, %c0_9] : memref<1x192xf32, #tpu.memory_space<vmem>>, vector<1x192xf32>
    %12 = vector.broadcast %11 : vector<1x192xf32> to vector<32x192xf32>
    %13 = arith.addf %10, %12 : vector<32x192xf32>
    %cst_10 = arith.constant 0.000000e+00 : f32
    %14 = vector.broadcast %cst_10 : f32 to vector<32x192xf32>
    %15 = arith.cmpf ogt, %13, %14 : vector<32x192xf32>
    %16 = vector.broadcast %7 : f32 to vector<32x192xf32>
    %17 = arith.mulf %16, %13 : vector<32x192xf32>
    %18 = arith.select %15, %13, %17 : vector<32x192xi1>, vector<32x192xf32>
    %19 = arith.truncf %18 : vector<32x192xf32> to vector<32x192xbf16>
    %c0_11 = arith.constant 0 : index
    %c0_12 = arith.constant 0 : index
    %20 = vector.load %arg7[%c0_11, %c0_12] : memref<192x192xbf16, #tpu.memory_space<vmem>>, vector<192x192xbf16>
    %cst_13 = arith.constant dense<0.000000e+00> : vector<32x192xf32>
    %21 = tpu.matmul %19, %20, %cst_13 {dimension_numbers = #tpu.dot_dimension_numbers<[1], [0], [0], [1], [0, 0, 1, 1], [], []>} : vector<32x192xbf16>, vector<192x192xbf16>, vector<32x192xf32> -> vector<32x192xf32>
    %c0_14 = arith.constant 0 : index
    %c0_15 = arith.constant 0 : index
    %22 = vector.load %arg8[%c0_14, %c0_15] : memref<1x192xf32, #tpu.memory_space<vmem>>, vector<1x192xf32>
    %23 = vector.broadcast %22 : vector<1x192xf32> to vector<32x192xf32>
    %24 = arith.addf %21, %23 : vector<32x192xf32>
    %cst_16 = arith.constant 0.000000e+00 : f32
    %25 = vector.broadcast %cst_16 : f32 to vector<32x192xf32>
    %26 = arith.cmpf ogt, %24, %25 : vector<32x192xf32>
    %c1 = arith.constant 1 : index
    %27 = memref.load %arg1[%c1] : memref<4xf32, #tpu.memory_space<smem>>
    %28 = vector.broadcast %27 : f32 to vector<32x192xf32>
    %29 = arith.mulf %28, %24 : vector<32x192xf32>
    %30 = arith.select %26, %24, %29 : vector<32x192xi1>, vector<32x192xf32>
    %31 = arith.truncf %30 : vector<32x192xf32> to vector<32x192xbf16>
    %c0_17 = arith.constant 0 : index
    %c0_18 = arith.constant 0 : index
    %32 = vector.load %arg9[%c0_17, %c0_18] : memref<192x192xbf16, #tpu.memory_space<vmem>>, vector<192x192xbf16>
    %cst_19 = arith.constant dense<0.000000e+00> : vector<32x192xf32>
    %33 = tpu.matmul %31, %32, %cst_19 {dimension_numbers = #tpu.dot_dimension_numbers<[1], [0], [0], [1], [0, 0, 1, 1], [], []>} : vector<32x192xbf16>, vector<192x192xbf16>, vector<32x192xf32> -> vector<32x192xf32>
    %c0_20 = arith.constant 0 : index
    %c0_21 = arith.constant 0 : index
    %34 = vector.load %arg10[%c0_20, %c0_21] : memref<1x192xf32, #tpu.memory_space<vmem>>, vector<1x192xf32>
    %35 = vector.broadcast %34 : vector<1x192xf32> to vector<32x192xf32>
    %36 = arith.addf %33, %35 : vector<32x192xf32>
    %37 = arith.extf %6 : vector<32x192xbf16> to vector<32x192xf32>
    %38 = arith.addf %36, %37 : vector<32x192xf32>
    %cst_22 = arith.constant 5.000000e-01 : f32
    %39 = vector.broadcast %cst_22 : f32 to vector<32x192xf32>
    %40 = arith.mulf %38, %39 : vector<32x192xf32>
    %41 = arith.truncf %40 : vector<32x192xf32> to vector<32x192xbf16>
    %c2 = arith.constant 2 : index
    %42 = memref.load %arg1[%c2] : memref<4xf32, #tpu.memory_space<smem>>
    %c0_23 = arith.constant 0 : index
    %c0_24 = arith.constant 0 : index
    %43 = vector.load %arg11[%c0_23, %c0_24] : memref<1x192xf32, #tpu.memory_space<vmem>>, vector<1x192xf32>
    %44 = vector.broadcast %43 : vector<1x192xf32> to vector<32x192xf32>
    %45 = arith.mulf %40, %44 : vector<32x192xf32>
    %c0_25 = arith.constant 0 : index
    %c0_26 = arith.constant 0 : index
    %46 = vector.load %arg12[%c0_25, %c0_26] : memref<1x192xf32, #tpu.memory_space<vmem>>, vector<1x192xf32>
    %47 = vector.broadcast %46 : vector<1x192xf32> to vector<32x192xf32>
    %48 = arith.addf %45, %47 : vector<32x192xf32>
    %cst_27 = arith.constant 0.000000e+00 : f32
    %49 = vector.broadcast %cst_27 : f32 to vector<32x192xf32>
    %50 = arith.cmpf ogt, %48, %49 : vector<32x192xf32>
    %51 = vector.broadcast %42 : f32 to vector<32x192xf32>
    %52 = arith.mulf %51, %48 : vector<32x192xf32>
    %53 = arith.select %50, %48, %52 : vector<32x192xi1>, vector<32x192xf32>
    %54 = arith.truncf %53 : vector<32x192xf32> to vector<32x192xbf16>
    %c0_28 = arith.constant 0 : index
    %c0_29 = arith.constant 0 : index
    %55 = vector.load %arg13[%c0_28, %c0_29] : memref<192x192xbf16, #tpu.memory_space<vmem>>, vector<192x192xbf16>
    %cst_30 = arith.constant dense<0.000000e+00> : vector<32x192xf32>
    %56 = tpu.matmul %54, %55, %cst_30 {dimension_numbers = #tpu.dot_dimension_numbers<[1], [0], [0], [1], [0, 0, 1, 1], [], []>} : vector<32x192xbf16>, vector<192x192xbf16>, vector<32x192xf32> -> vector<32x192xf32>
    %c0_31 = arith.constant 0 : index
    %c0_32 = arith.constant 0 : index
    %57 = vector.load %arg14[%c0_31, %c0_32] : memref<1x192xf32, #tpu.memory_space<vmem>>, vector<1x192xf32>
    %58 = vector.broadcast %57 : vector<1x192xf32> to vector<32x192xf32>
    %59 = arith.addf %56, %58 : vector<32x192xf32>
    %60 = arith.extf %41 : vector<32x192xbf16> to vector<32x192xf32>
    %61 = arith.addf %59, %60 : vector<32x192xf32>
    %c3 = arith.constant 3 : index
    %62 = memref.load %arg1[%c3] : memref<4xf32, #tpu.memory_space<smem>>
    %c0_33 = arith.constant 0 : index
    %c0_34 = arith.constant 0 : index
    %63 = vector.load %arg15[%c0_33, %c0_34] : memref<1x192xf32, #tpu.memory_space<vmem>>, vector<1x192xf32>
    %64 = vector.broadcast %63 : vector<1x192xf32> to vector<32x192xf32>
    %65 = arith.mulf %61, %64 : vector<32x192xf32>
    %c0_35 = arith.constant 0 : index
    %c0_36 = arith.constant 0 : index
    %66 = vector.load %arg16[%c0_35, %c0_36] : memref<1x192xf32, #tpu.memory_space<vmem>>, vector<1x192xf32>
    %67 = vector.broadcast %66 : vector<1x192xf32> to vector<32x192xf32>
    %68 = arith.addf %65, %67 : vector<32x192xf32>
    %cst_37 = arith.constant 0.000000e+00 : f32
    %69 = vector.broadcast %cst_37 : f32 to vector<32x192xf32>
    %70 = arith.cmpf ogt, %68, %69 : vector<32x192xf32>
    %71 = vector.broadcast %62 : f32 to vector<32x192xf32>
    %72 = arith.mulf %71, %68 : vector<32x192xf32>
    %73 = arith.select %70, %68, %72 : vector<32x192xi1>, vector<32x192xf32>
    %74 = arith.truncf %73 : vector<32x192xf32> to vector<32x192xbf16>
    %c0_38 = arith.constant 0 : index
    %c0_39 = arith.constant 0 : index
    %75 = vector.load %arg17[%c0_38, %c0_39] : memref<192x32xbf16, #tpu.memory_space<vmem>>, vector<192x32xbf16>
    %cst_40 = arith.constant dense<0.000000e+00> : vector<32x32xf32>
    %76 = tpu.matmul %74, %75, %cst_40 {dimension_numbers = #tpu.dot_dimension_numbers<[1], [0], [0], [1], [0, 0, 1, 1], [], []>} : vector<32x192xbf16>, vector<192x32xbf16>, vector<32x32xf32> -> vector<32x32xf32>
    %c0_41 = arith.constant 0 : index
    %c0_42 = arith.constant 0 : index
    %77 = vector.load %arg18[%c0_41, %c0_42] : memref<1x32xf32, #tpu.memory_space<vmem>>, vector<1x32xf32>
    %78 = vector.broadcast %77 : vector<1x32xf32> to vector<32x32xf32>
    %79 = arith.addf %76, %78 : vector<32x32xf32>
    %c0_43 = arith.constant 0 : index
    %c0_44 = arith.constant 0 : index
    %80 = vector.load %arg19[%c0_43, %c0_44] : memref<32x32xf32, #tpu.memory_space<vmem>>, vector<32x32xf32>
    tpu.vector_store %arg19[%c0_43, %c0_44], %79 {strides = array<i32>} : memref<32x32xf32, #tpu.memory_space<vmem>>, vector<32x32xf32>,
    return
  }
  func.func @transform_0(%arg0: i32) -> i32 {
    %c0_i32 = arith.constant 0 : i32
    %c0_i32_0 = arith.constant 0 : i32
    return %c0_i32 : i32
  }
  func.func @transform_1(%arg0: i32) -> (i32, i32) {
    %c0_i32 = arith.constant 0 : i32
    %c0_i32_0 = arith.constant 0 : i32
    return %arg0, %c0_i32 : i32, i32
  }
  func.func @transform_2(%arg0: i32) -> (i32, i32) {
    %c0_i32 = arith.constant 0 : i32
    %c0_i32_0 = arith.constant 0 : i32
    %c0_i32_1 = arith.constant 0 : i32
    return %c0_i32, %c0_i32_0 : i32, i32
  }
  func.func @transform_3(%arg0: i32) -> (i32, i32) {
    %c0_i32 = arith.constant 0 : i32
    %c0_i32_0 = arith.constant 0 : i32
    %c0_i32_1 = arith.constant 0 : i32
    return %c0_i32, %c0_i32_0 : i32, i32
  }
  func.func @transform_4(%arg0: i32) -> (i32, i32) {
    %c0_i32 = arith.constant 0 : i32
    %c0_i32_0 = arith.constant 0 : i32
    %c0_i32_1 = arith.constant 0 : i32
    return %c0_i32, %c0_i32_0 : i32, i32
  }
  func.func @transform_5(%arg0: i32) -> (i32, i32) {
    %c0_i32 = arith.constant 0 : i32
    %c0_i32_0 = arith.constant 0 : i32
    %c0_i32_1 = arith.constant 0 : i32
    return %c0_i32, %c0_i32_0 : i32, i32
  }
  func.func @transform_6(%arg0: i32) -> (i32, i32) {
    %c0_i32 = arith.constant 0 : i32
    %c0_i32_0 = arith.constant 0 : i32
    %c0_i32_1 = arith.constant 0 : i32
    return %c0_i32, %c0_i32_0 : i32, i32
  }
  func.func @transform_7(%arg0: i32) -> (i32, i32) {
    %c0_i32 = arith.constant 0 : i32
    %c0_i32_0 = arith.constant 0 : i32
    %c0_i32_1 = arith.constant 0 : i32
    return %c0_i32, %c0_i32_0 : i32, i32
  }
  func.func @transform_8(%arg0: i32) -> (i32, i32) {
    %c0_i32 = arith.constant 0 : i32
    %c0_i32_0 = arith.constant 0 : i32
    %c0_i32_1 = arith.constant 0 : i32
    return %c0_i32, %c0_i32_0 : i32, i32
  }
  func.func @transform_9(%arg0: i32) -> (i32, i32) {
    %c0_i32 = arith.constant 0 : i32
    %c0_i32_0 = arith.constant 0 : i32
    %c0_i32_1 = arith.constant 0 : i32
    return %c0_i32, %c0_i32_0 : i32, i32
  }
  func.func @transform_10(%arg0: i32) -> (i32, i32) {
    %c0_i32 = arith.constant 0 : i32
    %c0_i32_0 = arith.constant 0 : i32
    %c0_i32_1 = arith.constant 0 : i32
    return %c0_i32, %c0_i32_0 : i32, i32
  }
  func.func @transform_11(%arg0: i32) -> (i32, i32) {
    %c0_i32 = arith.constant 0 : i32
    %c0_i32_0 = arith.constant 0 : i32
    %c0_i32_1 = arith.constant 0 : i32
    return %c0_i32, %c0_i32_0 : i32, i32
  }
  func.func @transform_12(%arg0: i32) -> (i32, i32) {
    %c0_i32 = arith.constant 0 : i32
    %c0_i32_0 = arith.constant 0 : i32
    %c0_i32_1 = arith.constant 0 : i32
    return %c0_i32, %c0_i32_0 : i32, i32
  }
  func.func @transform_13(%arg0: i32) -> (i32, i32) {
    %c0_i32 = arith.constant 0 : i32
    %c0_i32_0 = arith.constant 0 : i32
    %c0_i32_1 = arith.constant 0 : i32
    return %c0_i32, %c0_i32_0 : i32, i32
  }
  func.func @transform_14(%arg0: i32) -> (i32, i32) {
    %c0_i32 = arith.constant 0 : i32
    %c0_i32_0 = arith.constant 0 : i32
    %c0_i32_1 = arith.constant 0 : i32
    return %c0_i32, %c0_i32_0 : i32, i32
  }
  func.func @transform_15(%arg0: i32) -> (i32, i32) {
    %c0_i32 = arith.constant 0 : i32
    %c0_i32_0 = arith.constant 0 : i32
    %c0_i32_1 = arith.constant 0 : i32
    return %c0_i32, %c0_i32_0 : i32, i32
  }
  func.func @transform_16(%arg0: i32) -> (i32, i32) {
    %c0_i32 = arith.constant 0 : i32
    %c0_i32_0 = arith.constant 0 : i32
    %c0_i32_1 = arith.constant 0 : i32
    return %c0_i32, %c0_i32_0 : i32, i32
  }
  func.func @transform_17(%arg0: i32) -> (i32, i32) {
    %c0_i32 = arith.constant 0 : i32
    %c0_i32_0 = arith.constant 0 : i32
    %c0_i32_1 = arith.constant 0 : i32
    return %c0_i32, %c0_i32_0 : i32, i32
  }
  func.func @transform_18(%arg0: i32) -> (i32, i32) {
    %c0_i32 = arith.constant 0 : i32
    %c0_i32_0 = arith.constant 0 : i32
    return %arg0, %c0_i32 : i32, i32
  }
}

</mosaic_0001>

<bundles_post_ra>
// kernel: tpu_custom_call.1
= control target key start
LH: loop header
LB: loop body
LE: loop exit
PB: predicated region body
PF: predicated region fallthrough
CT: control target
= control target key end

     0   :  { %s3521_s0 = inlined_call_operand.hbm [shape: f32[4], index: 0, kind: input, shape index: {}]   ;;  %s3522_s1 = inlined_call_operand.vmem [shape: bf16[64,32], index: 1, kind: input, shape index: {}]   ;;  %s3523_s2 = inlined_call_operand.hbm [shape: bf16[32,192], index: 2, kind: input, shape index: {}]   ;;  %s3524_s3 = inlined_call_operand.hbm [shape: f32[1,192], index: 3, kind: input, shape index: {}]   ;;  %s3525_s4 = inlined_call_operand.hbm [shape: f32[1,192], index: 4, kind: input, shape index: {}]   ;;  %s3526_s5 = inlined_call_operand.hbm [shape: f32[1,192], index: 5, kind: input, shape index: {}]   ;;  %s3527_s6 = inlined_call_operand.vmem [shape: bf16[192,192], index: 6, kind: input, shape index: {}]   ;;  %s3528_s7 = inlined_call_operand.hbm [shape: f32[1,192], index: 7, kind: input, shape index: {}]   ;;  %s3529_s8 = inlined_call_operand.hbm [shape: bf16[192,192], index: 8, kind: input, shape index: {}]   ;;  %s3530_s9 = inlined_call_operand.hbm [shape: f32[1,192], index: 9, kind: input, shape index: {}]   ;;  %s3531_s10 = inlined_call_operand.hbm [shape: f32[1,192], index: 10, kind: input, shape index: {}]   ;;  %s3532_s11 = inlined_call_operand.hbm [shape: f32[1,192], index: 11, kind: input, shape index: {}]   ;;  %s3533_s12 = inlined_call_operand.hbm [shape: bf16[192,192], index: 12, kind: input, shape index: {}]   ;;  %s3534_s13 = inlined_call_operand.hbm [shape: f32[1,192], index: 13, kind: input, shape index: {}]   ;;  %s3535_s14 = inlined_call_operand.vmem [shape: f32[1,192], index: 14, kind: input, shape index: {}]   ;;  %s3536_s15 = inlined_call_operand.vmem [shape: f32[1,192], index: 15, kind: input, shape index: {}]   ;;  %s3537_s16 = inlined_call_operand.vmem [shape: bf16[192,32], index: 16, kind: input, shape index: {}]   ;;  %s3538_s17 = inlined_call_operand.vmem [shape: f32[1,32], index: 17, kind: input, shape index: {}]   ;;  %s3539_s18 = inlined_call_operand.vmem [shape: f32[64,32], index: 18, kind: output, shape index: {}]  }
   0x1   :  { %3549 = sst [smem:[#allocation28_spill]] %s3521_s0 }
   0x2   :  { %3550 = sst [smem:[#allocation29_spill]] %s3522_s1 }
   0x3   :  { %3551 = sst [smem:[#allocation30_spill]] %s3523_s2 }
   0x4   :  { %3552 = sst [smem:[#allocation31_spill]] %s3524_s3 }
   0x5   :  { %3553 = sst [smem:[#allocation32_spill]] %s3526_s5 }
   0x6   :  { %3554 = sst [smem:[#allocation33_spill]] %s3529_s8 }
   0x7   :  { %3555 = sst [smem:[#allocation34_spill]] %s3536_s15 }
   0x8   :  { %3556 = sst [smem:[#allocation35_spill]] %s3538_s17 }
   0x9   :  { %3557 = sst [smem:[#allocation36_spill]] %s3539_s18 }
   0xa   :  { %23 = vsyncpa [#allocation4], 0 }
   0xb   :  { %24 = vsyncpa [#allocation3], 0 }
   0xc   :  { %25 = vsyncpa [#allocation7], 0 }
   0xd   :  { %26 = vsyncpa [#allocation10], 0 }
   0xe   :  { %27 = vsyncpa [#allocation13], 0 }
   0xf   :  { %28 = vsyncpa [#allocation16], 0 }
  0x10   :  { %29 = vsyncpa [#allocation19], 0  ;;  %s2983_s27 = smov 0  }
  0x11 LB: > { %s2873_s28 = smov [#allocation6]   ;;  %s3542_s30 = sadd.s32 4294967295, %s2871_s27   ;;  %s2871_s27 = sphi %s2983_s27, %s35_s27  }
  0x12   : > { %s484_s29 = sshll.u32 %s2873_s28, 4  ;;  %p2119_p0 = scmp.ge.s32.totalorder %s2871_s27, 1  ;;  %s2997_s29 = int_to_ptr.vmem [resolvable:$true] %s484_s29 }
  0x13   : > { %p449_p1 = scmp.lt.s32.totalorder %s2871_s27, 3  ;;  %p2993_p2 = scmp.eq.s32.totalorder %s3542_s30, 0 }
  0x14   : > { %s2874_s1 = smov [#allocation9]   ;;  %s2875_s22 = smov [#allocation12]  }
  0x15   : > { %s3558_s0 = scalar_select %p2993_p2, 1, 0 }
  0x16   : > { %p2999_p3 = pnand %p2119_p0, %p449_p1  ;;  %s506_s20 = sshll.u32 %s2874_s1, 4  ;;  %s3005_s20 = int_to_ptr.vmem [resolvable:$true] %s506_s20 }
  0x17   : > { %s530_s2 = sshll.u32 %s2875_s22, 4  ;;  %s2876_s23 = smov [#allocation15]   ;;  %s3013_s2 = int_to_ptr.vmem [resolvable:$true] %s530_s2 }
  0x18   : > { %s3559_s19 = scalar_select %p2999_p3, 1, 0 }
  0x19   : > { %p2304_p4 = pneg %p2999_p3  ;;  %s3015_s24 = sshll.u32 %s2876_s23, 4  ;;  %s556_s24 = int_to_ptr.vmem [resolvable:$true] %s3015_s24 }
  0x1a   : > { %s3561_s3 = sld [smem:[#allocation31_spill]] }
  0x1b   : > { %p3009_p5 = pnand %p2993_p2, %p2304_p4 }
  0x1d   : > { %p3025_p7 = pneg %p3009_p5 }
  0x20   : > { %s2516_s28 = scalar_lea.hbm %s3561_s3, 32 }
  0x21   : > { %p2517_p6 = scmp.ne.s32.totalorder %s3561_s3, %s2516_s28  ;;  %p2523_p10 = scmp.lt.u32.totalorder %s2516_s28, %s3561_s3 }
  0x23   : > { %p2519_p8 = pnand %p3025_p7, %p2517_p6 }
  0x25   : > { %p2520_p9 = pneg %p2519_p8 }
  0x27   : > { %p2525_p11 = pnand %p2523_p10, %p2520_p9 }
  0x29   : > { %2528 = shalt.err (!%p2525_p11)
}
  0x2a   : > { %s2529_s30 = scalar_lea.vmem %s2997_s29, 32  ;;  %p2537_p1 = scmp.lt.s32.totalorder %s2997_s29, %s2997_s29 }
  0x2b   : > { %p2530_p12 = scmp.ne.s32.totalorder %s2997_s29, %s2529_s30  ;;  %p2538_p4 = scmp.lt.s32.totalorder %s2529_s30, %s2529_s30 }
  0x2d   : > { %p2532_p13 = pnand %p2530_p12, %p3025_p7  ;;  %p2539_p6 = por %p2538_p4, %p2537_p1 }
  0x2f   : > { %p2533_p0 = pneg %p2532_p13 }
  0x31   : > { %p2540_p8 = pnand %p2539_p6, %p2533_p0 }
  0x33   : > { %2543 = shalt.err (!%p2540_p8)
}
  0x34   : > { %2313 = dma.hbm_to_vmem [thread:$0]  (!%p3009_p5), %s3561_s3, 32, %s2997_s29, [#allocation7]  }
  0x35   : > { %s3563_s5 = sld [smem:[#allocation32_spill]] }
  0x3b   : > { %s2544_s22 = scalar_lea.hbm %s3563_s5, 32 }
  0x3c   : > { %p2545_p9 = scmp.ne.s32.totalorder %s3563_s5, %s2544_s22  ;;  %p2551_p12 = scmp.lt.u32.totalorder %s2544_s22, %s3563_s5 }
  0x3e   : > { %p2547_p10 = pnand %p2545_p9, %p3025_p7 }
  0x40   : > { %p2548_p11 = pneg %p2547_p10 }
  0x42   : > { %p2553_p13 = pnand %p2551_p12, %p2548_p11 }
  0x44   : > { %2556 = shalt.err (!%p2553_p13)
}
  0x45   : > { %s2557_s29 = scalar_lea.vmem %s3005_s20, 32  ;;  %p2565_p6 = scmp.lt.s32.totalorder %s3005_s20, %s3005_s20 }
  0x46   : > { %p2558_p0 = scmp.ne.s32.totalorder %s3005_s20, %s2557_s29  ;;  %p2566_p8 = scmp.lt.s32.totalorder %s2557_s29, %s2557_s29 }
  0x48   : > { %p2560_p1 = pnand %p2558_p0, %p3025_p7  ;;  %p2567_p9 = por %p2566_p8, %p2565_p6 }
  0x4a   : > { %p2561_p4 = pneg %p2560_p1 }
  0x4c   : > { %p2568_p10 = pnand %p2567_p9, %p2561_p4 }
  0x4e   : > { %2571 = shalt.err (!%p2568_p10)
}
  0x4f   : > { %2319 = dma.hbm_to_vmem [thread:$0]  (!%p3009_p5), %s3563_s5, 32, %s3005_s20, [#allocation10]  }
  0x50   : > { %s3564_s8 = sld [smem:[#allocation33_spill]] }
  0x56   : > { %s2572_s28 = scalar_lea.hbm %s3564_s8, 3072 }
  0x57   : > { %p2573_p11 = scmp.ne.s32.totalorder %s3564_s8, %s2572_s28  ;;  %p2579_p0 = scmp.lt.u32.totalorder %s2572_s28, %s3564_s8 }
  0x59   : > { %p2575_p12 = pnand %p2573_p11, %p3025_p7 }
  0x5b   : > { %p2576_p13 = pneg %p2575_p12 }
  0x5d   : > { %p2581_p1 = pnand %p2579_p0, %p2576_p13 }
  0x5f   : > { %2584 = shalt.err (!%p2581_p1)
}
  0x60   : > { %s2585_s20 = scalar_lea.vmem %s3013_s2, 3072  ;;  %p2593_p9 = scmp.lt.s32.totalorder %s3013_s2, %s3013_s2 }
  0x61   : > { %p2586_p4 = scmp.ne.s32.totalorder %s3013_s2, %s2585_s20  ;;  %p2594_p10 = scmp.lt.s32.totalorder %s2585_s20, %s2585_s20 }
  0x63   : > { %p2588_p6 = pnand %p2586_p4, %p3025_p7  ;;  %p2595_p11 = por %p2594_p10, %p2593_p9 }
  0x65   : > { %p2589_p8 = pneg %p2588_p6 }
  0x67   : > { %p2596_p12 = pnand %p2595_p11, %p2589_p8 }
  0x69   : > { %2599 = shalt.err (!%p2596_p12)
}
  0x6a   : > { %s3546_s29 = smov 128   ;;  %s3548_s15 = smov 8  }
  0x6b   : > { %2325 = dma.hbm_to_vmem [thread:$0]  (!%p3009_p5), %s3564_s8, 3072, %s3013_s2, [#allocation13], %s3546_s29, %s3546_s29, %s3548_s15  }
  0x6c   : > { %s2600_s1 = scalar_lea.hbm %s3531_s10, 32 }
  0x6d   : > { %p2601_p13 = scmp.ne.s32.totalorder %s3531_s10, %s2600_s1  ;;  %p2607_p4 = scmp.lt.u32.totalorder %s2600_s1, %s3531_s10 }
  0x6f   : > { %p2603_p0 = pnand %p2601_p13, %p3025_p7 }
  0x71   : > { %p2604_p1 = pneg %p2603_p0 }
  0x73   : > { %p2609_p6 = pnand %p2607_p4, %p2604_p1 }
  0x75   : > { %2612 = shalt.err (!%p2609_p6)
}
  0x76   : > { %s2613_s17 = scalar_lea.vmem %s556_s24, 32  ;;  %p2621_p11 = scmp.lt.s32.totalorder %s556_s24, %s556_s24 }
  0x77   : > { %p2614_p8 = scmp.ne.s32.totalorder %s556_s24, %s2613_s17  ;;  %p2622_p12 = scmp.lt.s32.totalorder %s2613_s17, %s2613_s17 }
  0x79   : > { %p2616_p9 = pnand %p2614_p8, %p3025_p7  ;;  %p2623_p2 = por %p2622_p12, %p2621_p11 }
  0x7b   : > { %p2617_p10 = pneg %p2616_p9 }
  0x7d   : > { %p2624_p3 = pnand %p2623_p2, %p2617_p10 }
  0x7f   : > { %2627 = shalt.err (!%p2624_p3)
}
  0x80   : > { %2331 = dma.hbm_to_vmem [thread:$0]  (!%p3009_p5), %s3531_s10, 32, %s556_s24, [#allocation16]  }
  0x81   : > { %s2879_s26 = smov [#allocation18]   ;;  %s2628_s23 = scalar_lea.hbm %s3533_s12, 3072 }
  0x82   : > { %s576_s28 = sshll.u32 %s2879_s26, 4  ;;  %p2629_p13 = scmp.ne.s32.totalorder %s3533_s12, %s2628_s23  ;;  %s577_s28 = int_to_ptr.vmem [resolvable:$true] %s576_s28 }
  0x83   : > { %p2635_p0 = scmp.lt.u32.totalorder %s2628_s23, %s3533_s12 }
  0x84   : > { %p2631_p2 = pnand %p2629_p13, %p3025_p7 }
  0x86   : > { %p2632_p3 = pneg %p2631_p2 }
  0x88   : > { %p2637_p1 = pnand %p2635_p0, %p2632_p3 }
  0x8a   : > { %2640 = shalt.err (!%p2637_p1)
}
  0x8b   : > { %s2641_s24 = scalar_lea.vmem %s577_s28, 3072  ;;  %p2649_p9 = scmp.lt.s32.totalorder %s577_s28, %s577_s28 }
  0x8c   : > { %p2642_p4 = scmp.ne.s32.totalorder %s577_s28, %s2641_s24  ;;  %p2650_p10 = scmp.lt.s32.totalorder %s2641_s24, %s2641_s24 }
  0x8e   : > { %p2644_p6 = pnand %p2642_p4, %p3025_p7  ;;  %p2651_p11 = por %p2650_p10, %p2649_p9 }
  0x90   : > { %p2645_p8 = pneg %p2644_p6 }
  0x92   : > { %p2652_p12 = pnand %p2651_p11, %p2645_p8 }
  0x94   : > { %2655 = shalt.err (!%p2652_p12)
}
  0x95   : > { %s3565_s2 = smov 128   ;;  %s3566_s22 = sld [smem:[#allocation28_spill]] }
  0x96   : > { %2337 = dma.hbm_to_vmem [thread:$0]  (!%p3009_p5), %s3533_s12, 3072, %s577_s28, [#allocation19], %s3565_s2, %s3565_s2, %s3548_s15  }
  0x9b   : > { %s2656_s23 = scalar_lea.hbm %s3566_s22, 16 }
  0x9c   : > { %p2657_p13 = scmp.ne.s32.totalorder %s3566_s22, %s2656_s23  ;;  %p2663_p0 = scmp.lt.u32.totalorder %s2656_s23, %s3566_s22 }
  0x9e   : > { %p2659_p2 = pnand %p2657_p13, %p3025_p7 }
  0xa0   : > { %p2660_p3 = pneg %p2659_p2 }
  0xa2   : > { %p2665_p1 = pnand %p2663_p0, %p2660_p3 }
  0xa4   : > { %2668 = shalt.err (!%p2665_p1)
}
  0xa5   : > { %s2880_s29 = smov [#allocation2]   ;;  %s2881_s26 = smov [#allocation5]  }
  0xa6   : > { %2307 = dma.hbm_to_smem (!%p3009_p5), %s3566_s22, 16, %s2880_s29, [#allocation4]  }
  0xa7   : > { %s470_s1 = sshll.u32 %s2881_s26, 4  ;;  %s2882_s30 = smov [#allocation8]   ;;  %s471_s1 = int_to_ptr.vmem [resolvable:$true] %s470_s1 }
  0xa8   : > { %s495_s20 = sshll.u32 %s2882_s30, 4  ;;  %s3567_s5 = sld [smem:[#allocation30_spill]]  ;;  %s496_s20 = int_to_ptr.vmem [resolvable:$true] %s495_s20 }
  0xae   : > { %s2669_s17 = scalar_lea.hbm %s3567_s5, 512 }
  0xaf   : > { %p2670_p4 = scmp.ne.s32.totalorder %s3567_s5, %s2669_s17  ;;  %p2676_p9 = scmp.lt.u32.totalorder %s2669_s17, %s3567_s5 }
  0xb1   : > { %p2672_p6 = pnand %p2670_p4, %p3025_p7 }
  0xb3   : > { %p2673_p8 = pneg %p2672_p6 }
  0xb5   : > { %p2678_p10 = pnand %p2676_p9, %p2673_p8 }
  0xb7   : > { %2681 = shalt.err (!%p2678_p10)
}
  0xb8   : > { %s2682_s29 = scalar_lea.vmem %s471_s1, 512  ;;  %p2690_p2 = scmp.lt.s32.totalorder %s471_s1, %s471_s1 }
  0xb9   : > { %p2683_p11 = scmp.ne.s32.totalorder %s471_s1, %s2682_s29  ;;  %p2691_p3 = scmp.lt.s32.totalorder %s2682_s29, %s2682_s29 }
  0xbb   : > { %p2685_p12 = pnand %p2683_p11, %p3025_p7  ;;  %p2692_p0 = por %p2691_p3, %p2690_p2 }
  0xbd   : > { %p2686_p13 = pneg %p2685_p12 }
  0xbf   : > { %p2693_p1 = pnand %p2692_p0, %p2686_p13 }
  0xc1   : > { %2696 = shalt.err (!%p2693_p1)
}
  0xc2   : > { %s3568_s3 = smov 8   ;;  %s2697_s30 = scalar_lea.hbm %s3525_s4, 32 }
  0xc3   : > { %2310 = dma.hbm_to_vmem [thread:$0]  (!%p3009_p5), %s3567_s5, 512, %s471_s1, [#allocation3], %s3565_s2, %s3565_s2, %s3568_s3  }
  0xc4   : > { %p2698_p4 = scmp.ne.s32.totalorder %s3525_s4, %s2697_s30  ;;  %p2704_p9 = scmp.lt.u32.totalorder %s2697_s30, %s3525_s4 }
  0xc6   : > { %p2700_p6 = pnand %p2698_p4, %p3025_p7 }
  0xc8   : > { %p2701_p8 = pneg %p2700_p6 }
  0xca   : > { %p2706_p10 = pnand %p2704_p9, %p2701_p8 }
  0xcc   : > { %2709 = shalt.err (!%p2706_p10)
}
  0xcd   : > { %s2710_s29 = scalar_lea.vmem %s496_s20, 32  ;;  %p2718_p2 = scmp.lt.s32.totalorder %s496_s20, %s496_s20 }
  0xce   : > { %p2711_p11 = scmp.ne.s32.totalorder %s496_s20, %s2710_s29  ;;  %p2719_p3 = scmp.lt.s32.totalorder %s2710_s29, %s2710_s29 }
  0xd0   : > { %p2713_p12 = pnand %p2711_p11, %p3025_p7  ;;  %p2720_p0 = por %p2719_p3, %p2718_p2 }
  0xd2   : > { %p2714_p13 = pneg %p2713_p12 }
  0xd4   : > { %p2721_p1 = pnand %p2720_p0, %p2714_p13 }
  0xd6   : > { %2724 = shalt.err (!%p2721_p1)
}
  0xd7   : > { %2316 = dma.hbm_to_vmem [thread:$0]  (!%p3009_p5), %s3525_s4, 32, %s496_s20, [#allocation7]  }
  0xd8   : > { %s2883_s3 = smov [#allocation11]   ;;  %s2884_s15 = smov [#allocation14]  }
  0xd9   : > { %s520_s8 = sshll.u32 %s2883_s3, 4  ;;  %s544_s25 = sshll.u32 %s2884_s15, 4  ;;  %s521_s8 = int_to_ptr.vmem [resolvable:$true] %s520_s8  ;;  %s545_s25 = int_to_ptr.vmem [resolvable:$true] %s544_s25 }
  0xda   : > { %s2725_s17 = scalar_lea.hbm %s3528_s7, 32 }
  0xdb   : > { %p2726_p4 = scmp.ne.s32.totalorder %s3528_s7, %s2725_s17  ;;  %p2732_p9 = scmp.lt.u32.totalorder %s2725_s17, %s3528_s7 }
  0xdd   : > { %p2728_p6 = pnand %p2726_p4, %p3025_p7 }
  0xdf   : > { %p2729_p8 = pneg %p2728_p6 }
  0xe1   : > { %p2734_p10 = pnand %p2732_p9, %p2729_p8 }
  0xe3   : > { %2737 = shalt.err (!%p2734_p10)
}
  0xe4   : > { %s2738_s20 = scalar_lea.vmem %s521_s8, 32  ;;  %p2746_p2 = scmp.lt.s32.totalorder %s521_s8, %s521_s8 }
  0xe5   : > { %p2739_p11 = scmp.ne.s32.totalorder %s521_s8, %s2738_s20  ;;  %p2747_p3 = scmp.lt.s32.totalorder %s2738_s20, %s2738_s20 }
  0xe7   : > { %p2741_p12 = pnand %p2739_p11, %p3025_p7  ;;  %p2748_p0 = por %p2747_p3, %p2746_p2 }
  0xe9   : > { %p2742_p13 = pneg %p2741_p12 }
  0xeb   : > { %p2749_p1 = pnand %p2748_p0, %p2742_p13 }
  0xed   : > { %2752 = shalt.err (!%p2749_p1)
}
  0xee   : > { %2322 = dma.hbm_to_vmem [thread:$0]  (!%p3009_p5), %s3528_s7, 32, %s521_s8, [#allocation10]  }
  0xef   : > { %s2753_s26 = scalar_lea.hbm %s3530_s9, 32 }
  0xf0   : > { %p2754_p4 = scmp.ne.s32.totalorder %s3530_s9, %s2753_s26  ;;  %p2760_p9 = scmp.lt.u32.totalorder %s2753_s26, %s3530_s9 }
  0xf2   : > { %p2756_p6 = pnand %p2754_p4, %p3025_p7 }
  0xf4   : > { %p2757_p8 = pneg %p2756_p6 }
  0xf6   : > { %p2762_p10 = pnand %p2760_p9, %p2757_p8 }
  0xf8   : > { %2765 = shalt.err (!%p2762_p10)
}
  0xf9   : > { %s2766_s28 = scalar_lea.vmem %s545_s25, 32  ;;  %p2774_p2 = scmp.lt.s32.totalorder %s545_s25, %s545_s25 }
  0xfa   : > { %p2767_p11 = scmp.ne.s32.totalorder %s545_s25, %s2766_s28  ;;  %p2775_p3 = scmp.lt.s32.totalorder %s2766_s28, %s2766_s28 }
  0xfc   : > { %p2769_p12 = pnand %p2767_p11, %p3025_p7  ;;  %p2776_p0 = por %p2775_p3, %p2774_p2 }
  0xfe   : > { %p2770_p13 = pneg %p2769_p12 }
 0x100   : > { %p2777_p1 = pnand %p2776_p0, %p2770_p13 }
 0x102   : > { %2780 = shalt.err (!%p2777_p1)
}
 0x103   : > { %2328 = dma.hbm_to_vmem [thread:$0]  (!%p3009_p5), %s3530_s9, 32, %s545_s25, [#allocation13]  }
 0x104   : > { %s2885_s20 = smov [#allocation17]   ;;  %s2886_s1 = smov [#allocation20]  }
 0x105   : > { %s566_s2 = sshll.u32 %s2885_s20, 4  ;;  %s590_s3 = sshll.u32 %s2886_s1, 4  ;;  %s567_s2 = int_to_ptr.vmem [resolvable:$true] %s566_s2  ;;  %s591_s3 = int_to_ptr.vmem [resolvable:$true] %s590_s3 }
 0x106   : > { %s2781_s30 = scalar_lea.hbm %s3532_s11, 32 }
 0x107   : > { %p2782_p4 = scmp.ne.s32.totalorder %s3532_s11, %s2781_s30  ;;  %p2788_p9 = scmp.lt.u32.totalorder %s2781_s30, %s3532_s11 }
 0x109   : > { %p2784_p6 = pnand %p2782_p4, %p3025_p7 }
 0x10b   : > { %p2785_p8 = pneg %p2784_p6 }
 0x10d   : > { %p2790_p10 = pnand %p2788_p9, %p2785_p8 }
 0x10f   : > { %2793 = shalt.err (!%p2790_p10)
}
 0x110   : > { %s2794_s25 = scalar_lea.vmem %s567_s2, 32  ;;  %p2802_p2 = scmp.lt.s32.totalorder %s567_s2, %s567_s2 }
 0x111   : > { %p2795_p11 = scmp.ne.s32.totalorder %s567_s2, %s2794_s25  ;;  %p2803_p3 = scmp.lt.s32.totalorder %s2794_s25, %s2794_s25 }
 0x113   : > { %p2797_p12 = pnand %p2795_p11, %p3025_p7  ;;  %p2804_p0 = por %p2803_p3, %p2802_p2 }
 0x115   : > { %p2798_p13 = pneg %p2797_p12 }
 0x117   : > { %p2805_p1 = pnand %p2804_p0, %p2798_p13 }
 0x119   : > { %2808 = shalt.err (!%p2805_p1)
}
 0x11a   : > { %2334 = dma.hbm_to_vmem [thread:$0]  (!%p3009_p5), %s3532_s11, 32, %s567_s2, [#allocation16]  }
 0x11b   : > { %s2809_s15 = scalar_lea.hbm %s3534_s13, 32 }
 0x11c   : > { %p2810_p4 = scmp.ne.s32.totalorder %s3534_s13, %s2809_s15  ;;  %p2816_p9 = scmp.lt.u32.totalorder %s2809_s15, %s3534_s13 }
 0x11e   : > { %p2812_p6 = pnand %p2810_p4, %p3025_p7 }
 0x120   : > { %p2813_p8 = pneg %p2812_p6 }
 0x122   : > { %p2818_p10 = pnand %p2816_p9, %p2813_p8 }
 0x124   : > { %2821 = shalt.err (!%p2818_p10)
}
 0x125   : > { %s2822_s24 = scalar_lea.vmem %s591_s3, 32  ;;  %p2830_p2 = scmp.lt.s32.totalorder %s591_s3, %s591_s3 }
 0x126   : > { %p2823_p11 = scmp.ne.s32.totalorder %s591_s3, %s2822_s24  ;;  %p2831_p3 = scmp.lt.s32.totalorder %s2822_s24, %s2822_s24 }
 0x128   : > { %p2825_p12 = pnand %p2823_p11, %p3025_p7  ;;  %p2832_p0 = por %p2831_p3, %p2830_p2 }
 0x12a   : > { %p2826_p13 = pneg %p2825_p12 }
 0x12c   : > { %p2833_p1 = pnand %p2832_p0, %p2826_p13 }
 0x12e   : > { %2836 = shalt.err (!%p2833_p1)
}
 0x12f   : > { %2340 = dma.hbm_to_vmem [thread:$0]  (!%p3009_p5), %s3534_s13, 32, %s591_s3, [#allocation19]  }
 0x130   : > { %p3569_p4 = scmp.ne.s32.totalorder %s3559_s19, 0 }
 0x131   : > { %p3570_p6 = scmp.ne.s32.totalorder (!%p3569_p4), %s3558_s0, 0 }
 0x132   : > { %624 = sbr.rel (%p3569_p4) target bundleno = 1474 (0x5c2), region = 92 }
 0x139   : > { %2842 = dma.done.wait (%p3570_p6), [#allocation4], 16  }
 0x13a   : > { %2844 = vsyncadd (%p3570_p6), [#allocation4], 4294967280 }
 0x13b   : > { %2846 = dma.done.wait (%p3570_p6), [#allocation3], 512  }
 0x13c   : > { %2848 = vsyncadd (%p3570_p6), [#allocation3], 4294966784 }
 0x13d   : > { %2850 = dma.done.wait (%p3570_p6), [#allocation7], 64  }
 0x13e   : > { %2852 = vsyncadd (%p3570_p6), [#allocation7], 4294967232 }
 0x13f   : > { %2854 = dma.done.wait (%p3570_p6), [#allocation10], 64  }
 0x140   : > { %2856 = vsyncadd (%p3570_p6), [#allocation10], 4294967232 }
 0x141   : > { %2858 = dma.done.wait (%p3570_p6), [#allocation13], 3104  }
 0x142   : > { %2860 = vsyncadd (%p3570_p6), [#allocation13], 4294964192 }
 0x143   : > { %2862 = dma.done.wait (%p3570_p6), [#allocation16], 64  }
 0x144   : > { %2864 = vsyncadd (%p3570_p6), [#allocation16], 4294967232 }
 0x145   : > { %2866 = dma.done.wait (%p3570_p6), [#allocation19], 3104  }
 0x146   : > { %2868 = vsyncadd (%p3570_p6), [#allocation19], 4294964192 }
 0x147   : > { %674 = sfence }
 0x148   : > { %v2388_v0 = vld [vmem:[#allocation5 + $0x4] ss:$8 sps:$4 sm:$0xff]   ;;  %s3571_s18 = sadd.s32 4294967295, %s2871_s27   ;;  %v2390_v1 = vld [vmem:[#allocation5] ss:$8 sps:$4 sm:$0xff]   ;;  %v2887_v2 = vmov 0   ;;  %v746_v49 = vlaneseq }
 0x149   : > { %s2146_s19 = sshll.u32 %s3571_s18, 2  ;;  %825 = vmatprep.mubr.bf16.mxu0 %v2887_v2  ;;  %793 = vmatprep.subr.bf16.mxu0 %v2388_v0  ;;  %v2391_v3 = vld [vmem:[#allocation5 + $0x14] ss:$8 sps:$4 sm:$0xff]   ;;  %v2393_v4 = vld [vmem:[#allocation5 + $0x10] ss:$8 sps:$4 sm:$0xff]   ;;  %s3572_s26 = sld [smem:[#allocation29_spill]] }
 0x14a   : > { %p724_p5 = scmp.lt.s32.totalorder %s2146_s19, 7  ;;  %794 = vmatpush1.bf16.msra.mxu0 %v2390_v1  ;;  %v2396_v5 = vld [vmem:[%s3527_s6 + $0x4] ss:$8 sps:$4 sm:$0xff]   ;;  %v2398_v6 = vld [vmem:[%s3527_s6] ss:$8 sps:$4 sm:$0xff]   ;;  %vm786_vm0 = vcmask 261120  }
 0x14b   : > { %795 = vmatprep.subr.bf16.mxu0 %v2391_v3  ;;  %v2399_v7 = vld [vmem:[%s3527_s6 + $0x14] ss:$8 sps:$4 sm:$0xff]   ;;  %1083 = vmatprep.subr.bf16.mxu1 %v2396_v5  ;;  %v2401_v8 = vld [vmem:[%s3527_s6 + $0x10] ss:$8 sps:$4 sm:$0xff]   ;;  %v2402_v9 = vld [vmem:[%s3527_s6 + $0x24] ss:$8 sps:$4 sm:$0xff]  }
 0x14c   : > { %s3577_s19 = smov (!%p724_p5, %s2146_s19), 7  ;;  %1084 = vmatpush1.bf16.msra.mxu1 %v2398_v6  ;;  %v2404_v11 = vld [vmem:[%s3527_s6 + $0x20] ss:$8 sps:$4 sm:$0xff]   ;;  %v2405_v12 = vld [vmem:[%s3527_s6 + $0x34] ss:$8 sps:$4 sm:$0xff]   ;;  %v747_v50 = vshrl.u32 %v746_v49, 7 }
 0x14d   : > { %s2147_s20 = sshll.u32 %s3577_s19, 2  ;;  %1085 = vmatprep.subr.bf16.mxu1 %v2399_v7  ;;  %v2407_v14 = vld [vmem:[%s3527_s6 + $0x30] ss:$8 sps:$4 sm:$0xff]   ;;  %v2408_v15 = vld [vmem:[%s3527_s6 + $0x44] ss:$8 sps:$4 sm:$0xff]   ;;  %s850_s0 = sld [smem:[#allocation2]] }
 0x14e   : > { %796 = vmatpush1.bf16.msra.mxu0 %v2393_v4  ;;  %v2410_v16 = vld [vmem:[%s3527_s6 + $0x40] ss:$8 sps:$4 sm:$0xff]   ;;  %v2411_v17 = vld [vmem:[%s3527_s6 + $0x54] ss:$8 sps:$4 sm:$0xff]   ;;  %v2413_v18 = vld [vmem:[%s3527_s6 + $0x50] ss:$8 sps:$4 sm:$0xff]  }
 0x14f   : > { %s727_s30 = scalar_lea.vmem %s3572_s26, %s2147_s20  ;;  %v2414_v19 = vld [vmem:[%s3527_s6 + $0x64] ss:$8 sps:$4 sm:$0xff]   ;;  %v2416_v20 = vld [vmem:[%s3527_s6 + $0x60] ss:$8 sps:$4 sm:$0xff]   ;;  %v2417_v21 = vld [vmem:[%s3527_s6 + $0x74] ss:$8 sps:$4 sm:$0xff]  }
 0x150   : > { %v2394_v10 = vld [vmem:[%s727_s30] sm:$0xff]   ;;  %1086 = vmatpush1.bf16.msra.mxu1 %v2401_v8  ;;  %v2395_v13 = vld [vmem:[%s727_s30 + $0x8] sm:$0xff]   ;;  %v2419_v22 = vld [vmem:[%s3527_s6 + $0x70] ss:$8 sps:$4 sm:$0xff]   ;;  %v3376_v51 = vsub.s32 0, %v747_v50  ;;  %v3378_v53 = vsub.s32 1, %v747_v50 }
 0x151   : > { %2156 = vmatmul.mubr.msk.bf16.vlgmr.msra.gmra.mrb[0].mxu0 %vm786_vm0, %v2394_v10  ;;  %1087 = vmatprep.subr.bf16.mxu1 %v2402_v9  ;;  %v2420_v23 = vld [vmem:[%s3527_s6 + $0x84] ss:$8 sps:$4 sm:$0xff]   ;;  %v2422_v24 = vld [vmem:[%s3527_s6 + $0x80] ss:$8 sps:$4 sm:$0xff]   ;;  %v2423_v25 = vld [vmem:[%s3527_s6 + $0x94] ss:$8 sps:$4 sm:$0xff]  }
 0x152   : > { %835 = vmatprep.mubr.bf16.mxu0 %v2887_v2  ;;  %v2425_v26 = vld [vmem:[%s3527_s6 + $0x90] ss:$8 sps:$4 sm:$0xff]   ;;  %v2426_v27 = vld [vmem:[%s3527_s6 + $0xa4] ss:$8 sps:$4 sm:$0xff]   ;;  %v2428_v28 = vld [vmem:[%s3527_s6 + $0xa0] ss:$8 sps:$4 sm:$0xff]  }
 0x153   : > { %v2429_v29 = vld [vmem:[%s3527_s6 + $0xb4] ss:$8 sps:$4 sm:$0xff]   ;;  %v2431_v30 = vld [vmem:[%s3527_s6 + $0xb0] ss:$8 sps:$4 sm:$0xff]   ;;  %v744_v52 = vld [vmem:[#allocation6] sm:$0x3]  ;;  %v899_v7 = vstv %s850_s0 }
 0x154   : > { %1088 = vmatpush1.bf16.msra.mxu1 %v2404_v11  ;;  %v2432_v31 = vld [vmem:[#allocation12] ss:$8 sps:$4 sm:$0xff]   ;;  %v2434_v32 = vld [vmem:[#allocation12 + $0x4] ss:$8 sps:$4 sm:$0xff]   ;;  %v2437_v33 = vld [vmem:[#allocation12 + $0x14] ss:$8 sps:$4 sm:$0xff]   ;;  %v749_v55 = vrot.slane %v744_v52, %v3376_v51  ;;  %v753_v57 = vrot.slane %v744_v52, %v3378_v53 }
 0x155   : > { %1089 = vmatprep.subr.bf16.mxu1 %v2405_v12  ;;  %1328 = vmatprep.subr.bf16.mxu0 %v2434_v32  ;;  %v2435_v34 = vld [vmem:[#allocation12 + $0x10] ss:$8 sps:$4 sm:$0xff]   ;;  %v2440_v35 = vld [vmem:[#allocation12 + $0x24] ss:$8 sps:$4 sm:$0xff]   ;;  %v2438_v36 = vld [vmem:[#allocation12 + $0x20] ss:$8 sps:$4 sm:$0xff]  }
 0x156   : > { %1329 = vmatpush1.bf16.msra.mxu0 %v2432_v31  ;;  %v2443_v37 = vld [vmem:[#allocation12 + $0x34] ss:$8 sps:$4 sm:$0xff]   ;;  %v2441_v38 = vld [vmem:[#allocation12 + $0x30] ss:$8 sps:$4 sm:$0xff]   ;;  %v2446_v39 = vld [vmem:[#allocation12 + $0x44] ss:$8 sps:$4 sm:$0xff]  }
 0x157   : > { %1330 = vmatprep.subr.bf16.mxu0 %v2437_v33  ;;  %v2444_v40 = vld [vmem:[#allocation12 + $0x40] ss:$8 sps:$4 sm:$0xff]   ;;  %v2449_v41 = vld [vmem:[#allocation12 + $0x54] ss:$8 sps:$4 sm:$0xff]   ;;  %v2447_v42 = vld [vmem:[#allocation12 + $0x50] ss:$8 sps:$4 sm:$0xff]  }
 0x158   : > { %1090 = vmatpush1.bf16.msra.mxu1 %v2407_v14  ;;  %v2452_v43 = vld [vmem:[#allocation12 + $0x64] ss:$8 sps:$4 sm:$0xff]   ;;  %v2450_v44 = vld [vmem:[#allocation12 + $0x60] ss:$8 sps:$4 sm:$0xff]   ;;  %v2455_v45 = vld [vmem:[#allocation12 + $0x74] ss:$8 sps:$4 sm:$0xff]  }
 0x159   : > { %2157 = vmatmul.mubr.msk.bf16.gmra.mrb[4].mxu0 %vm786_vm0, %v2395_v13  ;;  %1091 = vmatprep.subr.bf16.mxu1 %v2408_v15  ;;  %v2453_v46 = vld [vmem:[#allocation12 + $0x70] ss:$8 sps:$4 sm:$0xff]   ;;  %v2458_v47 = vld [vmem:[#allocation12 + $0x84] ss:$8 sps:$4 sm:$0xff]   ;;  %v2456_v48 = vld [vmem:[#allocation12 + $0x80] ss:$8 sps:$4 sm:$0xff]  }
 0x15a   : > { %1331 = vmatpush1.bf16.msra.mxu0 %v2435_v34  ;;  %v851_v54 = vld [vmem:[#allocation8] sm:$0x3]  ;;  %v871_v56 = vld [vmem:[#allocation9] sm:$0x3]  ;;  %vm1076_vm3 = vcmask 523264   ;;  %s2184_s25 = sld [smem:[#allocation2 + $0x1]] }
 0x15b   : > { %1332 = vmatprep.subr.bf16.mxu0 %v2440_v35  ;;  %v856_v58 = vrot.slane %v851_v54, %v3376_v51  ;;  %v860_v60 = vrot.slane %v851_v54, %v3378_v53  ;;  %v876_v62 = vrot.slane %v871_v56, %v3376_v51  ;;  %v880_v1 = vrot.slane %v871_v56, %v3378_v53  ;;  %s2238_s23 = sld [smem:[#allocation2 + $0x3]]  ;;  %s3573_s21 = sld [smem:[#allocation34_spill]] }
 0x15c   : > { %1092 = vmatpush1.bf16.msra.mxu1 %v2410_v16  ;;  %s2149_s3 = sshll.u32 %s3577_s19, 3  ;;  %s3574_s8 = sld [smem:[#allocation35_spill]] }
 0x15d   : > { %1093 = vmatprep.subr.bf16.mxu1 %v2411_v17  ;;  %s3575_s1 = sld [smem:[#allocation36_spill]] }
 0x15e   : > { %1333 = vmatpush1.bf16.msra.mxu0 %v2438_v36 }
 0x15f   : > { %1334 = vmatprep.subr.bf16.mxu0 %v2443_v37 }
 0x160   : > { %1094 = vmatpush1.bf16.msra.mxu1 %v2413_v18 }
 0x161   : > { %1095 = vmatprep.subr.bf16.mxu1 %v2414_v19 }
 0x162   : > { %1335 = vmatpush1.bf16.msra.mxu0 %v2441_v38 }
 0x163   : > { %1336 = vmatprep.subr.bf16.mxu0 %v2446_v39  ;;  %s733_s15 = scalar_lea.vmem %s3575_s1, %s2149_s3 }
 0x164   : > { %1096 = vmatpush1.bf16.msra.mxu1 %v2416_v20 }
 0x165   : > { %1097 = vmatprep.subr.bf16.mxu1 %v2417_v21 }
 0x166   : > { %1337 = vmatpush1.bf16.msra.mxu0 %v2444_v40 }
 0x167   : > { %1338 = vmatprep.subr.bf16.mxu0 %v2449_v41 }
 0x168   : > { %1098 = vmatpush1.bf16.msra.mxu1 %v2419_v22 }
 0x169   : > { %1099 = vmatprep.subr.bf16.mxu1 %v2420_v23 }
 0x16a   : > { %1339 = vmatpush1.bf16.msra.mxu0 %v2447_v42 }
 0x16b   : > { %1340 = vmatprep.subr.bf16.mxu0 %v2452_v43 }
 0x16c   : > { %1100 = vmatpush1.bf16.msra.mxu1 %v2422_v24 }
 0x16d   : > { %1101 = vmatprep.subr.bf16.mxu1 %v2423_v25 }
 0x16e   : > { %1341 = vmatpush1.bf16.msra.mxu0 %v2450_v44 }
 0x16f   : > { %1342 = vmatprep.subr.bf16.mxu0 %v2455_v45 }
 0x170   : > { %1102 = vmatpush1.bf16.msra.mxu1 %v2425_v26 }
 0x171   : > { %1103 = vmatprep.subr.bf16.mxu1 %v2426_v27 }
 0x172   : > { %1343 = vmatpush1.bf16.msra.mxu0 %v2453_v46 }
 0x173   : > { %1344 = vmatprep.subr.bf16.mxu0 %v2458_v47 }
 0x174   : > { %1104 = vmatpush1.bf16.msra.mxu1 %v2428_v28 }
 0x175   : > { %1105 = vmatprep.subr.bf16.mxu1 %v2429_v29 }
 0x176   : > { %1345 = vmatpush1.bf16.msra.mxu0 %v2456_v48 }
 0x178   : > { %1106 = vmatpush1.bf16.msra.mxu1 %v2431_v30 }
 0x224   : > { %v827_v59 = vpop.f32.mrb[0].mxu0 }
 0x225   : > { %v828_v61 = vadd.f32 %v827_v59, %v749_v55  ;;  %v829_v63 = vpop.f32.mrb[1].mxu0  ;;  %v2459_v59 = vld [vmem:[#allocation12 + $0x90] ss:$8 sps:$4 sm:$0xff]  }
 0x226   : > { %v830_v0 = vadd.f32 %v829_v63, %v753_v57  ;;  %v831_v3 = vpop.f32.mrb[2].mxu0  ;;  %v2465_v63 = vld [vmem:[#allocation12 + $0xb0] ss:$8 sps:$4 sm:$0xff]  }
 0x227   : > { %v863_v4 = vmul.f32 %v856_v58, %v828_v61  ;;  %v832_v5 = vadd.f32 %v831_v3, %v749_v55  ;;  %v833_v6 = vpop.f32.mrb[3].mxu0  ;;  %v2473_v3 = vld [vmem:[#allocation18 + $0x14] ss:$8 sps:$4 sm:$0xff]  }
 0x228   : > { %v864_v8 = vmul.f32 %v860_v60, %v830_v0  ;;  %v834_v9 = vadd.f32 %v833_v6, %v753_v57  ;;  %v2474_v6 = vld [vmem:[#allocation18 + $0x20] ss:$8 sps:$4 sm:$0xff]  }
 0x229   : > { %v883_v10 = vadd.f32 %v876_v62, %v863_v4  ;;  %v3386_v11 = vpack.c.bf16 %v832_v5, %v828_v61  ;;  %v865_v12 = vmul.f32 %v856_v58, %v832_v5  ;;  %v2462_v61 = vld [vmem:[#allocation12 + $0xa0] ss:$8 sps:$4 sm:$0xff]  }
 0x22a   : > { %v884_v13 = vadd.f32 %v880_v1, %v864_v8  ;;  %v3388_v14 = vpack.c.bf16 %v834_v9, %v830_v0  ;;  %v866_v15 = vmul.f32 %v860_v60, %v834_v9  ;;  %v2468_v0 = vld [vmem:[#allocation18] ss:$8 sps:$4 sm:$0xff]   ;;  %v2471_v4 = vld [vmem:[#allocation18 + $0x10] ss:$8 sps:$4 sm:$0xff]   ;;  %v2476_v5 = vld [vmem:[#allocation18 + $0x24] ss:$8 sps:$4 sm:$0xff]  }
 0x22b   : > { %v900_v16 = vmul.f32 %v899_v7, %v883_v10  ;;  %v885_v17 = vadd.f32 %v876_v62, %v865_v12  ;;  %vm891_vm1 = vcmp.gt.f32.partialorder %v883_v10, 0.0  ;;  %v2477_v8 = vld [vmem:[#allocation18 + $0x30] ss:$8 sps:$4 sm:$0xff]   ;;  %v2482_v9 = vld [vmem:[#allocation18 + $0x44] ss:$8 sps:$4 sm:$0xff]  }
 0x22c   : > { %v886_v18 = vadd.f32 %v880_v1, %v866_v15  ;;  %v837_v19 = vpop.f32.mrb[4].mxu0  ;;  %vm892_vm2 = vcmp.gt.f32.partialorder %v884_v13, 0.0  ;;  %v901_v20 = vmul.f32 %v899_v7, %v884_v13  ;;  %v2485_v12 = vld [vmem:[#allocation18 + $0x54] ss:$8 sps:$4 sm:$0xff]   ;;  %v2488_v15 = vld [vmem:[#allocation18 + $0x64] ss:$8 sps:$4 sm:$0xff]  }
 0x22d   : > { %v902_v21 = vmul.f32 %v899_v7, %v885_v17  ;;  %v838_v22 = vadd.f32 %v837_v19, %v749_v55  ;;  %v839_v23 = vpop.f32.mrb[5].mxu0  ;;  %vm893_vm4 = vcmp.gt.f32.partialorder %v885_v17, 0.0  ;;  %v908_v27 = vsel %vm891_vm1, %v883_v10, %v900_v16  ;;  %v2480_v10 = vld [vmem:[#allocation18 + $0x40] ss:$8 sps:$4 sm:$0xff]  }
 0x22e   : > { %v840_v24 = vadd.f32 %v839_v23, %v753_v57  ;;  %v841_v25 = vpop.f32.mrb[6].mxu0  ;;  %vm894_vm5 = vcmp.gt.f32.partialorder %v886_v18, 0.0  ;;  %v903_v26 = vmul.f32 %v899_v7, %v886_v18  ;;  %v909_v31 = vsel %vm892_vm2, %v884_v13, %v901_v20  ;;  %v2483_v13 = vld [vmem:[#allocation18 + $0x50] ss:$8 sps:$4 sm:$0xff]   ;;  %v2486_v16 = vld [vmem:[#allocation18 + $0x60] ss:$8 sps:$4 sm:$0xff]  }
 0x22f   : > { %v867_v28 = vmul.f32 %v856_v58, %v838_v22  ;;  %v842_v29 = vadd.f32 %v841_v25, %v749_v55  ;;  %v843_v30 = vpop.f32.mrb[7].mxu0  ;;  %v910_v32 = vsel %vm893_vm4, %v885_v17, %v902_v21  ;;  %v944_v17 = vld [vmem:[#allocation11] sm:$0x3]  ;;  %v1145_v21 = vstv %s2184_s25  ;;  %s2211_s25 = sld [smem:[#allocation2 + $0x2]] }
 0x230   : > { %v868_v33 = vmul.f32 %v860_v60, %v840_v24  ;;  %v844_v34 = vadd.f32 %v843_v30, %v753_v57  ;;  %v911_v35 = vsel %vm894_vm5, %v886_v18, %v903_v26  ;;  %v916_v36 = vpack.c.bf16 %v910_v32, %v908_v27 }
 0x231   : > { %v887_v37 = vadd.f32 %v876_v62, %v867_v28  ;;  %v3390_v38 = vpack.c.bf16 %v842_v29, %v838_v22  ;;  %v869_v39 = vmul.f32 %v856_v58, %v842_v29  ;;  %v917_v40 = vpack.c.bf16 %v911_v35, %v909_v31  ;;  %v2461_v58 = vld [vmem:[#allocation12 + $0x94] ss:$8 sps:$4 sm:$0xff]  }
 0x232   : > { %v888_v41 = vadd.f32 %v880_v1, %v868_v33  ;;  %v3392_v42 = vpack.c.bf16 %v844_v34, %v840_v24  ;;  %v870_v43 = vmul.f32 %v860_v60, %v844_v34  ;;  %1346 = vmatprep.subr.bf16.mxu0 %v2461_v58  ;;  %v2464_v60 = vld [vmem:[#allocation12 + $0xa4] ss:$8 sps:$4 sm:$0xff]   ;;  %v949_v18 = vrot.slane %v944_v17, %v3376_v51 }
 0x233   : > { %v904_v44 = vmul.f32 %v899_v7, %v887_v37  ;;  %v889_v45 = vadd.f32 %v876_v62, %v869_v39  ;;  %2182 = vmatprep.mubr.msk.bf16.mxu1 %vm1076_vm3, %v917_v40  ;;  %vm895_vm6 = vcmp.gt.f32.partialorder %v887_v37, 0.0  ;;  %1347 = vmatpush1.bf16.msra.mxu0 %v2459_v59  ;;  %v2467_v62 = vld [vmem:[#allocation12 + $0xb4] ss:$8 sps:$4 sm:$0xff]   ;;  %v953_v19 = vrot.slane %v944_v17, %v3378_v53 }
 0x234   : > { %v905_v46 = vmul.f32 %v899_v7, %v888_v41  ;;  %v890_v47 = vadd.f32 %v880_v1, %v870_v43  ;;  %1116 = vmatmul.mubr.bf16.vlgmr.msra.gmra.mrb[0].mxu1 %v916_v36  ;;  %vm896_vm7 = vcmp.gt.f32.partialorder %v888_v41, 0.0  ;;  %1348 = vmatprep.subr.bf16.mxu0 %v2464_v60  ;;  %v2470_v1 = vld [vmem:[#allocation18 + $0x4] ss:$8 sps:$4 sm:$0xff]  }
 0x235   : > { %v906_v48 = vmul.f32 %v899_v7, %v889_v45  ;;  %vm897_vm8 = vcmp.gt.f32.partialorder %v889_v45, 0.0  ;;  %v912_v50 = vsel %vm895_vm6, %v887_v37, %v904_v44  ;;  %1641 = vmatprep.subr.bf16.mxu1 %v2470_v1  ;;  %v2497_v1 = vld [vmem:[#allocation18 + $0x94] ss:$8 sps:$4 sm:$0xff]   ;;  %v2511_v17 = vld [vmem:[%s3537_s16 + $0x38] sm:$0xff]  }
 0x236   : > { %vm898_vm9 = vcmp.gt.f32.partialorder %v890_v47, 0.0  ;;  %v907_v49 = vmul.f32 %v899_v7, %v890_v47  ;;  %v913_v54 = vsel %vm896_vm7, %v888_v41, %v905_v46  ;;  %1642 = vmatpush1.bf16.msra.mxu1 %v2468_v0  ;;  %v2479_v7 = vld [vmem:[#allocation18 + $0x34] ss:$8 sps:$4 sm:$0xff]   ;;  %v2492_v0 = vld [vmem:[#allocation18 + $0x80] ss:$8 sps:$4 sm:$0xff]  }
 0x237   : > { %v914_v52 = vsel %vm897_vm8, %v889_v45, %v906_v48  ;;  %1349 = vmatpush1.bf16.msra.mxu0 %v2462_v61  ;;  %1643 = vmatprep.subr.bf16.mxu1 %v2473_v3  ;;  %v2491_v61 = vld [vmem:[#allocation18 + $0x74] ss:$8 sps:$4 sm:$0xff]   ;;  %v2495_v3 = vld [vmem:[#allocation18 + $0x90] ss:$8 sps:$4 sm:$0xff]  }
 0x238   : > { %v915_v55 = vsel %vm898_vm9, %v890_v47, %v907_v49  ;;  %v918_v56 = vpack.c.bf16 %v914_v52, %v912_v50  ;;  %1350 = vmatprep.subr.bf16.mxu0 %v2467_v62  ;;  %v2489_v62 = vld [vmem:[#allocation18 + $0x70] ss:$8 sps:$4 sm:$0xff]  }
 0x239   : > { %v919_v57 = vpack.c.bf16 %v915_v55, %v913_v54 }
 0x23a   : > { %1644 = vmatpush1.bf16.msra.mxu1 %v2471_v4  ;;  %v2500_v4 = vld [vmem:[#allocation18 + $0xa4] ss:$8 sps:$4 sm:$0xff]  }
 0x23b   : > { %2183 = vmatprep.mubr.msk.bf16.mxu1 %vm1076_vm3, %v919_v57  ;;  %1351 = vmatpush1.bf16.msra.mxu0 %v2465_v63  ;;  %v2494_v63 = vld [vmem:[#allocation18 + $0x84] ss:$8 sps:$4 sm:$0xff]  }
 0x23c   : > { %1126 = vmatmul.mubr.bf16.gmra.mrb[4].mxu1 %v918_v56  ;;  %1889 = vmatprep.subr.bf16.mxu0 %v2887_v2 }
 0x23d   : > { %1645 = vmatprep.subr.bf16.mxu1 %v2476_v5  ;;  %v2498_v5 = vld [vmem:[#allocation18 + $0xa0] ss:$8 sps:$4 sm:$0xff]  }
 0x23e   : > { %1646 = vmatpush1.bf16.msra.mxu1 %v2474_v6  ;;  %v2503_v6 = vld [vmem:[#allocation18 + $0xb4] ss:$8 sps:$4 sm:$0xff]  }
 0x23f   : > { %1647 = vmatprep.subr.bf16.mxu1 %v2479_v7  ;;  %v2501_v7 = vld [vmem:[#allocation18 + $0xb0] ss:$8 sps:$4 sm:$0xff]  }
 0x242   : > { %1648 = vmatpush1.bf16.msra.mxu1 %v2477_v8  ;;  %v2504_v8 = vld [vmem:[%s3537_s16] sm:$0xff]  }
 0x243   : > { %1649 = vmatprep.subr.bf16.mxu1 %v2482_v9  ;;  %v2505_v9 = vld [vmem:[%s3537_s16 + $0x8] sm:$0xff]  }
 0x246   : > { %1650 = vmatpush1.bf16.msra.mxu1 %v2480_v10  ;;  %v2506_v10 = vld [vmem:[%s3537_s16 + $0x10] sm:$0xff]  }
 0x247   : > { %1651 = vmatprep.subr.bf16.mxu1 %v2485_v12  ;;  %v2507_v12 = vld [vmem:[%s3537_s16 + $0x18] sm:$0xff]  }
 0x24a   : > { %1652 = vmatpush1.bf16.msra.mxu1 %v2483_v13  ;;  %v2508_v13 = vld [vmem:[%s3537_s16 + $0x20] sm:$0xff]  }
 0x24b   : > { %1653 = vmatprep.subr.bf16.mxu1 %v2488_v15  ;;  %v2509_v15 = vld [vmem:[%s3537_s16 + $0x28] sm:$0xff]  }
 0x24e   : > { %1654 = vmatpush1.bf16.msra.mxu1 %v2486_v16  ;;  %v2510_v16 = vld [vmem:[%s3537_s16 + $0x30] sm:$0xff]  }
 0x24f   : > { %1655 = vmatprep.subr.bf16.mxu1 %v2491_v61 }
 0x252   : > { %1656 = vmatpush1.bf16.msra.mxu1 %v2489_v62 }
 0x253   : > { %1657 = vmatprep.subr.bf16.mxu1 %v2494_v63 }
 0x256   : > { %1658 = vmatpush1.bf16.msra.mxu1 %v2492_v0 }
 0x257   : > { %1659 = vmatprep.subr.bf16.mxu1 %v2497_v1 }
 0x25a   : > { %1660 = vmatpush1.bf16.msra.mxu1 %v2495_v3 }
 0x25b   : > { %1661 = vmatprep.subr.bf16.mxu1 %v2500_v4 }
 0x25e   : > { %1662 = vmatpush1.bf16.msra.mxu1 %v2498_v5 }
 0x25f   : > { %1663 = vmatprep.subr.bf16.mxu1 %v2503_v6 }
 0x262   : > { %1664 = vmatpush1.bf16.msra.mxu1 %v2501_v7 }
 0x307   : > { %v1117_v20 = vpop.f32.mrb[0].mxu1 }
 0x308   : > { %v1118_v22 = vadd.f32 %v1117_v20, %v949_v18  ;;  %v1119_v23 = vpop.f32.mrb[1].mxu1 }
 0x309   : > { %v1120_v24 = vadd.f32 %v1119_v23, %v953_v19  ;;  %v1121_v25 = vpop.f32.mrb[2].mxu1 }
 0x30a   : > { %v1146_v26 = vmul.f32 %v1145_v21, %v1118_v22  ;;  %v1122_v27 = vadd.f32 %v1121_v25, %v949_v18  ;;  %v1123_v28 = vpop.f32.mrb[3].mxu1  ;;  %vm1136_vm10 = vcmp.gt.f32.partialorder %v1118_v22, 0.0 }
 0x30b   : > { %v1147_v29 = vmul.f32 %v1145_v21, %v1120_v24  ;;  %v1124_v30 = vadd.f32 %v1123_v28, %v953_v19  ;;  %vm1137_vm11 = vcmp.gt.f32.partialorder %v1120_v24, 0.0  ;;  %v1382_v28 = vunpack.c.l.bf16 %v3388_v14 }
 0x30c   : > { %vm1138_vm12 = vcmp.gt.f32.partialorder %v1122_v27, 0.0  ;;  %v1148_v31 = vmul.f32 %v1145_v21, %v1122_v27  ;;  %v1154_v33 = vsel %vm1136_vm10, %v1118_v22, %v1146_v26  ;;  %v1410_v22 = vld [vmem:[#allocation15] sm:$0x3]  ;;  %v1430_v26 = vld [vmem:[#allocation17] sm:$0x3] }
 0x30d   : > { %vm1139_vm13 = vcmp.gt.f32.partialorder %v1124_v30, 0.0  ;;  %v1149_v32 = vmul.f32 %v1145_v21, %v1124_v30  ;;  %v1155_v35 = vsel %vm1137_vm11, %v1120_v24, %v1147_v29  ;;  %v1381_v24 = vunpack.c.l.bf16 %v3386_v11 }
 0x30e   : > { %v1156_v34 = vsel %vm1138_vm12, %v1122_v27, %v1148_v31  ;;  %v3438_v31 = vrot.slane %v1410_v22, %v3376_v51 }
 0x30f   : > { %v1162_v36 = vpack.c.bf16 %v1156_v34, %v1154_v33  ;;  %v1157_v37 = vsel %vm1139_vm13, %v1124_v30, %v1149_v32  ;;  %v1127_v39 = vpop.f32.mrb[4].mxu1  ;;  %v1383_v33 = vunpack.c.h.bf16 %v3386_v11  ;;  %v1385_v11 = vunpack.c.l.bf16 %v3390_v38 }
 0x310   : > { %v1163_v40 = vpack.c.bf16 %v1157_v37, %v1155_v35  ;;  %v1128_v41 = vadd.f32 %v1127_v39, %v949_v18  ;;  %v1129_v43 = vpop.f32.mrb[5].mxu1  ;;  %v1384_v39 = vunpack.c.h.bf16 %v3388_v14 }
 0x311   : > { %v1130_v44 = vadd.f32 %v1129_v43, %v953_v19  ;;  %v1131_v45 = vpop.f32.mrb[6].mxu1 }
 0x312   : > { %v1150_v46 = vmul.f32 %v1145_v21, %v1128_v41  ;;  %v1132_v47 = vadd.f32 %v1131_v45, %v949_v18  ;;  %v1133_v48 = vpop.f32.mrb[7].mxu1  ;;  %2209 = vmatprep.mubr.msk.bf16.mxu0 %vm1076_vm3, %v1163_v40  ;;  %vm1140_vm14 = vcmp.gt.f32.partialorder %v1128_v41, 0.0  ;;  %v1190_v18 = vld [vmem:[#allocation14] sm:$0x3]  ;;  %v1439_v45 = vrot.slane %v1430_v26, %v3378_v53 }
 0x313   : > { %v1151_v49 = vmul.f32 %v1145_v21, %v1130_v44  ;;  %v1134_v50 = vadd.f32 %v1133_v48, %v953_v19  ;;  %1361 = vmatmul.mubr.bf16.vlgmr.msra.gmra.mrb[8].mxu0 %v1162_v36  ;;  %vm1141_vm15 = vcmp.gt.f32.partialorder %v1130_v44, 0.0  ;;  %v1195_v19 = vrot.slane %v1190_v18, %v3376_v51 }
 0x314   : > { %vm1142_vm1 = vcmp.gt.f32.partialorder %v1132_v47, 0.0  ;;  %v1152_v52 = vmul.f32 %v1145_v21, %v1132_v47  ;;  %v1158_v55 = vsel %vm1140_vm14, %v1128_v41, %v1150_v46  ;;  %1890 = vmatpush1.bf16.msra.mxu0 %v2504_v8  ;;  %v1199_v20 = vrot.slane %v1190_v18, %v3378_v53 }
 0x315   : > { %vm1143_vm2 = vcmp.gt.f32.partialorder %v1134_v50, 0.0  ;;  %v1153_v54 = vmul.f32 %v1145_v21, %v1134_v50  ;;  %v1159_v57 = vsel %vm1141_vm15, %v1130_v44, %v1151_v49  ;;  %1891 = vmatprep.subr.bf16.mxu0 %v2887_v2  ;;  %v3442_v36 = vrot.slane %v1410_v22, %v3378_v53 }
 0x316   : > { %v1160_v56 = vsel %vm1142_vm1, %v1132_v47, %v1152_v52  ;;  %v1435_v41 = vrot.slane %v1430_v26, %v3376_v51  ;;  %v1386_v49 = vunpack.c.l.bf16 %v3392_v42 }
 0x317   : > { %v1161_v58 = vsel %vm1143_vm2, %v1134_v50, %v1153_v54  ;;  %v1164_v59 = vpack.c.bf16 %v1160_v56, %v1158_v55  ;;  %v1458_v50 = vstv %s2211_s25  ;;  %v1387_v55 = vunpack.c.h.bf16 %v3390_v38 }
 0x318   : > { %v1165_v60 = vpack.c.bf16 %v1161_v58, %v1159_v57  ;;  %1892 = vmatpush1.bf16.msra.mxu0 %v2505_v9  ;;  %v1388_v38 = vunpack.c.h.bf16 %v3392_v42 }
 0x319   : > { %1893 = vmatprep.subr.bf16.mxu0 %v2887_v2 }
 0x31a   : > { %2210 = vmatprep.mubr.msk.bf16.mxu0 %vm1076_vm3, %v1165_v60 }
 0x31b   : > { %1371 = vmatmul.mubr.bf16.gmra.mrb[12].mxu0 %v1164_v59 }
 0x31c   : > { %1894 = vmatpush1.bf16.msra.mxu0 %v2506_v10 }
 0x31d   : > { %1895 = vmatprep.subr.bf16.mxu0 %v2887_v2 }
 0x320   : > { %1896 = vmatpush1.bf16.msra.mxu0 %v2507_v12 }
 0x321   : > { %1897 = vmatprep.subr.bf16.mxu0 %v2887_v2 }
 0x324   : > { %1898 = vmatpush1.bf16.msra.mxu0 %v2508_v13 }
 0x325   : > { %1899 = vmatprep.subr.bf16.mxu0 %v2887_v2 }
 0x328   : > { %1900 = vmatpush1.bf16.msra.mxu0 %v2509_v15 }
 0x329   : > { %1901 = vmatprep.subr.bf16.mxu0 %v2887_v2 }
 0x32c   : > { %1902 = vmatpush1.bf16.msra.mxu0 %v2510_v16 }
 0x32d   : > { %1903 = vmatprep.subr.bf16.mxu0 %v2887_v2 }
 0x330   : > { %1904 = vmatpush1.bf16.msra.mxu0 %v2511_v17 }
 0x331   : > { %1905 = vmatprep.subr.bf16.mxu0 %v2887_v2 }
 0x3e6   : > { %v1362_v21 = vpop.f32.mrb[8].mxu0 }
 0x3e7   : > { %v1363_v23 = vadd.f32 %v1362_v21, %v1195_v19  ;;  %v1364_v25 = vpop.f32.mrb[9].mxu0 }
 0x3e8   : > { %v1365_v27 = vadd.f32 %v1364_v25, %v1199_v20  ;;  %v1366_v29 = vpop.f32.mrb[10].mxu0 }
 0x3e9   : > { %v1389_v30 = vadd.f32 %v1381_v24, %v1363_v23  ;;  %v1367_v32 = vadd.f32 %v1366_v29, %v1195_v19  ;;  %v1368_v34 = vpop.f32.mrb[11].mxu0 }
 0x3ea   : > { %v1390_v35 = vadd.f32 %v1382_v28, %v1365_v27  ;;  %v1369_v37 = vadd.f32 %v1368_v34, %v1199_v20 }
 0x3eb   : > { %v1397_v40 = vmul.f32 0.5, %v1389_v30  ;;  %v1391_v43 = vadd.f32 %v1383_v33, %v1367_v32 }
 0x3ec   : > { %v1398_v44 = vmul.f32 0.5, %v1390_v35  ;;  %v1392_v46 = vadd.f32 %v1384_v39, %v1369_v37 }
 0x3ed   : > { %v1422_v47 = vmul.f32 %v3438_v31, %v1397_v40  ;;  %v1399_v48 = vmul.f32 0.5, %v1391_v43 }
 0x3ee   : > { %v1423_v52 = vmul.f32 %v3442_v36, %v1398_v44  ;;  %v1400_v54 = vmul.f32 0.5, %v1392_v46  ;;  %v1372_v14 = vpop.f32.mrb[12].mxu0 }
 0x3ef   : > { %v1442_v56 = vadd.f32 %v1435_v41, %v1422_v47  ;;  %v3452_v57 = vpack.c.bf16 %v1399_v48, %v1397_v40  ;;  %v1424_v58 = vmul.f32 %v3438_v31, %v1399_v48  ;;  %v1373_v59 = vadd.f32 %v1372_v14, %v1195_v19  ;;  %v1374_v60 = vpop.f32.mrb[13].mxu0 }
 0x3f0   : > { %v1443_v61 = vadd.f32 %v1439_v45, %v1423_v52  ;;  %v3455_v62 = vpack.c.bf16 %v1400_v54, %v1398_v44  ;;  %v1425_v63 = vmul.f32 %v3442_v36, %v1400_v54  ;;  %v1375_v0 = vadd.f32 %v1374_v60, %v1199_v20  ;;  %v1376_v1 = vpop.f32.mrb[14].mxu0  ;;  %v2515_v52 = vld [vmem:[%s3537_s16 + $0x58] sm:$0xff]   ;;  %v1503_v54 = vld [vmem:[#allocation20] sm:$0x3] }
 0x3f1   : > { %vm1450_vm4 = vcmp.gt.f32.partialorder %v1442_v56, 0.0  ;;  %v1444_v3 = vadd.f32 %v1435_v41, %v1424_v58  ;;  %v1393_v4 = vadd.f32 %v1385_v11, %v1373_v59  ;;  %v1378_v5 = vpop.f32.mrb[15].mxu0  ;;  %v1459_v6 = vmul.f32 %v1458_v50, %v1442_v56 }
 0x3f2   : > { %v1445_v7 = vadd.f32 %v1439_v45, %v1425_v63  ;;  %v1394_v8 = vadd.f32 %v1386_v49, %v1375_v0  ;;  %v1377_v9 = vadd.f32 %v1376_v1, %v1195_v19  ;;  %v1460_v10 = vmul.f32 %v1458_v50, %v1443_v61 }
 0x3f3   : > { %vm1452_vm5 = vcmp.gt.f32.partialorder %v1444_v3, 0.0  ;;  %v1461_v12 = vmul.f32 %v1458_v50, %v1444_v3  ;;  %v1401_v13 = vmul.f32 0.5, %v1393_v4  ;;  %v1379_v18 = vadd.f32 %v1378_v5, %v1199_v20 }
 0x3f4   : > { %v1462_v15 = vmul.f32 %v1458_v50, %v1445_v7  ;;  %v1402_v16 = vmul.f32 0.5, %v1394_v8  ;;  %v1395_v17 = vadd.f32 %v1387_v55, %v1377_v9  ;;  %vm1451_vm6 = vcmp.gt.f32.partialorder %v1443_v61, 0.0  ;;  %v1711_v55 = vld [vmem:[%s3535_s14] sm:$0x3] }
 0x3f5   : > { %v1469_v21 = vsel %vm1452_vm5, %v1444_v3, %v1461_v12  ;;  %v1426_v22 = vmul.f32 %v3438_v31, %v1401_v13  ;;  %vm1453_vm7 = vcmp.gt.f32.partialorder %v1445_v7, 0.0  ;;  %v1467_v23 = vsel %vm1450_vm4, %v1442_v56, %v1459_v6 }
 0x3f6   : > { %v1427_v42 = vmul.f32 %v3442_v36, %v1402_v16  ;;  %v1403_v24 = vmul.f32 0.5, %v1395_v17  ;;  %v1396_v25 = vadd.f32 %v1388_v38, %v1379_v18  ;;  %v1468_v26 = vsel %vm1451_vm6, %v1443_v61, %v1460_v10 }
 0x3f7   : > { %v1446_v19 = vadd.f32 %v1435_v41, %v1426_v22  ;;  %v1470_v27 = vsel %vm1453_vm7, %v1445_v7, %v1462_v15  ;;  %v1475_v28 = vpack.c.bf16 %v1469_v21, %v1467_v23  ;;  %v1508_v14 = vrot.slane %v1503_v54, %v3376_v51 }
 0x3f8   : > { %v1447_v29 = vadd.f32 %v1439_v45, %v1427_v42  ;;  %v3462_v30 = vpack.c.bf16 %v1403_v24, %v1401_v13  ;;  %v1428_v20 = vmul.f32 %v3438_v31, %v1403_v24  ;;  %v1404_v32 = vmul.f32 0.5, %v1396_v25 }
 0x3f9   : > { %v1476_v33 = vpack.c.bf16 %v1470_v27, %v1468_v26  ;;  %v1463_v39 = vmul.f32 %v1458_v50, %v1446_v19  ;;  %vm1454_vm8 = vcmp.gt.f32.partialorder %v1446_v19, 0.0  ;;  %v1512_v56 = vrot.slane %v1503_v54, %v3378_v53 }
 0x3fa   : > { %v1448_v34 = vadd.f32 %v1435_v41, %v1428_v20  ;;  %v3465_v35 = vpack.c.bf16 %v1404_v32, %v1402_v16  ;;  %v1429_v37 = vmul.f32 %v3442_v36, %v1404_v32  ;;  %v1464_v40 = vmul.f32 %v1458_v50, %v1447_v29  ;;  %v2512_v36 = vld [vmem:[%s3537_s16 + $0x40] sm:$0xff]  }
 0x3fb   : > { %2236 = vmatprep.mubr.msk.bf16.mxu1 %vm1076_vm3, %v1476_v33  ;;  %vm1455_vm10 = vcmp.gt.f32.partialorder %v1447_v29, 0.0  ;;  %v1471_v31 = vsel %vm1454_vm8, %v1446_v19, %v1463_v39  ;;  %1906 = vmatpush1.bf16.msra.mxu0 %v2512_v36  ;;  %v1694_v60 = vunpack.c.l.bf16 %v3452_v57  ;;  %v1716_v61 = vrot.slane %v1711_v55, %v3376_v51 }
 0x3fc   : > { %v1449_v43 = vadd.f32 %v1439_v45, %v1429_v37  ;;  %1674 = vmatmul.mubr.bf16.vlgmr.msra.gmra.mrb[8].mxu1 %v1475_v28  ;;  %vm1456_vm9 = vcmp.gt.f32.partialorder %v1448_v34, 0.0  ;;  %v1465_v44 = vmul.f32 %v1458_v50, %v1448_v34  ;;  %v1472_v41 = vsel %vm1455_vm10, %v1447_v29, %v1464_v40  ;;  %1907 = vmatprep.subr.bf16.mxu0 %v2887_v2  ;;  %v2513_v45 = vld [vmem:[%s3537_s16 + $0x48] sm:$0xff]  }
 0x3fd   : > { %v1695_v1 = vunpack.c.l.bf16 %v3455_v62  ;;  %v1720_v3 = vrot.slane %v1711_v55, %v3378_v53  ;;  %v1696_v7 = vunpack.c.h.bf16 %v3452_v57  ;;  %v1697_v13 = vunpack.c.h.bf16 %v3455_v62 }
 0x3fe   : > { %v1466_v46 = vmul.f32 %v1458_v50, %v1449_v43  ;;  %vm1457_vm11 = vcmp.gt.f32.partialorder %v1449_v43, 0.0  ;;  %v1473_v47 = vsel %vm1456_vm9, %v1448_v34, %v1465_v44  ;;  %v2514_v50 = vld [vmem:[%s3537_s16 + $0x50] sm:$0xff]   ;;  %v1759_v17 = vstv %s2238_s23 }
 0x3ff   : > { %v1477_v48 = vpack.c.bf16 %v1473_v47, %v1471_v31  ;;  %1908 = vmatpush1.bf16.msra.mxu0 %v2513_v45  ;;  %v1698_v42 = vunpack.c.l.bf16 %v3462_v30  ;;  %v1700_v19 = vunpack.c.h.bf16 %v3462_v30 }
 0x400   : > { %v1474_v11 = vsel %vm1457_vm11, %v1449_v43, %v1466_v46  ;;  %1909 = vmatprep.subr.bf16.mxu0 %v2887_v2 }
 0x401   : > { %v1478_v49 = vpack.c.bf16 %v1474_v11, %v1472_v41 }
 0x403   : > { %2237 = vmatprep.mubr.msk.bf16.mxu1 %vm1076_vm3, %v1478_v49  ;;  %1910 = vmatpush1.bf16.msra.mxu0 %v2514_v50 }
 0x404   : > { %1684 = vmatmul.mubr.bf16.gmra.mrb[12].mxu1 %v1477_v48  ;;  %1911 = vmatprep.subr.bf16.mxu0 %v2887_v2  ;;  %v1731_v2 = vld [vmem:[%s3573_s21] sm:$0x3] }
 0x405   : > { %v1736_v38 = vrot.slane %v1731_v2, %v3376_v51  ;;  %v1740_v10 = vrot.slane %v1731_v2, %v3378_v53  ;;  %v1699_v51 = vunpack.c.l.bf16 %v3465_v35  ;;  %v1701_v53 = vunpack.c.h.bf16 %v3465_v35 }
 0x407   : > { %1912 = vmatpush1.bf16.msra.mxu0 %v2515_v52 }
 0x4cf   : > { %v1675_v58 = vpop.f32.mrb[8].mxu1 }
 0x4d0   : > { %v1676_v59 = vadd.f32 %v1675_v58, %v1508_v14  ;;  %v1677_v63 = vpop.f32.mrb[9].mxu1 }
 0x4d1   : > { %v1678_v0 = vadd.f32 %v1677_v63, %v1512_v56  ;;  %v1679_v4 = vpop.f32.mrb[10].mxu1 }
 0x4d2   : > { %v1702_v5 = vadd.f32 %v1694_v60, %v1676_v59  ;;  %v1680_v6 = vadd.f32 %v1679_v4, %v1508_v14  ;;  %v1681_v8 = vpop.f32.mrb[11].mxu1 }
 0x4d3   : > { %v1703_v9 = vadd.f32 %v1695_v1, %v1678_v0  ;;  %v1682_v12 = vadd.f32 %v1681_v8, %v1512_v56 }
 0x4d4   : > { %v1723_v15 = vmul.f32 %v1716_v61, %v1702_v5  ;;  %v1704_v16 = vadd.f32 %v1696_v7, %v1680_v6  ;;  %v2239_v5 = vld [vmem:[%s3574_s8] ss:$0 sm:$0xff] }
 0x4d5   : > { %v1724_v18 = vmul.f32 %v1720_v3, %v1703_v9  ;;  %v1705_v21 = vadd.f32 %v1697_v13, %v1682_v12 }
 0x4d6   : > { %v1743_v22 = vadd.f32 %v1736_v38, %v1723_v15  ;;  %v1725_v23 = vmul.f32 %v1716_v61, %v1704_v16 }
 0x4d7   : > { %v1744_v24 = vadd.f32 %v1740_v10, %v1724_v18  ;;  %v1726_v57 = vmul.f32 %v1720_v3, %v1705_v21  ;;  %v1685_v25 = vpop.f32.mrb[12].mxu1 }
 0x4d8   : > { %vm1751_vm12 = vcmp.gt.f32.partialorder %v1743_v22, 0.0  ;;  %v1760_v62 = vmul.f32 %v1759_v17, %v1743_v22  ;;  %v1745_v26 = vadd.f32 %v1736_v38, %v1725_v23  ;;  %v1686_v27 = vadd.f32 %v1685_v25, %v1508_v14  ;;  %v1687_v28 = vpop.f32.mrb[13].mxu1 }
 0x4d9   : > { %v1761_v29 = vmul.f32 %v1759_v17, %v1744_v24  ;;  %v1746_v20 = vadd.f32 %v1740_v10, %v1726_v57  ;;  %v1688_v32 = vadd.f32 %v1687_v28, %v1512_v56  ;;  %v1689_v33 = vpop.f32.mrb[14].mxu1  ;;  %vm1752_vm13 = vcmp.gt.f32.partialorder %v1744_v24, 0.0 }
 0x4da   : > { %v1768_v34 = vsel %vm1751_vm12, %v1743_v22, %v1760_v62  ;;  %vm1753_vm14 = vcmp.gt.f32.partialorder %v1745_v26, 0.0  ;;  %v1762_v37 = vmul.f32 %v1759_v17, %v1745_v26  ;;  %v1706_v39 = vadd.f32 %v1698_v42, %v1686_v27  ;;  %v1691_v40 = vpop.f32.mrb[15].mxu1 }
 0x4db   : > { %v1763_v43 = vmul.f32 %v1759_v17, %v1746_v20  ;;  %v1707_v44 = vadd.f32 %v1699_v51, %v1688_v32  ;;  %v1690_v30 = vadd.f32 %v1689_v33, %v1508_v14  ;;  %v1692_v46 = vadd.f32 %v1691_v40, %v1512_v56 }
 0x4dc   : > { %v1770_v35 = vsel %vm1753_vm14, %v1745_v26, %v1762_v37  ;;  %v1727_v31 = vmul.f32 %v1716_v61, %v1706_v39  ;;  %vm1754_vm15 = vcmp.gt.f32.partialorder %v1746_v20, 0.0  ;;  %v1769_v47 = vsel %vm1752_vm13, %v1744_v24, %v1761_v29 }
 0x4dd   : > { %v1728_v48 = vmul.f32 %v1720_v3, %v1707_v44  ;;  %v1708_v41 = vadd.f32 %v1700_v19, %v1690_v30  ;;  %v1709_v11 = vadd.f32 %v1701_v53, %v1692_v46  ;;  %v1771_v49 = vsel %vm1754_vm15, %v1746_v20, %v1763_v43 }
 0x4de   : > { %v1747_v36 = vadd.f32 %v1736_v38, %v1727_v31  ;;  %v1777_v45 = vpack.c.bf16 %v1771_v49, %v1769_v47  ;;  %v1776_v50 = vpack.c.bf16 %v1770_v35, %v1768_v34 }
 0x4df   : > { %v1748_v52 = vadd.f32 %v1740_v10, %v1728_v48  ;;  %v1729_v54 = vmul.f32 %v1716_v61, %v1708_v41  ;;  %v1730_v55 = vmul.f32 %v1720_v3, %v1709_v11 }
 0x4e0   : > { %2252 = vmatprep.mubr.msk.bf16.mxu0 %vm1076_vm3, %v1777_v45  ;;  %v1764_v56 = vmul.f32 %v1759_v17, %v1747_v36  ;;  %vm1755_vm4 = vcmp.gt.f32.partialorder %v1747_v36, 0.0 }
 0x4e1   : > { %v1765_v58 = vmul.f32 %v1759_v17, %v1748_v52  ;;  %v1749_v2 = vadd.f32 %v1736_v38, %v1729_v54  ;;  %v1750_v14 = vadd.f32 %v1740_v10, %v1730_v55  ;;  %1922 = vmatmul.mubr.bf16.vlgmr.msra.gmra.mrb[16].mxu0 %v1776_v50  ;;  %vm1756_vm1 = vcmp.gt.f32.partialorder %v1748_v52, 0.0 }
 0x4e2   : > { %v1772_v4 = vsel %vm1755_vm4, %v1747_v36, %v1764_v56 }
 0x4e3   : > { %v1767_v59 = vmul.f32 %v1759_v17, %v1750_v14  ;;  %vm1758_vm2 = vcmp.gt.f32.partialorder %v1750_v14, 0.0  ;;  %vm1757_vm5 = vcmp.gt.f32.partialorder %v1749_v2, 0.0  ;;  %v1766_v60 = vmul.f32 %v1759_v17, %v1749_v2 }
 0x4e4   : > { %v1773_v63 = vsel %vm1756_vm1, %v1748_v52, %v1765_v58 }
 0x4e5   : > { %v1775_v0 = vsel %vm1758_vm2, %v1750_v14, %v1767_v59  ;;  %v1774_v61 = vsel %vm1757_vm5, %v1749_v2, %v1766_v60 }
 0x4e6   : > { %v1779_v1 = vpack.c.bf16 %v1775_v0, %v1773_v63  ;;  %v1778_v3 = vpack.c.bf16 %v1774_v61, %v1772_v4 }
 0x4e8   : > { %2253 = vmatprep.mubr.msk.bf16.mxu0 %vm1076_vm3, %v1779_v1 }
 0x4e9   : > { %1930 = vmatmul.mubr.bf16.gmra.mrb[20].mxu0 %v1778_v3 }
 0x5b4   : > { %v1923_v38 = vpop.f32.mrb[16].mxu0 }
 0x5b5   : > { %v1924_v6 = vadd.f32 %v2239_v5, %v1923_v38  ;;  %v1925_v7 = vpop.f32.mrb[17].mxu0 }
 0x5b6   : > { %v1926_v8 = vpop.f32.mrb[18].mxu0 }
 0x5b7   : > { %1938 = vst.msk [vmem:[%s733_s15] sm:$0xff] %vm786_vm0, %v1924_v6  ;;  %v1927_v9 = vadd.f32 %v2239_v5, %v1926_v8  ;;  %v1928_v10 = vpop.f32.mrb[19].mxu0 }
 0x5b9   : > { %1939 = vst.msk [vmem:[%s733_s15 + $0x8] sm:$0xff] %vm786_vm0, %v1927_v9 }
 0x5bc   : > { %v1931_v12 = vpop.f32.mrb[20].mxu0 }
 0x5bd   : > { %v1932_v13 = vadd.f32 %v2239_v5, %v1931_v12  ;;  %v1933_v15 = vpop.f32.mrb[21].mxu0 }
 0x5be   : > { %v1934_v16 = vpop.f32.mrb[22].mxu0 }
 0x5bf   : > { %1940 = vst.msk [vmem:[%s733_s15 + $0x10] sm:$0xff] %vm786_vm0, %v1932_v13  ;;  %v1935_v17 = vadd.f32 %v2239_v5, %v1934_v16  ;;  %v1936_v18 = vpop.f32.mrb[23].mxu0 }
 0x5c1   : > { %1941 = vst.msk [vmem:[%s733_s15 + $0x18] sm:$0xff] %vm786_vm0, %v1935_v17 }
 0x5c2 PF: > { %s35_s27 = sadd.s32 1, %s2871_s27  }
 0x5c3   : > { %p32_p7 = scmp.ge.s32.totalorder %s35_s27, 4  }
 0x5c5   :  { %34 = sbr.rel (!%p32_p7) target bundleno = 17 (0x11), region = 172 }
 0x5cc   :  { %1964 = vsyncpa [#allocation3], 1 }
 0x5cd   :  { %1966 = vsyncpa [#allocation3 + $0x1], 1 }
 0x5ce   :  { %1967 = vsyncpa [#allocation7], 1 }
 0x5cf   :  { %1968 = vsyncpa [#allocation10], 1 }
 0x5d0   :  { %1969 = vsyncpa [#allocation13], 1 }
 0x5d1   :  { %1970 = vsyncpa [#allocation16], 1 }
 0x5d2   :  { %1971 = vsyncpa [#allocation19], 1 }
 0x5d3   :  { %1972 = vsyncpa [#allocation4], 1 }
 0x5d4   :  { %1974 = vsyncpa [#allocation4 + $0x1], 1 }

// kernel: tpu_custom_call.1
= control target key start
LH: loop header
LB: loop body
LE: loop exit
PB: predicated region body
PF: predicated region fallthrough
CT: control target
= control target key end

     0   :  { %s3521_s0 = inlined_call_operand.hbm [shape: f32[4], index: 0, kind: input, shape index: {}]   ;;  %s3522_s1 = inlined_call_operand.vmem [shape: bf16[64,32], index: 1, kind: input, shape index: {}]   ;;  %s3523_s2 = inlined_call_operand.hbm [shape: bf16[32,192], index: 2, kind: input, shape index: {}]   ;;  %s3524_s3 = inlined_call_operand.hbm [shape: f32[1,192], index: 3, kind: input, shape index: {}]   ;;  %s3525_s4 = inlined_call_operand.hbm [shape: f32[1,192], index: 4, kind: input, shape index: {}]   ;;  %s3526_s5 = inlined_call_operand.hbm [shape: f32[1,192], index: 5, kind: input, shape index: {}]   ;;  %s3527_s6 = inlined_call_operand.vmem [shape: bf16[192,192], index: 6, kind: input, shape index: {}]   ;;  %s3528_s7 = inlined_call_operand.hbm [shape: f32[1,192], index: 7, kind: input, shape index: {}]   ;;  %s3529_s8 = inlined_call_operand.hbm [shape: bf16[192,192], index: 8, kind: input, shape index: {}]   ;;  %s3530_s9 = inlined_call_operand.hbm [shape: f32[1,192], index: 9, kind: input, shape index: {}]   ;;  %s3531_s10 = inlined_call_operand.hbm [shape: f32[1,192], index: 10, kind: input, shape index: {}]   ;;  %s3532_s11 = inlined_call_operand.hbm [shape: f32[1,192], index: 11, kind: input, shape index: {}]   ;;  %s3533_s12 = inlined_call_operand.hbm [shape: bf16[192,192], index: 12, kind: input, shape index: {}]   ;;  %s3534_s13 = inlined_call_operand.hbm [shape: f32[1,192], index: 13, kind: input, shape index: {}]   ;;  %s3535_s14 = inlined_call_operand.vmem [shape: f32[1,192], index: 14, kind: input, shape index: {}]   ;;  %s3536_s15 = inlined_call_operand.vmem [shape: f32[1,192], index: 15, kind: input, shape index: {}]   ;;  %s3537_s16 = inlined_call_operand.vmem [shape: bf16[192,32], index: 16, kind: input, shape index: {}]   ;;  %s3538_s17 = inlined_call_operand.vmem [shape: f32[1,32], index: 17, kind: input, shape index: {}]   ;;  %s3539_s18 = inlined_call_operand.vmem [shape: f32[64,32], index: 18, kind: output, shape index: {}]  }
   0x1   :  { %3549 = sst [smem:[#allocation28_spill]] %s3521_s0 }
   0x2   :  { %3550 = sst [smem:[#allocation29_spill]] %s3522_s1 }
   0x3   :  { %3551 = sst [smem:[#allocation30_spill]] %s3523_s2 }
   0x4   :  { %3552 = sst [smem:[#allocation31_spill]] %s3524_s3 }
   0x5   :  { %3553 = sst [smem:[#allocation32_spill]] %s3526_s5 }
   0x6   :  { %3554 = sst [smem:[#allocation33_spill]] %s3529_s8 }
   0x7   :  { %3555 = sst [smem:[#allocation34_spill]] %s3536_s15 }
   0x8   :  { %3556 = sst [smem:[#allocation35_spill]] %s3538_s17 }
   0x9   :  { %3557 = sst [smem:[#allocation36_spill]] %s3539_s18 }
   0xa   :  { %23 = vsyncpa [#allocation4], 0 }
   0xb   :  { %24 = vsyncpa [#allocation3], 0 }
   0xc   :  { %25 = vsyncpa [#allocation7], 0 }
   0xd   :  { %26 = vsyncpa [#allocation10], 0 }
   0xe   :  { %27 = vsyncpa [#allocation13], 0 }
   0xf   :  { %28 = vsyncpa [#allocation16], 0 }
  0x10   :  { %29 = vsyncpa [#allocation19], 0  ;;  %s2983_s27 = smov 0  }
  0x11 LB: > { %s2873_s28 = smov [#allocation6]   ;;  %s3542_s30 = sadd.s32 4294967295, %s2871_s27   ;;  %s2871_s27 = sphi %s2983_s27, %s35_s27  }
  0x12   : > { %s484_s29 = sshll.u32 %s2873_s28, 4  ;;  %p2119_p0 = scmp.ge.s32.totalorder %s2871_s27, 1  ;;  %s2997_s29 = int_to_ptr.vmem [resolvable:$true] %s484_s29 }
  0x13   : > { %p449_p1 = scmp.lt.s32.totalorder %s2871_s27, 3  ;;  %p2993_p2 = scmp.eq.s32.totalorder %s3542_s30, 0 }
  0x14   : > { %s2874_s1 = smov [#allocation9]   ;;  %s2875_s22 = smov [#allocation12]  }
  0x15   : > { %s3558_s0 = scalar_select %p2993_p2, 1, 0 }
  0x16   : > { %p2999_p3 = pnand %p2119_p0, %p449_p1  ;;  %s506_s20 = sshll.u32 %s2874_s1, 4  ;;  %s3005_s20 = int_to_ptr.vmem [resolvable:$true] %s506_s20 }
  0x17   : > { %s530_s2 = sshll.u32 %s2875_s22, 4  ;;  %s2876_s23 = smov [#allocation15]   ;;  %s3013_s2 = int_to_ptr.vmem [resolvable:$true] %s530_s2 }
  0x18   : > { %s3559_s19 = scalar_select %p2999_p3, 1, 0 }
  0x19   : > { %p2304_p4 = pneg %p2999_p3  ;;  %s3015_s24 = sshll.u32 %s2876_s23, 4  ;;  %s556_s24 = int_to_ptr.vmem [resolvable:$true] %s3015_s24 }
  0x1a   : > { %s3561_s3 = sld [smem:[#allocation31_spill]] }
  0x1b   : > { %p3009_p5 = pnand %p2993_p2, %p2304_p4 }
  0x1d   : > { %p3025_p7 = pneg %p3009_p5 }
  0x20   : > { %s2516_s28 = scalar_lea.hbm %s3561_s3, 32 }
  0x21   : > { %p2517_p6 = scmp.ne.s32.totalorder %s3561_s3, %s2516_s28  ;;  %p2523_p10 = scmp.lt.u32.totalorder %s2516_s28, %s3561_s3 }
  0x23   : > { %p2519_p8 = pnand %p3025_p7, %p2517_p6 }
  0x25   : > { %p2520_p9 = pneg %p2519_p8 }
  0x27   : > { %p2525_p11 = pnand %p2523_p10, %p2520_p9 }
  0x29   : > { %2528 = shalt.err (!%p2525_p11)
}
  0x2a   : > { %s2529_s30 = scalar_lea.vmem %s2997_s29, 32  ;;  %p2537_p1 = scmp.lt.s32.totalorder %s2997_s29, %s2997_s29 }
  0x2b   : > { %p2530_p12 = scmp.ne.s32.totalorder %s2997_s29, %s2529_s30  ;;  %p2538_p4 = scmp.lt.s32.totalorder %s2529_s30, %s2529_s30 }
  0x2d   : > { %p2532_p13 = pnand %p2530_p12, %p3025_p7  ;;  %p2539_p6 = por %p2538_p4, %p2537_p1 }
  0x2f   : > { %p2533_p0 = pneg %p2532_p13 }
  0x31   : > { %p2540_p8 = pnand %p2539_p6, %p2533_p0 }
  0x33   : > { %2543 = shalt.err (!%p2540_p8)
}
  0x34   : > { %2313 = dma.hbm_to_vmem [thread:$0]  (!%p3009_p5), %s3561_s3, 32, %s2997_s29, [#allocation7]  }
  0x35   : > { %s3563_s5 = sld [smem:[#allocation32_spill]] }
  0x3b   : > { %s2544_s22 = scalar_lea.hbm %s3563_s5, 32 }
  0x3c   : > { %p2545_p9 = scmp.ne.s32.totalorder %s3563_s5, %s2544_s22  ;;  %p2551_p12 = scmp.lt.u32.totalorder %s2544_s22, %s3563_s5 }
  0x3e   : > { %p2547_p10 = pnand %p2545_p9, %p3025_p7 }
  0x40   : > { %p2548_p11 = pneg %p2547_p10 }
  0x42   : > { %p2553_p13 = pnand %p2551_p12, %p2548_p11 }
  0x44   : > { %2556 = shalt.err (!%p2553_p13)
}
  0x45   : > { %s2557_s29 = scalar_lea.vmem %s3005_s20, 32  ;;  %p2565_p6 = scmp.lt.s32.totalorder %s3005_s20, %s3005_s20 }
  0x46   : > { %p2558_p0 = scmp.ne.s32.totalorder %s3005_s20, %s2557_s29  ;;  %p2566_p8 = scmp.lt.s32.totalorder %s2557_s29, %s2557_s29 }
  0x48   : > { %p2560_p1 = pnand %p2558_p0, %p3025_p7  ;;  %p2567_p9 = por %p2566_p8, %p2565_p6 }
  0x4a   : > { %p2561_p4 = pneg %p2560_p1 }
  0x4c   : > { %p2568_p10 = pnand %p2567_p9, %p2561_p4 }
  0x4e   : > { %2571 = shalt.err (!%p2568_p10)
}
  0x4f   : > { %2319 = dma.hbm_to_vmem [thread:$0]  (!%p3009_p5), %s3563_s5, 32, %s3005_s20, [#allocation10]  }
  0x50   : > { %s3564_s8 = sld [smem:[#allocation33_spill]] }
  0x56   : > { %s2572_s28 = scalar_lea.hbm %s3564_s8, 3072 }
  0x57   : > { %p2573_p11 = scmp.ne.s32.totalorder %s3564_s8, %s2572_s28  ;;  %p2579_p0 = scmp.lt.u32.totalorder %s2572_s28, %s3564_s8 }
  0x59   : > { %p2575_p12 = pnand %p2573_p11, %p3025_p7 }
  0x5b   : > { %p2576_p13 = pneg %p2575_p12 }
  0x5d   : > { %p2581_p1 = pnand %p2579_p0, %p2576_p13 }
  0x5f   : > { %2584 = shalt.err (!%p2581_p1)
}
  0x60   : > { %s2585_s20 = scalar_lea.vmem %s3013_s2, 3072  ;;  %p2593_p9 = scmp.lt.s32.totalorder %s3013_s2, %s3013_s2 }
  0x61   : > { %p2586_p4 = scmp.ne.s32.totalorder %s3013_s2, %s2585_s20  ;;  %p2594_p10 = scmp.lt.s32.totalorder %s2585_s20, %s2585_s20 }
  0x63   : > { %p2588_p6 = pnand %p2586_p4, %p3025_p7  ;;  %p2595_p11 = por %p2594_p10, %p2593_p9 }
  0x65   : > { %p2589_p8 = pneg %p2588_p6 }
  0x67   : > { %p2596_p12 = pnand %p2595_p11, %p2589_p8 }
  0x69   : > { %2599 = shalt.err (!%p2596_p12)
}
  0x6a   : > { %s3546_s29 = smov 128   ;;  %s3548_s15 = smov 8  }
  0x6b   : > { %2325 = dma.hbm_to_vmem [thread:$0]  (!%p3009_p5), %s3564_s8, 3072, %s3013_s2, [#allocation13], %s3546_s29, %s3546_s29, %s3548_s15  }
  0x6c   : > { %s2600_s1 = scalar_lea.hbm %s3531_s10, 32 }
  0x6d   : > { %p2601_p13 = scmp.ne.s32.totalorder %s3531_s10, %s2600_s1  ;;  %p2607_p4 = scmp.lt.u32.totalorder %s2600_s1, %s3531_s10 }
  0x6f   : > { %p2603_p0 = pnand %p2601_p13, %p3025_p7 }
  0x71   : > { %p2604_p1 = pneg %p2603_p0 }
  0x73   : > { %p2609_p6 = pnand %p2607_p4, %p2604_p1 }
  0x75   : > { %2612 = shalt.err (!%p2609_p6)
}
  0x76   : > { %s2613_s17 = scalar_lea.vmem %s556_s24, 32  ;;  %p2621_p11 = scmp.lt.s32.totalorder %s556_s24, %s556_s24 }
  0x77   : > { %p2614_p8 = scmp.ne.s32.totalorder %s556_s24, %s2613_s17  ;;  %p2622_p12 = scmp.lt.s32.totalorder %s2613_s17, %s2613_s17 }
  0x79   : > { %p2616_p9 = pnand %p2614_p8, %p3025_p7  ;;  %p2623_p2 = por %p2622_p12, %p2621_p11 }
  0x7b   : > { %p2617_p10 = pneg %p2616_p9 }
  0x7d   : > { %p2624_p3 = pnand %p2623_p2, %p2617_p10 }
  0x7f   : > { %2627 = shalt.err (!%p2624_p3)
}
  0x80   : > { %2331 = dma.hbm_to_vmem [thread:$0]  (!%p3009_p5), %s3531_s10, 32, %s556_s24, [#allocation16]  }
  0x81   : > { %s2879_s26 = smov [#allocation18]   ;;  %s2628_s23 = scalar_lea.hbm %s3533_s12, 3072 }
  0x82   : > { %s576_s28 = sshll.u32 %s2879_s26, 4  ;;  %p2629_p13 = scmp.ne.s32.totalorder %s3533_s12, %s2628_s23  ;;  %s577_s28 = int_to_ptr.vmem [resolvable:$true] %s576_s28 }
  0x83   : > { %p2635_p0 = scmp.lt.u32.totalorder %s2628_s23, %s3533_s12 }
  0x84   : > { %p2631_p2 = pnand %p2629_p13, %p3025_p7 }
  0x86   : > { %p2632_p3 = pneg %p2631_p2 }
  0x88   : > { %p2637_p1 = pnand %p2635_p0, %p2632_p3 }
  0x8a   : > { %2640 = shalt.err (!%p2637_p1)
}
  0x8b   : > { %s2641_s24 = scalar_lea.vmem %s577_s28, 3072  ;;  %p2649_p9 = scmp.lt.s32.totalorder %s577_s28, %s577_s28 }
  0x8c   : > { %p2642_p4 = scmp.ne.s32.totalorder %s577_s28, %s2641_s24  ;;  %p2650_p10 = scmp.lt.s32.totalorder %s2641_s24, %s2641_s24 }
  0x8e   : > { %p2644_p6 = pnand %p2642_p4, %p3025_p7  ;;  %p2651_p11 = por %p2650_p10, %p2649_p9 }
  0x90   : > { %p2645_p8 = pneg %p2644_p6 }
  0x92   : > { %p2652_p12 = pnand %p2651_p11, %p2645_p8 }
  0x94   : > { %2655 = shalt.err (!%p2652_p12)
}
  0x95   : > { %s3565_s2 = smov 128   ;;  %s3566_s22 = sld [smem:[#allocation28_spill]] }
  0x96   : > { %2337 = dma.hbm_to_vmem [thread:$0]  (!%p3009_p5), %s3533_s12, 3072, %s577_s28, [#allocation19], %s3565_s2, %s3565_s2, %s3548_s15  }
  0x9b   : > { %s2656_s23 = scalar_lea.hbm %s3566_s22, 16 }
  0x9c   : > { %p2657_p13 = scmp.ne.s32.totalorder %s3566_s22, %s2656_s23  ;;  %p2663_p0 = scmp.lt.u32.totalorder %s2656_s23, %s3566_s22 }
  0x9e   : > { %p2659_p2 = pnand %p2657_p13, %p3025_p7 }
  0xa0   : > { %p2660_p3 = pneg %p2659_p2 }
  0xa2   : > { %p2665_p1 = pnand %p2663_p0, %p2660_p3 }
  0xa4   : > { %2668 = shalt.err (!%p2665_p1)
}
  0xa5   : > { %s2880_s29 = smov [#allocation2]   ;;  %s2881_s26 = smov [#allocation5]  }
  0xa6   : > { %2307 = dma.hbm_to_smem (!%p3009_p5), %s3566_s22, 16, %s2880_s29, [#allocation4]  }
  0xa7   : > { %s470_s1 = sshll.u32 %s2881_s26, 4  ;;  %s2882_s30 = smov [#allocation8]   ;;  %s471_s1 = int_to_ptr.vmem [resolvable:$true] %s470_s1 }
  0xa8   : > { %s495_s20 = sshll.u32 %s2882_s30, 4  ;;  %s3567_s5 = sld [smem:[#allocation30_spill]]  ;;  %s496_s20 = int_to_ptr.vmem [resolvable:$true] %s495_s20 }
  0xae   : > { %s2669_s17 = scalar_lea.hbm %s3567_s5, 512 }
  0xaf   : > { %p2670_p4 = scmp.ne.s32.totalorder %s3567_s5, %s2669_s17  ;;  %p2676_p9 = scmp.lt.u32.totalorder %s2669_s17, %s3567_s5 }
  0xb1   : > { %p2672_p6 = pnand %p2670_p4, %p3025_p7 }
  0xb3   : > { %p2673_p8 = pneg %p2672_p6 }
  0xb5   : > { %p2678_p10 = pnand %p2676_p9, %p2673_p8 }
  0xb7   : > { %2681 = shalt.err (!%p2678_p10)
}
  0xb8   : > { %s2682_s29 = scalar_lea.vmem %s471_s1, 512  ;;  %p2690_p2 = scmp.lt.s32.totalorder %s471_s1, %s471_s1 }
  0xb9   : > { %p2683_p11 = scmp.ne.s32.totalorder %s471_s1, %s2682_s29  ;;  %p2691_p3 = scmp.lt.s32.totalorder %s2682_s29, %s2682_s29 }
  0xbb   : > { %p2685_p12 = pnand %p2683_p11, %p3025_p7  ;;  %p2692_p0 = por %p2691_p3, %p2690_p2 }
  0xbd   : > { %p2686_p13 = pneg %p2685_p12 }
  0xbf   : > { %p2693_p1 = pnand %p2692_p0, %p2686_p13 }
  0xc1   : > { %2696 = shalt.err (!%p2693_p1)
}
  0xc2   : > { %s3568_s3 = smov 8   ;;  %s2697_s30 = scalar_lea.hbm %s3525_s4, 32 }
  0xc3   : > { %2310 = dma.hbm_to_vmem [thread:$0]  (!%p3009_p5), %s3567_s5, 512, %s471_s1, [#allocation3], %s3565_s2, %s3565_s2, %s3568_s3  }
  0xc4   : > { %p2698_p4 = scmp.ne.s32.totalorder %s3525_s4, %s2697_s30  ;;  %p2704_p9 = scmp.lt.u32.totalorder %s2697_s30, %s3525_s4 }
  0xc6   : > { %p2700_p6 = pnand %p2698_p4, %p3025_p7 }
  0xc8   : > { %p2701_p8 = pneg %p2700_p6 }
  0xca   : > { %p2706_p10 = pnand %p2704_p9, %p2701_p8 }
  0xcc   : > { %2709 = shalt.err (!%p2706_p10)
}
  0xcd   : > { %s2710_s29 = scalar_lea.vmem %s496_s20, 32  ;;  %p2718_p2 = scmp.lt.s32.totalorder %s496_s20, %s496_s20 }
  0xce   : > { %p2711_p11 = scmp.ne.s32.totalorder %s496_s20, %s2710_s29  ;;  %p2719_p3 = scmp.lt.s32.totalorder %s2710_s29, %s2710_s29 }
  0xd0   : > { %p2713_p12 = pnand %p2711_p11, %p3025_p7  ;;  %p2720_p0 = por %p2719_p3, %p2718_p2 }
  0xd2   : > { %p2714_p13 = pneg %p2713_p12 }
  0xd4   : > { %p2721_p1 = pnand %p2720_p0, %p2714_p13 }
  0xd6   : > { %2724 = shalt.err (!%p2721_p1)
}
  0xd7   : > { %2316 = dma.hbm_to_vmem [thread:$0]  (!%p3009_p5), %s3525_s4, 32, %s496_s20, [#allocation7]  }
  0xd8   : > { %s2883_s3 = smov [#allocation11]   ;;  %s2884_s15 = smov [#allocation14]  }
  0xd9   : > { %s520_s8 = sshll.u32 %s2883_s3, 4  ;;  %s544_s25 = sshll.u32 %s2884_s15, 4  ;;  %s521_s8 = int_to_ptr.vmem [resolvable:$true] %s520_s8  ;;  %s545_s25 = int_to_ptr.vmem [resolvable:$true] %s544_s25 }
  0xda   : > { %s2725_s17 = scalar_lea.hbm %s3528_s7, 32 }
  0xdb   : > { %p2726_p4 = scmp.ne.s32.totalorder %s3528_s7, %s2725_s17  ;;  %p2732_p9 = scmp.lt.u32.totalorder %s2725_s17, %s3528_s7 }
  0xdd   : > { %p2728_p6 = pnand %p2726_p4, %p3025_p7 }
  0xdf   : > { %p2729_p8 = pneg %p2728_p6 }
  0xe1   : > { %p2734_p10 = pnand %p2732_p9, %p2729_p8 }
  0xe3   : > { %2737 = shalt.err (!%p2734_p10)
}
  0xe4   : > { %s2738_s20 = scalar_lea.vmem %s521_s8, 32  ;;  %p2746_p2 = scmp.lt.s32.totalorder %s521_s8, %s521_s8 }
  0xe5   : > { %p2739_p11 = scmp.ne.s32.totalorder %s521_s8, %s2738_s20  ;;  %p2747_p3 = scmp.lt.s32.totalorder %s2738_s20, %s2738_s20 }
  0xe7   : > { %p2741_p12 = pnand %p2739_p11, %p3025_p7  ;;  %p2748_p0 = por %p2747_p3, %p2746_p2 }
  0xe9   : > { %p2742_p13 = pneg %p2741_p12 }
  0xeb   : > { %p2749_p1 = pnand %p2748_p0, %p2742_p13 }
  0xed   : > { %2752 = shalt.err (!%p2749_p1)
}
  0xee   : > { %2322 = dma.hbm_to_vmem [thread:$0]  (!%p3009_p5), %s3528_s7, 32, %s521_s8, [#allocation10]  }
  0xef   : > { %s2753_s26 = scalar_lea.hbm %s3530_s9, 32 }
  0xf0   : > { %p2754_p4 = scmp.ne.s32.totalorder %s3530_s9, %s2753_s26  ;;  %p2760_p9 = scmp.lt.u32.totalorder %s2753_s26, %s3530_s9 }
  0xf2   : > { %p2756_p6 = pnand %p2754_p4, %p3025_p7 }
  0xf4   : > { %p2757_p8 = pneg %p2756_p6 }
  0xf6   : > { %p2762_p10 = pnand %p2760_p9, %p2757_p8 }
  0xf8   : > { %2765 = shalt.err (!%p2762_p10)
}
  0xf9   : > { %s2766_s28 = scalar_lea.vmem %s545_s25, 32  ;;  %p2774_p2 = scmp.lt.s32.totalorder %s545_s25, %s545_s25 }
  0xfa   : > { %p2767_p11 = scmp.ne.s32.totalorder %s545_s25, %s2766_s28  ;;  %p2775_p3 = scmp.lt.s32.totalorder %s2766_s28, %s2766_s28 }
  0xfc   : > { %p2769_p12 = pnand %p2767_p11, %p3025_p7  ;;  %p2776_p0 = por %p2775_p3, %p2774_p2 }
  0xfe   : > { %p2770_p13 = pneg %p2769_p12 }
 0x100   : > { %p2777_p1 = pnand %p2776_p0, %p2770_p13 }
 0x102   : > { %2780 = shalt.err (!%p2777_p1)
}
 0x103   : > { %2328 = dma.hbm_to_vmem [thread:$0]  (!%p3009_p5), %s3530_s9, 32, %s545_s25, [#allocation13]  }
 0x104   : > { %s2885_s20 = smov [#allocation17]   ;;  %s2886_s1 = smov [#allocation20]  }
 0x105   : > { %s566_s2 = sshll.u32 %s2885_s20, 4  ;;  %s590_s3 = sshll.u32 %s2886_s1, 4  ;;  %s567_s2 = int_to_ptr.vmem [resolvable:$true] %s566_s2  ;;  %s591_s3 = int_to_ptr.vmem [resolvable:$true] %s590_s3 }
 0x106   : > { %s2781_s30 = scalar_lea.hbm %s3532_s11, 32 }
 0x107   : > { %p2782_p4 = scmp.ne.s32.totalorder %s3532_s11, %s2781_s30  ;;  %p2788_p9 = scmp.lt.u32.totalorder %s2781_s30, %s3532_s11 }
 0x109   : > { %p2784_p6 = pnand %p2782_p4, %p3025_p7 }
 0x10b   : > { %p2785_p8 = pneg %p2784_p6 }
 0x10d   : > { %p2790_p10 = pnand %p2788_p9, %p2785_p8 }
 0x10f   : > { %2793 = shalt.err (!%p2790_p10)
}
 0x110   : > { %s2794_s25 = scalar_lea.vmem %s567_s2, 32  ;;  %p2802_p2 = scmp.lt.s32.totalorder %s567_s2, %s567_s2 }
 0x111   : > { %p2795_p11 = scmp.ne.s32.totalorder %s567_s2, %s2794_s25  ;;  %p2803_p3 = scmp.lt.s32.totalorder %s2794_s25, %s2794_s25 }
 0x113   : > { %p2797_p12 = pnand %p2795_p11, %p3025_p7  ;;  %p2804_p0 = por %p2803_p3, %p2802_p2 }
 0x115   : > { %p2798_p13 = pneg %p2797_p12 }
 0x117   : > { %p2805_p1 = pnand %p2804_p0, %p2798_p13 }
 0x119   : > { %2808 = shalt.err (!%p2805_p1)
}
 0x11a   : > { %2334 = dma.hbm_to_vmem [thread:$0]  (!%p3009_p5), %s3532_s11, 32, %s567_s2, [#allocation16]  }
 0x11b   : > { %s2809_s15 = scalar_lea.hbm %s3534_s13, 32 }
 0x11c   : > { %p2810_p4 = scmp.ne.s32.totalorder %s3534_s13, %s2809_s15  ;;  %p2816_p9 = scmp.lt.u32.totalorder %s2809_s15, %s3534_s13 }
 0x11e   : > { %p2812_p6 = pnand %p2810_p4, %p3025_p7 }
 0x120   : > { %p2813_p8 = pneg %p2812_p6 }
 0x122   : > { %p2818_p10 = pnand %p2816_p9, %p2813_p8 }
 0x124   : > { %2821 = shalt.err (!%p2818_p10)
}
 0x125   : > { %s2822_s24 = scalar_lea.vmem %s591_s3, 32  ;;  %p2830_p2 = scmp.lt.s32.totalorder %s591_s3, %s591_s3 }
 0x126   : > { %p2823_p11 = scmp.ne.s32.totalorder %s591_s3, %s2822_s24  ;;  %p2831_p3 = scmp.lt.s32.totalorder %s2822_s24, %s2822_s24 }
 0x128   : > { %p2825_p12 = pnand %p2823_p11, %p3025_p7  ;;  %p2832_p0 = por %p2831_p3, %p2830_p2 }
 0x12a   : > { %p2826_p13 = pneg %p2825_p12 }
 0x12c   : > { %p2833_p1 = pnand %p2832_p0, %p2826_p13 }
 0x12e   : > { %2836 = shalt.err (!%p2833_p1)
}
 0x12f   : > { %2340 = dma.hbm_to_vmem [thread:$0]  (!%p3009_p5), %s3534_s13, 32, %s591_s3, [#allocation19]  }
 0x130   : > { %p3569_p4 = scmp.ne.s32.totalorder %s3559_s19, 0 }
 0x131   : > { %p3570_p6 = scmp.ne.s32.totalorder (!%p3569_p4), %s3558_s0, 0 }
 0x132   : > { %624 = sbr.rel (%p3569_p4) target bundleno = 1474 (0x5c2), region = 92 }
 0x139   : > { %2842 = dma.done.wait (%p3570_p6), [#allocation4], 16  }
 0x13a   : > { %2844 = vsyncadd (%p3570_p6), [#allocation4], 4294967280 }
 0x13b   : > { %2846 = dma.done.wait (%p3570_p6), [#allocation3], 512  }
 0x13c   : > { %2848 = vsyncadd (%p3570_p6), [#allocation3], 4294966784 }
 0x13d   : > { %2850 = dma.done.wait (%p3570_p6), [#allocation7], 64  }
 0x13e   : > { %2852 = vsyncadd (%p3570_p6), [#allocation7], 4294967232 }
 0x13f   : > { %2854 = dma.done.wait (%p3570_p6), [#allocation10], 64  }
 0x140   : > { %2856 = vsyncadd (%p3570_p6), [#allocation10], 4294967232 }
 0x141   : > { %2858 = dma.done.wait (%p3570_p6), [#allocation13], 3104  }
 0x142   : > { %2860 = vsyncadd (%p3570_p6), [#allocation13], 4294964192 }
 0x143   : > { %2862 = dma.done.wait (%p3570_p6), [#allocation16], 64  }
 0x144   : > { %2864 = vsyncadd (%p3570_p6), [#allocation16], 4294967232 }
 0x145   : > { %2866 = dma.done.wait (%p3570_p6), [#allocation19], 3104  }
 0x146   : > { %2868 = vsyncadd (%p3570_p6), [#allocation19], 4294964192 }
 0x147   : > { %674 = sfence }
 0x148   : > { %v2388_v0 = vld [vmem:[#allocation5 + $0x4] ss:$8 sps:$4 sm:$0xff]   ;;  %s3571_s18 = sadd.s32 4294967295, %s2871_s27   ;;  %v2390_v1 = vld [vmem:[#allocation5] ss:$8 sps:$4 sm:$0xff]   ;;  %v2887_v2 = vmov 0   ;;  %v746_v49 = vlaneseq }
 0x149   : > { %s2146_s19 = sshll.u32 %s3571_s18, 2  ;;  %825 = vmatprep.mubr.bf16.mxu0 %v2887_v2  ;;  %793 = vmatprep.subr.bf16.mxu0 %v2388_v0  ;;  %v2391_v3 = vld [vmem:[#allocation5 + $0x14] ss:$8 sps:$4 sm:$0xff]   ;;  %v2393_v4 = vld [vmem:[#allocation5 + $0x10] ss:$8 sps:$4 sm:$0xff]   ;;  %s3572_s26 = sld [smem:[#allocation29_spill]] }
 0x14a   : > { %p724_p5 = scmp.lt.s32.totalorder %s2146_s19, 7  ;;  %794 = vmatpush1.bf16.msra.mxu0 %v2390_v1  ;;  %v2396_v5 = vld [vmem:[%s3527_s6 + $0x4] ss:$8 sps:$4 sm:$0xff]   ;;  %v2398_v6 = vld [vmem:[%s3527_s6] ss:$8 sps:$4 sm:$0xff]   ;;  %vm786_vm0 = vcmask 261120  }
 0x14b   : > { %795 = vmatprep.subr.bf16.mxu0 %v2391_v3  ;;  %v2399_v7 = vld [vmem:[%s3527_s6 + $0x14] ss:$8 sps:$4 sm:$0xff]   ;;  %1083 = vmatprep.subr.bf16.mxu1 %v2396_v5  ;;  %v2401_v8 = vld [vmem:[%s3527_s6 + $0x10] ss:$8 sps:$4 sm:$0xff]   ;;  %v2402_v9 = vld [vmem:[%s3527_s6 + $0x24] ss:$8 sps:$4 sm:$0xff]  }
 0x14c   : > { %s3577_s19 = smov (!%p724_p5, %s2146_s19), 7  ;;  %1084 = vmatpush1.bf16.msra.mxu1 %v2398_v6  ;;  %v2404_v11 = vld [vmem:[%s3527_s6 + $0x20] ss:$8 sps:$4 sm:$0xff]   ;;  %v2405_v12 = vld [vmem:[%s3527_s6 + $0x34] ss:$8 sps:$4 sm:$0xff]   ;;  %v747_v50 = vshrl.u32 %v746_v49, 7 }
 0x14d   : > { %s2147_s20 = sshll.u32 %s3577_s19, 2  ;;  %1085 = vmatprep.subr.bf16.mxu1 %v2399_v7  ;;  %v2407_v14 = vld [vmem:[%s3527_s6 + $0x30] ss:$8 sps:$4 sm:$0xff]   ;;  %v2408_v15 = vld [vmem:[%s3527_s6 + $0x44] ss:$8 sps:$4 sm:$0xff]   ;;  %s850_s0 = sld [smem:[#allocation2]] }
 0x14e   : > { %796 = vmatpush1.bf16.msra.mxu0 %v2393_v4  ;;  %v2410_v16 = vld [vmem:[%s3527_s6 + $0x40] ss:$8 sps:$4 sm:$0xff]   ;;  %v2411_v17 = vld [vmem:[%s3527_s6 + $0x54] ss:$8 sps:$4 sm:$0xff]   ;;  %v2413_v18 = vld [vmem:[%s3527_s6 + $0x50] ss:$8 sps:$4 sm:$0xff]  }
 0x14f   : > { %s727_s30 = scalar_lea.vmem %s3572_s26, %s2147_s20  ;;  %v2414_v19 = vld [vmem:[%s3527_s6 + $0x64] ss:$8 sps:$4 sm:$0xff]   ;;  %v2416_v20 = vld [vmem:[%s3527_s6 + $0x60] ss:$8 sps:$4 sm:$0xff]   ;;  %v2417_v21 = vld [vmem:[%s3527_s6 + $0x74] ss:$8 sps:$4 sm:$0xff]  }
 0x150   : > { %v2394_v10 = vld [vmem:[%s727_s30] sm:$0xff]   ;;  %1086 = vmatpush1.bf16.msra.mxu1 %v2401_v8  ;;  %v2395_v13 = vld [vmem:[%s727_s30 + $0x8] sm:$0xff]   ;;  %v2419_v22 = vld [vmem:[%s3527_s6 + $0x70] ss:$8 sps:$4 sm:$0xff]   ;;  %v3376_v51 = vsub.s32 0, %v747_v50  ;;  %v3378_v53 = vsub.s32 1, %v747_v50 }
 0x151   : > { %2156 = vmatmul.mubr.msk.bf16.vlgmr.msra.gmra.mrb[0].mxu0 %vm786_vm0, %v2394_v10  ;;  %1087 = vmatprep.subr.bf16.mxu1 %v2402_v9  ;;  %v2420_v23 = vld [vmem:[%s3527_s6 + $0x84] ss:$8 sps:$4 sm:$0xff]   ;;  %v2422_v24 = vld [vmem:[%s3527_s6 + $0x80] ss:$8 sps:$4 sm:$0xff]   ;;  %v2423_v25 = vld [vmem:[%s3527_s6 + $0x94] ss:$8 sps:$4 sm:$0xff]  }
 0x152   : > { %835 = vmatprep.mubr.bf16.mxu0 %v2887_v2  ;;  %v2425_v26 = vld [vmem:[%s3527_s6 + $0x90] ss:$8 sps:$4 sm:$0xff]   ;;  %v2426_v27 = vld [vmem:[%s3527_s6 + $0xa4] ss:$8 sps:$4 sm:$0xff]   ;;  %v2428_v28 = vld [vmem:[%s3527_s6 + $0xa0] ss:$8 sps:$4 sm:$0xff]  }
 0x153   : > { %v2429_v29 = vld [vmem:[%s3527_s6 + $0xb4] ss:$8 sps:$4 sm:$0xff]   ;;  %v2431_v30 = vld [vmem:[%s3527_s6 + $0xb0] ss:$8 sps:$4 sm:$0xff]   ;;  %v744_v52 = vld [vmem:[#allocation6] sm:$0x3]  ;;  %v899_v7 = vstv %s850_s0 }
 0x154   : > { %1088 = vmatpush1.bf16.msra.mxu1 %v2404_v11  ;;  %v2432_v31 = vld [vmem:[#allocation12] ss:$8 sps:$4 sm:$0xff]   ;;  %v2434_v32 = vld [vmem:[#allocation12 + $0x4] ss:$8 sps:$4 sm:$0xff]   ;;  %v2437_v33 = vld [vmem:[#allocation12 + $0x14] ss:$8 sps:$4 sm:$0xff]   ;;  %v749_v55 = vrot.slane %v744_v52, %v3376_v51  ;;  %v753_v57 = vrot.slane %v744_v52, %v3378_v53 }
 0x155   : > { %1089 = vmatprep.subr.bf16.mxu1 %v2405_v12  ;;  %1328 = vmatprep.subr.bf16.mxu0 %v2434_v32  ;;  %v2435_v34 = vld [vmem:[#allocation12 + $0x10] ss:$8 sps:$4 sm:$0xff]   ;;  %v2440_v35 = vld [vmem:[#allocation12 + $0x24] ss:$8 sps:$4 sm:$0xff]   ;;  %v2438_v36 = vld [vmem:[#allocation12 + $0x20] ss:$8 sps:$4 sm:$0xff]  }
 0x156   : > { %1329 = vmatpush1.bf16.msra.mxu0 %v2432_v31  ;;  %v2443_v37 = vld [vmem:[#allocation12 + $0x34] ss:$8 sps:$4 sm:$0xff]   ;;  %v2441_v38 = vld [vmem:[#allocation12 + $0x30] ss:$8 sps:$4 sm:$0xff]   ;;  %v2446_v39 = vld [vmem:[#allocation12 + $0x44] ss:$8 sps:$4 sm:$0xff]  }
 0x157   : > { %1330 = vmatprep.subr.bf16.mxu0 %v2437_v33  ;;  %v2444_v40 = vld [vmem:[#allocation12 + $0x40] ss:$8 sps:$4 sm:$0xff]   ;;  %v2449_v41 = vld [vmem:[#allocation12 + $0x54] ss:$8 sps:$4 sm:$0xff]   ;;  %v2447_v42 = vld [vmem:[#allocation12 + $0x50] ss:$8 sps:$4 sm:$0xff]  }
 0x158   : > { %1090 = vmatpush1.bf16.msra.mxu1 %v2407_v14  ;;  %v2452_v43 = vld [vmem:[#allocation12 + $0x64] ss:$8 sps:$4 sm:$0xff]   ;;  %v2450_v44 = vld [vmem:[#allocation12 + $0x60] ss:$8 sps:$4 sm:$0xff]   ;;  %v2455_v45 = vld [vmem:[#allocation12 + $0x74] ss:$8 sps:$4 sm:$0xff]  }
 0x159   : > { %2157 = vmatmul.mubr.msk.bf16.gmra.mrb[4].mxu0 %vm786_vm0, %v2395_v13  ;;  %1091 = vmatprep.subr.bf16.mxu1 %v2408_v15  ;;  %v2453_v46 = vld [vmem:[#allocation12 + $0x70] ss:$8 sps:$4 sm:$0xff]   ;;  %v2458_v47 = vld [vmem:[#allocation12 + $0x84] ss:$8 sps:$4 sm:$0xff]   ;;  %v2456_v48 = vld [vmem:[#allocation12 + $0x80] ss:$8 sps:$4 sm:$0xff]  }
 0x15a   : > { %1331 = vmatpush1.bf16.msra.mxu0 %v2435_v34  ;;  %v851_v54 = vld [vmem:[#allocation8] sm:$0x3]  ;;  %v871_v56 = vld [vmem:[#allocation9] sm:$0x3]  ;;  %vm1076_vm3 = vcmask 523264   ;;  %s2184_s25 = sld [smem:[#allocation2 + $0x1]] }
 0x15b   : > { %1332 = vmatprep.subr.bf16.mxu0 %v2440_v35  ;;  %v856_v58 = vrot.slane %v851_v54, %v3376_v51  ;;  %v860_v60 = vrot.slane %v851_v54, %v3378_v53  ;;  %v876_v62 = vrot.slane %v871_v56, %v3376_v51  ;;  %v880_v1 = vrot.slane %v871_v56, %v3378_v53  ;;  %s2238_s23 = sld [smem:[#allocation2 + $0x3]]  ;;  %s3573_s21 = sld [smem:[#allocation34_spill]] }
 0x15c   : > { %1092 = vmatpush1.bf16.msra.mxu1 %v2410_v16  ;;  %s2149_s3 = sshll.u32 %s3577_s19, 3  ;;  %s3574_s8 = sld [smem:[#allocation35_spill]] }
 0x15d   : > { %1093 = vmatprep.subr.bf16.mxu1 %v2411_v17  ;;  %s3575_s1 = sld [smem:[#allocation36_spill]] }
 0x15e   : > { %1333 = vmatpush1.bf16.msra.mxu0 %v2438_v36 }
 0x15f   : > { %1334 = vmatprep.subr.bf16.mxu0 %v2443_v37 }
 0x160   : > { %1094 = vmatpush1.bf16.msra.mxu1 %v2413_v18 }
 0x161   : > { %1095 = vmatprep.subr.bf16.mxu1 %v2414_v19 }
 0x162   : > { %1335 = vmatpush1.bf16.msra.mxu0 %v2441_v38 }
 0x163   : > { %1336 = vmatprep.subr.bf16.mxu0 %v2446_v39  ;;  %s733_s15 = scalar_lea.vmem %s3575_s1, %s2149_s3 }
 0x164   : > { %1096 = vmatpush1.bf16.msra.mxu1 %v2416_v20 }
 0x165   : > { %1097 = vmatprep.subr.bf16.mxu1 %v2417_v21 }
 0x166   : > { %1337 = vmatpush1.bf16.msra.mxu0 %v2444_v40 }
 0x167   : > { %1338 = vmatprep.subr.bf16.mxu0 %v2449_v41 }
 0x168   : > { %1098 = vmatpush1.bf16.msra.mxu1 %v2419_v22 }
 0x169   : > { %1099 = vmatprep.subr.bf16.mxu1 %v2420_v23 }
 0x16a   : > { %1339 = vmatpush1.bf16.msra.mxu0 %v2447_v42 }
 0x16b   : > { %1340 = vmatprep.subr.bf16.mxu0 %v2452_v43 }
 0x16c   : > { %1100 = vmatpush1.bf16.msra.mxu1 %v2422_v24 }
 0x16d   : > { %1101 = vmatprep.subr.bf16.mxu1 %v2423_v25 }
 0x16e   : > { %1341 = vmatpush1.bf16.msra.mxu0 %v2450_v44 }
 0x16f   : > { %1342 = vmatprep.subr.bf16.mxu0 %v2455_v45 }
 0x170   : > { %1102 = vmatpush1.bf16.msra.mxu1 %v2425_v26 }
 0x171   : > { %1103 = vmatprep.subr.bf16.mxu1 %v2426_v27 }
 0x172   : > { %1343 = vmatpush1.bf16.msra.mxu0 %v2453_v46 }
 0x173   : > { %1344 = vmatprep.subr.bf16.mxu0 %v2458_v47 }
 0x174   : > { %1104 = vmatpush1.bf16.msra.mxu1 %v2428_v28 }
 0x175   : > { %1105 = vmatprep.subr.bf16.mxu1 %v2429_v29 }
 0x176   : > { %1345 = vmatpush1.bf16.msra.mxu0 %v2456_v48 }
 0x178   : > { %1106 = vmatpush1.bf16.msra.mxu1 %v2431_v30 }
 0x224   : > { %v827_v59 = vpop.f32.mrb[0].mxu0 }
 0x225   : > { %v828_v61 = vadd.f32 %v827_v59, %v749_v55  ;;  %v829_v63 = vpop.f32.mrb[1].mxu0  ;;  %v2459_v59 = vld [vmem:[#allocation12 + $0x90] ss:$8 sps:$4 sm:$0xff]  }
 0x226   : > { %v830_v0 = vadd.f32 %v829_v63, %v753_v57  ;;  %v831_v3 = vpop.f32.mrb[2].mxu0  ;;  %v2465_v63 = vld [vmem:[#allocation12 + $0xb0] ss:$8 sps:$4 sm:$0xff]  }
 0x227   : > { %v863_v4 = vmul.f32 %v856_v58, %v828_v61  ;;  %v832_v5 = vadd.f32 %v831_v3, %v749_v55  ;;  %v833_v6 = vpop.f32.mrb[3].mxu0  ;;  %v2473_v3 = vld [vmem:[#allocation18 + $0x14] ss:$8 sps:$4 sm:$0xff]  }
 0x228   : > { %v864_v8 = vmul.f32 %v860_v60, %v830_v0  ;;  %v834_v9 = vadd.f32 %v833_v6, %v753_v57  ;;  %v2474_v6 = vld [vmem:[#allocation18 + $0x20] ss:$8 sps:$4 sm:$0xff]  }
 0x229   : > { %v883_v10 = vadd.f32 %v876_v62, %v863_v4  ;;  %v3386_v11 = vpack.c.bf16 %v832_v5, %v828_v61  ;;  %v865_v12 = vmul.f32 %v856_v58, %v832_v5  ;;  %v2462_v61 = vld [vmem:[#allocation12 + $0xa0] ss:$8 sps:$4 sm:$0xff]  }
 0x22a   : > { %v884_v13 = vadd.f32 %v880_v1, %v864_v8  ;;  %v3388_v14 = vpack.c.bf16 %v834_v9, %v830_v0  ;;  %v866_v15 = vmul.f32 %v860_v60, %v834_v9  ;;  %v2468_v0 = vld [vmem:[#allocation18] ss:$8 sps:$4 sm:$0xff]   ;;  %v2471_v4 = vld [vmem:[#allocation18 + $0x10] ss:$8 sps:$4 sm:$0xff]   ;;  %v2476_v5 = vld [vmem:[#allocation18 + $0x24] ss:$8 sps:$4 sm:$0xff]  }
 0x22b   : > { %v900_v16 = vmul.f32 %v899_v7, %v883_v10  ;;  %v885_v17 = vadd.f32 %v876_v62, %v865_v12  ;;  %vm891_vm1 = vcmp.gt.f32.partialorder %v883_v10, 0.0  ;;  %v2477_v8 = vld [vmem:[#allocation18 + $0x30] ss:$8 sps:$4 sm:$0xff]   ;;  %v2482_v9 = vld [vmem:[#allocation18 + $0x44] ss:$8 sps:$4 sm:$0xff]  }
 0x22c   : > { %v886_v18 = vadd.f32 %v880_v1, %v866_v15  ;;  %v837_v19 = vpop.f32.mrb[4].mxu0  ;;  %vm892_vm2 = vcmp.gt.f32.partialorder %v884_v13, 0.0  ;;  %v901_v20 = vmul.f32 %v899_v7, %v884_v13  ;;  %v2485_v12 = vld [vmem:[#allocation18 + $0x54] ss:$8 sps:$4 sm:$0xff]   ;;  %v2488_v15 = vld [vmem:[#allocation18 + $0x64] ss:$8 sps:$4 sm:$0xff]  }
 0x22d   : > { %v902_v21 = vmul.f32 %v899_v7, %v885_v17  ;;  %v838_v22 = vadd.f32 %v837_v19, %v749_v55  ;;  %v839_v23 = vpop.f32.mrb[5].mxu0  ;;  %vm893_vm4 = vcmp.gt.f32.partialorder %v885_v17, 0.0  ;;  %v908_v27 = vsel %vm891_vm1, %v883_v10, %v900_v16  ;;  %v2480_v10 = vld [vmem:[#allocation18 + $0x40] ss:$8 sps:$4 sm:$0xff]  }
 0x22e   : > { %v840_v24 = vadd.f32 %v839_v23, %v753_v57  ;;  %v841_v25 = vpop.f32.mrb[6].mxu0  ;;  %vm894_vm5 = vcmp.gt.f32.partialorder %v886_v18, 0.0  ;;  %v903_v26 = vmul.f32 %v899_v7, %v886_v18  ;;  %v909_v31 = vsel %vm892_vm2, %v884_v13, %v901_v20  ;;  %v2483_v13 = vld [vmem:[#allocation18 + $0x50] ss:$8 sps:$4 sm:$0xff]   ;;  %v2486_v16 = vld [vmem:[#allocation18 + $0x60] ss:$8 sps:$4 sm:$0xff]  }
 0x22f   : > { %v867_v28 = vmul.f32 %v856_v58, %v838_v22  ;;  %v842_v29 = vadd.f32 %v841_v25, %v749_v55  ;;  %v843_v30 = vpop.f32.mrb[7].mxu0  ;;  %v910_v32 = vsel %vm893_vm4, %v885_v17, %v902_v21  ;;  %v944_v17 = vld [vmem:[#allocation11] sm:$0x3]  ;;  %v1145_v21 = vstv %s2184_s25  ;;  %s2211_s25 = sld [smem:[#allocation2 + $0x2]] }
 0x230   : > { %v868_v33 = vmul.f32 %v860_v60, %v840_v24  ;;  %v844_v34 = vadd.f32 %v843_v30, %v753_v57  ;;  %v911_v35 = vsel %vm894_vm5, %v886_v18, %v903_v26  ;;  %v916_v36 = vpack.c.bf16 %v910_v32, %v908_v27 }
 0x231   : > { %v887_v37 = vadd.f32 %v876_v62, %v867_v28  ;;  %v3390_v38 = vpack.c.bf16 %v842_v29, %v838_v22  ;;  %v869_v39 = vmul.f32 %v856_v58, %v842_v29  ;;  %v917_v40 = vpack.c.bf16 %v911_v35, %v909_v31  ;;  %v2461_v58 = vld [vmem:[#allocation12 + $0x94] ss:$8 sps:$4 sm:$0xff]  }
 0x232   : > { %v888_v41 = vadd.f32 %v880_v1, %v868_v33  ;;  %v3392_v42 = vpack.c.bf16 %v844_v34, %v840_v24  ;;  %v870_v43 = vmul.f32 %v860_v60, %v844_v34  ;;  %1346 = vmatprep.subr.bf16.mxu0 %v2461_v58  ;;  %v2464_v60 = vld [vmem:[#allocation12 + $0xa4] ss:$8 sps:$4 sm:$0xff]   ;;  %v949_v18 = vrot.slane %v944_v17, %v3376_v51 }
 0x233   : > { %v904_v44 = vmul.f32 %v899_v7, %v887_v37  ;;  %v889_v45 = vadd.f32 %v876_v62, %v869_v39  ;;  %2182 = vmatprep.mubr.msk.bf16.mxu1 %vm1076_vm3, %v917_v40  ;;  %vm895_vm6 = vcmp.gt.f32.partialorder %v887_v37, 0.0  ;;  %1347 = vmatpush1.bf16.msra.mxu0 %v2459_v59  ;;  %v2467_v62 = vld [vmem:[#allocation12 + $0xb4] ss:$8 sps:$4 sm:$0xff]   ;;  %v953_v19 = vrot.slane %v944_v17, %v3378_v53 }
 0x234   : > { %v905_v46 = vmul.f32 %v899_v7, %v888_v41  ;;  %v890_v47 = vadd.f32 %v880_v1, %v870_v43  ;;  %1116 = vmatmul.mubr.bf16.vlgmr.msra.gmra.mrb[0].mxu1 %v916_v36  ;;  %vm896_vm7 = vcmp.gt.f32.partialorder %v888_v41, 0.0  ;;  %1348 = vmatprep.subr.bf16.mxu0 %v2464_v60  ;;  %v2470_v1 = vld [vmem:[#allocation18 + $0x4] ss:$8 sps:$4 sm:$0xff]  }
 0x235   : > { %v906_v48 = vmul.f32 %v899_v7, %v889_v45  ;;  %vm897_vm8 = vcmp.gt.f32.partialorder %v889_v45, 0.0  ;;  %v912_v50 = vsel %vm895_vm6, %v887_v37, %v904_v44  ;;  %1641 = vmatprep.subr.bf16.mxu1 %v2470_v1  ;;  %v2497_v1 = vld [vmem:[#allocation18 + $0x94] ss:$8 sps:$4 sm:$0xff]   ;;  %v2511_v17 = vld [vmem:[%s3537_s16 + $0x38] sm:$0xff]  }
 0x236   : > { %vm898_vm9 = vcmp.gt.f32.partialorder %v890_v47, 0.0  ;;  %v907_v49 = vmul.f32 %v899_v7, %v890_v47  ;;  %v913_v54 = vsel %vm896_vm7, %v888_v41, %v905_v46  ;;  %1642 = vmatpush1.bf16.msra.mxu1 %v2468_v0  ;;  %v2479_v7 = vld [vmem:[#allocation18 + $0x34] ss:$8 sps:$4 sm:$0xff]   ;;  %v2492_v0 = vld [vmem:[#allocation18 + $0x80] ss:$8 sps:$4 sm:$0xff]  }
 0x237   : > { %v914_v52 = vsel %vm897_vm8, %v889_v45, %v906_v48  ;;  %1349 = vmatpush1.bf16.msra.mxu0 %v2462_v61  ;;  %1643 = vmatprep.subr.bf16.mxu1 %v2473_v3  ;;  %v2491_v61 = vld [vmem:[#allocation18 + $0x74] ss:$8 sps:$4 sm:$0xff]   ;;  %v2495_v3 = vld [vmem:[#allocation18 + $0x90] ss:$8 sps:$4 sm:$0xff]  }
 0x238   : > { %v915_v55 = vsel %vm898_vm9, %v890_v47, %v907_v49  ;;  %v918_v56 = vpack.c.bf16 %v914_v52, %v912_v50  ;;  %1350 = vmatprep.subr.bf16.mxu0 %v2467_v62  ;;  %v2489_v62 = vld [vmem:[#allocation18 + $0x70] ss:$8 sps:$4 sm:$0xff]  }
 0x239   : > { %v919_v57 = vpack.c.bf16 %v915_v55, %v913_v54 }
 0x23a   : > { %1644 = vmatpush1.bf16.msra.mxu1 %v2471_v4  ;;  %v2500_v4 = vld [vmem:[#allocation18 + $0xa4] ss:$8 sps:$4 sm:$0xff]  }
 0x23b   : > { %2183 = vmatprep.mubr.msk.bf16.mxu1 %vm1076_vm3, %v919_v57  ;;  %1351 = vmatpush1.bf16.msra.mxu0 %v2465_v63  ;;  %v2494_v63 = vld [vmem:[#allocation18 + $0x84] ss:$8 sps:$4 sm:$0xff]  }
 0x23c   : > { %1126 = vmatmul.mubr.bf16.gmra.mrb[4].mxu1 %v918_v56  ;;  %1889 = vmatprep.subr.bf16.mxu0 %v2887_v2 }
 0x23d   : > { %1645 = vmatprep.subr.bf16.mxu1 %v2476_v5  ;;  %v2498_v5 = vld [vmem:[#allocation18 + $0xa0] ss:$8 sps:$4 sm:$0xff]  }
 0x23e   : > { %1646 = vmatpush1.bf16.msra.mxu1 %v2474_v6  ;;  %v2503_v6 = vld [vmem:[#allocation18 + $0xb4] ss:$8 sps:$4 sm:$0xff]  }
 0x23f   : > { %1647 = vmatprep.subr.bf16.mxu1 %v2479_v7  ;;  %v2501_v7 = vld [vmem:[#allocation18 + $0xb0] ss:$8 sps:$4 sm:$0xff]  }
 0x242   : > { %1648 = vmatpush1.bf16.msra.mxu1 %v2477_v8  ;;  %v2504_v8 = vld [vmem:[%s3537_s16] sm:$0xff]  }
 0x243   : > { %1649 = vmatprep.subr.bf16.mxu1 %v2482_v9  ;;  %v2505_v9 = vld [vmem:[%s3537_s16 + $0x8] sm:$0xff]  }
 0x246   : > { %1650 = vmatpush1.bf16.msra.mxu1 %v2480_v10  ;;  %v2506_v10 = vld [vmem:[%s3537_s16 + $0x10] sm:$0xff]  }
 0x247   : > { %1651 = vmatprep.subr.bf16.mxu1 %v2485_v12  ;;  %v2507_v12 = vld [vmem:[%s3537_s16 + $0x18] sm:$0xff]  }
 0x24a   : > { %1652 = vmatpush1.bf16.msra.mxu1 %v2483_v13  ;;  %v2508_v13 = vld [vmem:[%s3537_s16 + $0x20] sm:$0xff]  }
 0x24b   : > { %1653 = vmatprep.subr.bf16.mxu1 %v2488_v15  ;;  %v2509_v15 = vld [vmem:[%s3537_s16 + $0x28] sm:$0xff]  }
 0x24e   : > { %1654 = vmatpush1.bf16.msra.mxu1 %v2486_v16  ;;  %v2510_v16 = vld [vmem:[%s3537_s16 + $0x30] sm:$0xff]  }
 0x24f   : > { %1655 = vmatprep.subr.bf16.mxu1 %v2491_v61 }
 0x252   : > { %1656 = vmatpush1.bf16.msra.mxu1 %v2489_v62 }
 0x253   : > { %1657 = vmatprep.subr.bf16.mxu1 %v2494_v63 }
 0x256   : > { %1658 = vmatpush1.bf16.msra.mxu1 %v2492_v0 }
 0x257   : > { %1659 = vmatprep.subr.bf16.mxu1 %v2497_v1 }
 0x25a   : > { %1660 = vmatpush1.bf16.msra.mxu1 %v2495_v3 }
 0x25b   : > { %1661 = vmatprep.subr.bf16.mxu1 %v2500_v4 }
 0x25e   : > { %1662 = vmatpush1.bf16.msra.mxu1 %v2498_v5 }
 0x25f   : > { %1663 = vmatprep.subr.bf16.mxu1 %v2503_v6 }
 0x262   : > { %1664 = vmatpush1.bf16.msra.mxu1 %v2501_v7 }
 0x307   : > { %v1117_v20 = vpop.f32.mrb[0].mxu1 }
 0x308   : > { %v1118_v22 = vadd.f32 %v1117_v20, %v949_v18  ;;  %v1119_v23 = vpop.f32.mrb[1].mxu1 }
 0x309   : > { %v1120_v24 = vadd.f32 %v1119_v23, %v953_v19  ;;  %v1121_v25 = vpop.f32.mrb[2].mxu1 }
 0x30a   : > { %v1146_v26 = vmul.f32 %v1145_v21, %v1118_v22  ;;  %v1122_v27 = vadd.f32 %v1121_v25, %v949_v18  ;;  %v1123_v28 = vpop.f32.mrb[3].mxu1  ;;  %vm1136_vm10 = vcmp.gt.f32.partialorder %v1118_v22, 0.0 }
 0x30b   : > { %v1147_v29 = vmul.f32 %v1145_v21, %v1120_v24  ;;  %v1124_v30 = vadd.f32 %v1123_v28, %v953_v19  ;;  %vm1137_vm11 = vcmp.gt.f32.partialorder %v1120_v24, 0.0  ;;  %v1382_v28 = vunpack.c.l.bf16 %v3388_v14 }
 0x30c   : > { %vm1138_vm12 = vcmp.gt.f32.partialorder %v1122_v27, 0.0  ;;  %v1148_v31 = vmul.f32 %v1145_v21, %v1122_v27  ;;  %v1154_v33 = vsel %vm1136_vm10, %v1118_v22, %v1146_v26  ;;  %v1410_v22 = vld [vmem:[#allocation15] sm:$0x3]  ;;  %v1430_v26 = vld [vmem:[#allocation17] sm:$0x3] }
 0x30d   : > { %vm1139_vm13 = vcmp.gt.f32.partialorder %v1124_v30, 0.0  ;;  %v1149_v32 = vmul.f32 %v1145_v21, %v1124_v30  ;;  %v1155_v35 = vsel %vm1137_vm11, %v1120_v24, %v1147_v29  ;;  %v1381_v24 = vunpack.c.l.bf16 %v3386_v11 }
 0x30e   : > { %v1156_v34 = vsel %vm1138_vm12, %v1122_v27, %v1148_v31  ;;  %v3438_v31 = vrot.slane %v1410_v22, %v3376_v51 }
 0x30f   : > { %v1162_v36 = vpack.c.bf16 %v1156_v34, %v1154_v33  ;;  %v1157_v37 = vsel %vm1139_vm13, %v1124_v30, %v1149_v32  ;;  %v1127_v39 = vpop.f32.mrb[4].mxu1  ;;  %v1383_v33 = vunpack.c.h.bf16 %v3386_v11  ;;  %v1385_v11 = vunpack.c.l.bf16 %v3390_v38 }
 0x310   : > { %v1163_v40 = vpack.c.bf16 %v1157_v37, %v1155_v35  ;;  %v1128_v41 = vadd.f32 %v1127_v39, %v949_v18  ;;  %v1129_v43 = vpop.f32.mrb[5].mxu1  ;;  %v1384_v39 = vunpack.c.h.bf16 %v3388_v14 }
 0x311   : > { %v1130_v44 = vadd.f32 %v1129_v43, %v953_v19  ;;  %v1131_v45 = vpop.f32.mrb[6].mxu1 }
 0x312   : > { %v1150_v46 = vmul.f32 %v1145_v21, %v1128_v41  ;;  %v1132_v47 = vadd.f32 %v1131_v45, %v949_v18  ;;  %v1133_v48 = vpop.f32.mrb[7].mxu1  ;;  %2209 = vmatprep.mubr.msk.bf16.mxu0 %vm1076_vm3, %v1163_v40  ;;  %vm1140_vm14 = vcmp.gt.f32.partialorder %v1128_v41, 0.0  ;;  %v1190_v18 = vld [vmem:[#allocation14] sm:$0x3]  ;;  %v1439_v45 = vrot.slane %v1430_v26, %v3378_v53 }
 0x313   : > { %v1151_v49 = vmul.f32 %v1145_v21, %v1130_v44  ;;  %v1134_v50 = vadd.f32 %v1133_v48, %v953_v19  ;;  %1361 = vmatmul.mubr.bf16.vlgmr.msra.gmra.mrb[8].mxu0 %v1162_v36  ;;  %vm1141_vm15 = vcmp.gt.f32.partialorder %v1130_v44, 0.0  ;;  %v1195_v19 = vrot.slane %v1190_v18, %v3376_v51 }
 0x314   : > { %vm1142_vm1 = vcmp.gt.f32.partialorder %v1132_v47, 0.0  ;;  %v1152_v52 = vmul.f32 %v1145_v21, %v1132_v47  ;;  %v1158_v55 = vsel %vm1140_vm14, %v1128_v41, %v1150_v46  ;;  %1890 = vmatpush1.bf16.msra.mxu0 %v2504_v8  ;;  %v1199_v20 = vrot.slane %v1190_v18, %v3378_v53 }
 0x315   : > { %vm1143_vm2 = vcmp.gt.f32.partialorder %v1134_v50, 0.0  ;;  %v1153_v54 = vmul.f32 %v1145_v21, %v1134_v50  ;;  %v1159_v57 = vsel %vm1141_vm15, %v1130_v44, %v1151_v49  ;;  %1891 = vmatprep.subr.bf16.mxu0 %v2887_v2  ;;  %v3442_v36 = vrot.slane %v1410_v22, %v3378_v53 }
 0x316   : > { %v1160_v56 = vsel %vm1142_vm1, %v1132_v47, %v1152_v52  ;;  %v1435_v41 = vrot.slane %v1430_v26, %v3376_v51  ;;  %v1386_v49 = vunpack.c.l.bf16 %v3392_v42 }
 0x317   : > { %v1161_v58 = vsel %vm1143_vm2, %v1134_v50, %v1153_v54  ;;  %v1164_v59 = vpack.c.bf16 %v1160_v56, %v1158_v55  ;;  %v1458_v50 = vstv %s2211_s25  ;;  %v1387_v55 = vunpack.c.h.bf16 %v3390_v38 }
 0x318   : > { %v1165_v60 = vpack.c.bf16 %v1161_v58, %v1159_v57  ;;  %1892 = vmatpush1.bf16.msra.mxu0 %v2505_v9  ;;  %v1388_v38 = vunpack.c.h.bf16 %v3392_v42 }
 0x319   : > { %1893 = vmatprep.subr.bf16.mxu0 %v2887_v2 }
 0x31a   : > { %2210 = vmatprep.mubr.msk.bf16.mxu0 %vm1076_vm3, %v1165_v60 }
 0x31b   : > { %1371 = vmatmul.mubr.bf16.gmra.mrb[12].mxu0 %v1164_v59 }
 0x31c   : > { %1894 = vmatpush1.bf16.msra.mxu0 %v2506_v10 }
 0x31d   : > { %1895 = vmatprep.subr.bf16.mxu0 %v2887_v2 }
 0x320   : > { %1896 = vmatpush1.bf16.msra.mxu0 %v2507_v12 }
 0x321   : > { %1897 = vmatprep.subr.bf16.mxu0 %v2887_v2 }
 0x324   : > { %1898 = vmatpush1.bf16.msra.mxu0 %v2508_v13 }
 0x325   : > { %1899 = vmatprep.subr.bf16.mxu0 %v2887_v2 }
 0x328   : > { %1900 = vmatpush1.bf16.msra.mxu0 %v2509_v15 }
 0x329   : > { %1901 = vmatprep.subr.bf16.mxu0 %v2887_v2 }
 0x32c   : > { %1902 = vmatpush1.bf16.msra.mxu0 %v2510_v16 }
 0x32d   : > { %1903 = vmatprep.subr.bf16.mxu0 %v2887_v2 }
 0x330   : > { %1904 = vmatpush1.bf16.msra.mxu0 %v2511_v17 }
 0x331   : > { %1905 = vmatprep.subr.bf16.mxu0 %v2887_v2 }
 0x3e6   : > { %v1362_v21 = vpop.f32.mrb[8].mxu0 }
 0x3e7   : > { %v1363_v23 = vadd.f32 %v1362_v21, %v1195_v19  ;;  %v1364_v25 = vpop.f32.mrb[9].mxu0 }
 0x3e8   : > { %v1365_v27 = vadd.f32 %v1364_v25, %v1199_v20  ;;  %v1366_v29 = vpop.f32.mrb[10].mxu0 }
 0x3e9   : > { %v1389_v30 = vadd.f32 %v1381_v24, %v1363_v23  ;;  %v1367_v32 = vadd.f32 %v1366_v29, %v1195_v19  ;;  %v1368_v34 = vpop.f32.mrb[11].mxu0 }
 0x3ea   : > { %v1390_v35 = vadd.f32 %v1382_v28, %v1365_v27  ;;  %v1369_v37 = vadd.f32 %v1368_v34, %v1199_v20 }
 0x3eb   : > { %v1397_v40 = vmul.f32 0.5, %v1389_v30  ;;  %v1391_v43 = vadd.f32 %v1383_v33, %v1367_v32 }
 0x3ec   : > { %v1398_v44 = vmul.f32 0.5, %v1390_v35  ;;  %v1392_v46 = vadd.f32 %v1384_v39, %v1369_v37 }
 0x3ed   : > { %v1422_v47 = vmul.f32 %v3438_v31, %v1397_v40  ;;  %v1399_v48 = vmul.f32 0.5, %v1391_v43 }
 0x3ee   : > { %v1423_v52 = vmul.f32 %v3442_v36, %v1398_v44  ;;  %v1400_v54 = vmul.f32 0.5, %v1392_v46  ;;  %v1372_v14 = vpop.f32.mrb[12].mxu0 }
 0x3ef   : > { %v1442_v56 = vadd.f32 %v1435_v41, %v1422_v47  ;;  %v3452_v57 = vpack.c.bf16 %v1399_v48, %v1397_v40  ;;  %v1424_v58 = vmul.f32 %v3438_v31, %v1399_v48  ;;  %v1373_v59 = vadd.f32 %v1372_v14, %v1195_v19  ;;  %v1374_v60 = vpop.f32.mrb[13].mxu0 }
 0x3f0   : > { %v1443_v61 = vadd.f32 %v1439_v45, %v1423_v52  ;;  %v3455_v62 = vpack.c.bf16 %v1400_v54, %v1398_v44  ;;  %v1425_v63 = vmul.f32 %v3442_v36, %v1400_v54  ;;  %v1375_v0 = vadd.f32 %v1374_v60, %v1199_v20  ;;  %v1376_v1 = vpop.f32.mrb[14].mxu0  ;;  %v2515_v52 = vld [vmem:[%s3537_s16 + $0x58] sm:$0xff]   ;;  %v1503_v54 = vld [vmem:[#allocation20] sm:$0x3] }
 0x3f1   : > { %vm1450_vm4 = vcmp.gt.f32.partialorder %v1442_v56, 0.0  ;;  %v1444_v3 = vadd.f32 %v1435_v41, %v1424_v58  ;;  %v1393_v4 = vadd.f32 %v1385_v11, %v1373_v59  ;;  %v1378_v5 = vpop.f32.mrb[15].mxu0  ;;  %v1459_v6 = vmul.f32 %v1458_v50, %v1442_v56 }
 0x3f2   : > { %v1445_v7 = vadd.f32 %v1439_v45, %v1425_v63  ;;  %v1394_v8 = vadd.f32 %v1386_v49, %v1375_v0  ;;  %v1377_v9 = vadd.f32 %v1376_v1, %v1195_v19  ;;  %v1460_v10 = vmul.f32 %v1458_v50, %v1443_v61 }
 0x3f3   : > { %vm1452_vm5 = vcmp.gt.f32.partialorder %v1444_v3, 0.0  ;;  %v1461_v12 = vmul.f32 %v1458_v50, %v1444_v3  ;;  %v1401_v13 = vmul.f32 0.5, %v1393_v4  ;;  %v1379_v18 = vadd.f32 %v1378_v5, %v1199_v20 }
 0x3f4   : > { %v1462_v15 = vmul.f32 %v1458_v50, %v1445_v7  ;;  %v1402_v16 = vmul.f32 0.5, %v1394_v8  ;;  %v1395_v17 = vadd.f32 %v1387_v55, %v1377_v9  ;;  %vm1451_vm6 = vcmp.gt.f32.partialorder %v1443_v61, 0.0  ;;  %v1711_v55 = vld [vmem:[%s3535_s14] sm:$0x3] }
 0x3f5   : > { %v1469_v21 = vsel %vm1452_vm5, %v1444_v3, %v1461_v12  ;;  %v1426_v22 = vmul.f32 %v3438_v31, %v1401_v13  ;;  %vm1453_vm7 = vcmp.gt.f32.partialorder %v1445_v7, 0.0  ;;  %v1467_v23 = vsel %vm1450_vm4, %v1442_v56, %v1459_v6 }
 0x3f6   : > { %v1427_v42 = vmul.f32 %v3442_v36, %v1402_v16  ;;  %v1403_v24 = vmul.f32 0.5, %v1395_v17  ;;  %v1396_v25 = vadd.f32 %v1388_v38, %v1379_v18  ;;  %v1468_v26 = vsel %vm1451_vm6, %v1443_v61, %v1460_v10 }
 0x3f7   : > { %v1446_v19 = vadd.f32 %v1435_v41, %v1426_v22  ;;  %v1470_v27 = vsel %vm1453_vm7, %v1445_v7, %v1462_v15  ;;  %v1475_v28 = vpack.c.bf16 %v1469_v21, %v1467_v23  ;;  %v1508_v14 = vrot.slane %v1503_v54, %v3376_v51 }
 0x3f8   : > { %v1447_v29 = vadd.f32 %v1439_v45, %v1427_v42  ;;  %v3462_v30 = vpack.c.bf16 %v1403_v24, %v1401_v13  ;;  %v1428_v20 = vmul.f32 %v3438_v31, %v1403_v24  ;;  %v1404_v32 = vmul.f32 0.5, %v1396_v25 }
 0x3f9   : > { %v1476_v33 = vpack.c.bf16 %v1470_v27, %v1468_v26  ;;  %v1463_v39 = vmul.f32 %v1458_v50, %v1446_v19  ;;  %vm1454_vm8 = vcmp.gt.f32.partialorder %v1446_v19, 0.0  ;;  %v1512_v56 = vrot.slane %v1503_v54, %v3378_v53 }
 0x3fa   : > { %v1448_v34 = vadd.f32 %v1435_v41, %v1428_v20  ;;  %v3465_v35 = vpack.c.bf16 %v1404_v32, %v1402_v16  ;;  %v1429_v37 = vmul.f32 %v3442_v36, %v1404_v32  ;;  %v1464_v40 = vmul.f32 %v1458_v50, %v1447_v29  ;;  %v2512_v36 = vld [vmem:[%s3537_s16 + $0x40] sm:$0xff]  }
 0x3fb   : > { %2236 = vmatprep.mubr.msk.bf16.mxu1 %vm1076_vm3, %v1476_v33  ;;  %vm1455_vm10 = vcmp.gt.f32.partialorder %v1447_v29, 0.0  ;;  %v1471_v31 = vsel %vm1454_vm8, %v1446_v19, %v1463_v39  ;;  %1906 = vmatpush1.bf16.msra.mxu0 %v2512_v36  ;;  %v1694_v60 = vunpack.c.l.bf16 %v3452_v57  ;;  %v1716_v61 = vrot.slane %v1711_v55, %v3376_v51 }
 0x3fc   : > { %v1449_v43 = vadd.f32 %v1439_v45, %v1429_v37  ;;  %1674 = vmatmul.mubr.bf16.vlgmr.msra.gmra.mrb[8].mxu1 %v1475_v28  ;;  %vm1456_vm9 = vcmp.gt.f32.partialorder %v1448_v34, 0.0  ;;  %v1465_v44 = vmul.f32 %v1458_v50, %v1448_v34  ;;  %v1472_v41 = vsel %vm1455_vm10, %v1447_v29, %v1464_v40  ;;  %1907 = vmatprep.subr.bf16.mxu0 %v2887_v2  ;;  %v2513_v45 = vld [vmem:[%s3537_s16 + $0x48] sm:$0xff]  }
 0x3fd   : > { %v1695_v1 = vunpack.c.l.bf16 %v3455_v62  ;;  %v1720_v3 = vrot.slane %v1711_v55, %v3378_v53  ;;  %v1696_v7 = vunpack.c.h.bf16 %v3452_v57  ;;  %v1697_v13 = vunpack.c.h.bf16 %v3455_v62 }
 0x3fe   : > { %v1466_v46 = vmul.f32 %v1458_v50, %v1449_v43  ;;  %vm1457_vm11 = vcmp.gt.f32.partialorder %v1449_v43, 0.0  ;;  %v1473_v47 = vsel %vm1456_vm9, %v1448_v34, %v1465_v44  ;;  %v2514_v50 = vld [vmem:[%s3537_s16 + $0x50] sm:$0xff]   ;;  %v1759_v17 = vstv %s2238_s23 }
 0x3ff   : > { %v1477_v48 = vpack.c.bf16 %v1473_v47, %v1471_v31  ;;  %1908 = vmatpush1.bf16.msra.mxu0 %v2513_v45  ;;  %v1698_v42 = vunpack.c.l.bf16 %v3462_v30  ;;  %v1700_v19 = vunpack.c.h.bf16 %v3462_v30 }
 0x400   : > { %v1474_v11 = vsel %vm1457_vm11, %v1449_v43, %v1466_v46  ;;  %1909 = vmatprep.subr.bf16.mxu0 %v2887_v2 }
 0x401   : > { %v1478_v49 = vpack.c.bf16 %v1474_v11, %v1472_v41 }
 0x403   : > { %2237 = vmatprep.mubr.msk.bf16.mxu1 %vm1076_vm3, %v1478_v49  ;;  %1910 = vmatpush1.bf16.msra.mxu0 %v2514_v50 }
 0x404   : > { %1684 = vmatmul.mubr.bf16.gmra.mrb[12].mxu1 %v1477_v48  ;;  %1911 = vmatprep.subr.bf16.mxu0 %v2887_v2  ;;  %v1731_v2 = vld [vmem:[%s3573_s21] sm:$0x3] }
 0x405   : > { %v1736_v38 = vrot.slane %v1731_v2, %v3376_v51  ;;  %v1740_v10 = vrot.slane %v1731_v2, %v3378_v53  ;;  %v1699_v51 = vunpack.c.l.bf16 %v3465_v35  ;;  %v1701_v53 = vunpack.c.h.bf16 %v3465_v35 }
 0x407   : > { %1912 = vmatpush1.bf16.msra.mxu0 %v2515_v52 }
 0x4cf   : > { %v1675_v58 = vpop.f32.mrb[8].mxu1 }
 0x4d0   : > { %v1676_v59 = vadd.f32 %v1675_v58, %v1508_v14  ;;  %v1677_v63 = vpop.f32.mrb[9].mxu1 }
 0x4d1   : > { %v1678_v0 = vadd.f32 %v1677_v63, %v1512_v56  ;;  %v1679_v4 = vpop.f32.mrb[10].mxu1 }
 0x4d2   : > { %v1702_v5 = vadd.f32 %v1694_v60, %v1676_v59  ;;  %v1680_v6 = vadd.f32 %v1679_v4, %v1508_v14  ;;  %v1681_v8 = vpop.f32.mrb[11].mxu1 }
 0x4d3   : > { %v1703_v9 = vadd.f32 %v1695_v1, %v1678_v0  ;;  %v1682_v12 = vadd.f32 %v1681_v8, %v1512_v56 }
 0x4d4   : > { %v1723_v15 = vmul.f32 %v1716_v61, %v1702_v5  ;;  %v1704_v16 = vadd.f32 %v1696_v7, %v1680_v6  ;;  %v2239_v5 = vld [vmem:[%s3574_s8] ss:$0 sm:$0xff] }
 0x4d5   : > { %v1724_v18 = vmul.f32 %v1720_v3, %v1703_v9  ;;  %v1705_v21 = vadd.f32 %v1697_v13, %v1682_v12 }
 0x4d6   : > { %v1743_v22 = vadd.f32 %v1736_v38, %v1723_v15  ;;  %v1725_v23 = vmul.f32 %v1716_v61, %v1704_v16 }
 0x4d7   : > { %v1744_v24 = vadd.f32 %v1740_v10, %v1724_v18  ;;  %v1726_v57 = vmul.f32 %v1720_v3, %v1705_v21  ;;  %v1685_v25 = vpop.f32.mrb[12].mxu1 }
 0x4d8   : > { %vm1751_vm12 = vcmp.gt.f32.partialorder %v1743_v22, 0.0  ;;  %v1760_v62 = vmul.f32 %v1759_v17, %v1743_v22  ;;  %v1745_v26 = vadd.f32 %v1736_v38, %v1725_v23  ;;  %v1686_v27 = vadd.f32 %v1685_v25, %v1508_v14  ;;  %v1687_v28 = vpop.f32.mrb[13].mxu1 }
 0x4d9   : > { %v1761_v29 = vmul.f32 %v1759_v17, %v1744_v24  ;;  %v1746_v20 = vadd.f32 %v1740_v10, %v1726_v57  ;;  %v1688_v32 = vadd.f32 %v1687_v28, %v1512_v56  ;;  %v1689_v33 = vpop.f32.mrb[14].mxu1  ;;  %vm1752_vm13 = vcmp.gt.f32.partialorder %v1744_v24, 0.0 }
 0x4da   : > { %v1768_v34 = vsel %vm1751_vm12, %v1743_v22, %v1760_v62  ;;  %vm1753_vm14 = vcmp.gt.f32.partialorder %v1745_v26, 0.0  ;;  %v1762_v37 = vmul.f32 %v1759_v17, %v1745_v26  ;;  %v1706_v39 = vadd.f32 %v1698_v42, %v1686_v27  ;;  %v1691_v40 = vpop.f32.mrb[15].mxu1 }
 0x4db   : > { %v1763_v43 = vmul.f32 %v1759_v17, %v1746_v20  ;;  %v1707_v44 = vadd.f32 %v1699_v51, %v1688_v32  ;;  %v1690_v30 = vadd.f32 %v1689_v33, %v1508_v14  ;;  %v1692_v46 = vadd.f32 %v1691_v40, %v1512_v56 }
 0x4dc   : > { %v1770_v35 = vsel %vm1753_vm14, %v1745_v26, %v1762_v37  ;;  %v1727_v31 = vmul.f32 %v1716_v61, %v1706_v39  ;;  %vm1754_vm15 = vcmp.gt.f32.partialorder %v1746_v20, 0.0  ;;  %v1769_v47 = vsel %vm1752_vm13, %v1744_v24, %v1761_v29 }
 0x4dd   : > { %v1728_v48 = vmul.f32 %v1720_v3, %v1707_v44  ;;  %v1708_v41 = vadd.f32 %v1700_v19, %v1690_v30  ;;  %v1709_v11 = vadd.f32 %v1701_v53, %v1692_v46  ;;  %v1771_v49 = vsel %vm1754_vm15, %v1746_v20, %v1763_v43 }
 0x4de   : > { %v1747_v36 = vadd.f32 %v1736_v38, %v1727_v31  ;;  %v1777_v45 = vpack.c.bf16 %v1771_v49, %v1769_v47  ;;  %v1776_v50 = vpack.c.bf16 %v1770_v35, %v1768_v34 }
 0x4df   : > { %v1748_v52 = vadd.f32 %v1740_v10, %v1728_v48  ;;  %v1729_v54 = vmul.f32 %v1716_v61, %v1708_v41  ;;  %v1730_v55 = vmul.f32 %v1720_v3, %v1709_v11 }
 0x4e0   : > { %2252 = vmatprep.mubr.msk.bf16.mxu0 %vm1076_vm3, %v1777_v45  ;;  %v1764_v56 = vmul.f32 %v1759_v17, %v1747_v36  ;;  %vm1755_vm4 = vcmp.gt.f32.partialorder %v1747_v36, 0.0 }
 0x4e1   : > { %v1765_v58 = vmul.f32 %v1759_v17, %v1748_v52  ;;  %v1749_v2 = vadd.f32 %v1736_v38, %v1729_v54  ;;  %v1750_v14 = vadd.f32 %v1740_v10, %v1730_v55  ;;  %1922 = vmatmul.mubr.bf16.vlgmr.msra.gmra.mrb[16].mxu0 %v1776_v50  ;;  %vm1756_vm1 = vcmp.gt.f32.partialorder %v1748_v52, 0.0 }
 0x4e2   : > { %v1772_v4 = vsel %vm1755_vm4, %v1747_v36, %v1764_v56 }
 0x4e3   : > { %v1767_v59 = vmul.f32 %v1759_v17, %v1750_v14  ;;  %vm1758_vm2 = vcmp.gt.f32.partialorder %v1750_v14, 0.0  ;;  %vm1757_vm5 = vcmp.gt.f32.partialorder %v1749_v2, 0.0  ;;  %v1766_v60 = vmul.f32 %v1759_v17, %v1749_v2 }
 0x4e4   : > { %v1773_v63 = vsel %vm1756_vm1, %v1748_v52, %v1765_v58 }
 0x4e5   : > { %v1775_v0 = vsel %vm1758_vm2, %v1750_v14, %v1767_v59  ;;  %v1774_v61 = vsel %vm1757_vm5, %v1749_v2, %v1766_v60 }
 0x4e6   : > { %v1779_v1 = vpack.c.bf16 %v1775_v0, %v1773_v63  ;;  %v1778_v3 = vpack.c.bf16 %v1774_v61, %v1772_v4 }
 0x4e8   : > { %2253 = vmatprep.mubr.msk.bf16.mxu0 %vm1076_vm3, %v1779_v1 }
 0x4e9   : > { %1930 = vmatmul.mubr.bf16.gmra.mrb[20].mxu0 %v1778_v3 }
 0x5b4   : > { %v1923_v38 = vpop.f32.mrb[16].mxu0 }
 0x5b5   : > { %v1924_v6 = vadd.f32 %v2239_v5, %v1923_v38  ;;  %v1925_v7 = vpop.f32.mrb[17].mxu0 }
 0x5b6   : > { %v1926_v8 = vpop.f32.mrb[18].mxu0 }
 0x5b7   : > { %1938 = vst.msk [vmem:[%s733_s15] sm:$0xff] %vm786_vm0, %v1924_v6  ;;  %v1927_v9 = vadd.f32 %v2239_v5, %v1926_v8  ;;  %v1928_v10 = vpop.f32.mrb[19].mxu0 }
 0x5b9   : > { %1939 = vst.msk [vmem:[%s733_s15 + $0x8] sm:$0xff] %vm786_vm0, %v1927_v9 }
 0x5bc   : > { %v1931_v12 = vpop.f32.mrb[20].mxu0 }
 0x5bd   : > { %v1932_v13 = vadd.f32 %v2239_v5, %v1931_v12  ;;  %v1933_v15 = vpop.f32.mrb[21].mxu0 }
 0x5be   : > { %v1934_v16 = vpop.f32.mrb[22].mxu0 }
 0x5bf   : > { %1940 = vst.msk [vmem:[%s733_s15 + $0x10] sm:$0xff] %vm786_vm0, %v1932_v13  ;;  %v1935_v17 = vadd.f32 %v2239_v5, %v1934_v16  ;;  %v1936_v18 = vpop.f32.mrb[23].mxu0 }
 0x5c1   : > { %1941 = vst.msk [vmem:[%s733_s15 + $0x18] sm:$0xff] %vm786_vm0, %v1935_v17 }
 0x5c2 PF: > { %s35_s27 = sadd.s32 1, %s2871_s27  }
 0x5c3   : > { %p32_p7 = scmp.ge.s32.totalorder %s35_s27, 4  }
 0x5c5   :  { %34 = sbr.rel (!%p32_p7) target bundleno = 17 (0x11), region = 172 }
 0x5cc   :  { %1964 = vsyncpa [#allocation3], 1 }
 0x5cd   :  { %1966 = vsyncpa [#allocation3 + $0x1], 1 }
 0x5ce   :  { %1967 = vsyncpa [#allocation7], 1 }
 0x5cf   :  { %1968 = vsyncpa [#allocation10], 1 }
 0x5d0   :  { %1969 = vsyncpa [#allocation13], 1 }
 0x5d1   :  { %1970 = vsyncpa [#allocation16], 1 }
 0x5d2   :  { %1971 = vsyncpa [#allocation19], 1 }
 0x5d3   :  { %1972 = vsyncpa [#allocation4], 1 }
 0x5d4   :  { %1974 = vsyncpa [#allocation4 + $0x1], 1 }

</bundles_post_ra>
